<compile_context>
chip_gen: v5e
topology: v5e:2x2
jax: 0.10.0
libtpu: 0.0.40
codegen_flags: <defaults>
</compile_context>

<pallas_src>
import functools

import jax
import jax.numpy as jnp
from jax.experimental import pallas as pl
from jax.experimental.pallas import tpu as pltpu

_SQRT1_2 = 0.7071067811865476
_LN_EPS = 1e-5


# ----------------------------- in-kernel helpers -----------------------------

def _layernorm(x, g, b, eps=_LN_EPS):
    mu = jnp.mean(x, axis=-1, keepdims=True)
    xc = x - mu
    var = jnp.mean(xc * xc, axis=-1, keepdims=True)
    return xc * jax.lax.rsqrt(var + eps) * g + b


def _erf_approx(x):
    # Abramowitz & Stegun 7.1.26 rational approximation, |err| < 1.5e-7.
    # Uses only abs/exp/mul/add/where so it lowers on every Mosaic version.
    ax = jnp.abs(x)
    t = 1.0 / (1.0 + 0.3275911 * ax)
    poly = t * (0.254829592 + t * (-0.284496736 + t * (1.421413741
              + t * (-1.453152027 + t * 1.061405429))))
    e = 1.0 - poly * jnp.exp(-ax * ax)
    return jnp.where(x < 0.0, -e, e)


def _gelu(x):
    # matches torch.nn.GELU (exact erf) up to <1.5e-7 from the erf approximation
    return 0.5 * x * (1.0 + _erf_approx(x * _SQRT1_2))


def _mha(x, qkv_w, proj_w, proj_b, *, num_heads, exact_softmax):
    """Multi-head self-attention on a VMEM-resident (N, D) tile.

    qkv_w already contains the softmax scale folded into its Q columns and is
    stored in the matmul dtype (bf16 fast path / f32 check path)."""
    N, D = x.shape
    hd = D // num_heads
    mm = qkv_w.dtype
    qkv = jnp.dot(x.astype(mm), qkv_w, preferred_element_type=jnp.float32)   # (N, 3D)

    def heads(base):  # (N, 3D) columns -> (H, N, hd) without a 3-D transpose
        return jnp.stack([qkv[:, base + h * hd: base + (h + 1) * hd]
                          for h in range(num_heads)], axis=0).astype(mm)

    q = heads(0)            # scale already folded into weights
    k = heads(D)
    v = heads(2 * D)

    s = jnp.einsum("hqd,hkd->hqk", q, k,
                   preferred_element_type=jnp.float32)                       # (H, N, N)
    s = s - jnp.max(s, axis=-1, keepdims=True)
    p = jnp.exp(s)
    denom = jnp.sum(p, axis=-1, keepdims=True)
    if exact_softmax:
        p = p / denom
    else:
        p = p * pl.reciprocal(denom, approx=True)                            # EUP slot
    ctx = jnp.einsum("hqk,hkd->hqd", p.astype(mm), v,
                     preferred_element_type=jnp.float32)                     # (H, N, hd)
    ctx = jnp.concatenate([ctx[h] for h in range(num_heads)], axis=-1)       # (N, D)
    return jnp.dot(ctx.astype(mm), proj_w,
                   preferred_element_type=jnp.float32) + proj_b


def _mlp(x, fc1_w, fc1_b, fc2_w, fc2_b):
    mm = fc1_w.dtype
    h = jnp.dot(x.astype(mm), fc1_w, preferred_element_type=jnp.float32) + fc1_b
    h = _gelu(h)
    return jnp.dot(h.astype(mm), fc2_w, preferred_element_type=jnp.float32) + fc2_b


# ----------------------------- Pallas kernels ------------------------------

def _patch_embed_kernel(x_ref, w_ref, b_ref, pos_ref, o_ref):
    # x_ref: (1, C, N) channels-first tile -> (N, C) in VMEM, then 1x1-conv ==
    # per-token linear fused with conv bias + positional embedding.
    mm = w_ref.dtype
    xnc = jnp.transpose(x_ref[0])                                            # (N, C) f32
    tok = jnp.dot(xnc.astype(mm), w_ref[...],
                  preferred_element_type=jnp.float32)                        # (N, D)
    o_ref[...] = tok + b_ref[...] + pos_ref[...]


def _m2stack_kernel(h_ref, ln1_g, ln1_b, qkv_w, proj_w, proj_b,
                    ln2_g, ln2_b, fc1_w, fc1_b, fc2_w, fc2_b,
                    o_ref, h_acc, *, num_heads, exact_softmax):
    # grid = (B, L): one transformer layer per step; h_acc (VMEM scratch) carries the
    # hidden state across the layer axis, so h only touches HBM at l==0 / l==L-1.
    l = pl.program_id(1)

    @pl.when(l == 0)
    def _load_h():
        h_acc[...] = h_ref[...]

    h = h_acc[...]                                                           # (N, D) f32
    h = h + _mha(_layernorm(h, ln1_g[0], ln1_b[0]),
                 qkv_w[0], proj_w[0], proj_b[0],
                 num_heads=num_heads, exact_softmax=exact_softmax)
    h = h + _mlp(_layernorm(h, ln2_g[0], ln2_b[0]),
                 fc1_w[0], fc1_b[0], fc2_w[0], fc2_b[0])
    h_acc[...] = h

    @pl.when(l == pl.num_programs(1) - 1)
    def _store_h():
        o_ref[...] = h


def _patch_unembed_kernel(h_ref, w_ref, b_ref, o_ref):
    # out[c, n] = sum_d W_prep[c, d] * h[n, d]  (trans_b contraction -> (C_out, N)
    # written directly, no transpose of the result, no host-side NCHW transpose).
    mm = w_ref.dtype
    y = jax.lax.dot_general(w_ref[...], h_ref[...].astype(mm),
                            dimension_numbers=(((1,), (1,)), ((), ())),
                            preferred_element_type=jnp.float32)              # (C_out, N)
    o_ref[0] = y + b_ref[...]


# ----------------------------- kernel wrappers ------------------------------

def pallas_patch_embed(x_cn, pe_w, pe_b, pos):
    B, C, N = x_cn.shape
    D = pe_w.shape[1]
    return pl.pallas_call(
        _patch_embed_kernel,
        out_shape=jax.ShapeDtypeStruct((B * N, D), jnp.float32),
        grid=(B,),
        in_specs=[pl.BlockSpec((1, C, N), lambda b: (b, 0, 0)),
                  pl.BlockSpec((C, D), lambda b: (0, 0)),
                  pl.BlockSpec((1, D), lambda b: (0, 0)),
                  pl.BlockSpec((N, D), lambda b: (0, 0))],
        out_specs=pl.BlockSpec((N, D), lambda b: (b, 0)),
        compiler_params=pltpu.CompilerParams(dimension_semantics=("parallel",)),
    )(x_cn, pe_w, pe_b, pos)


def pallas_m2block_stack(h, prep, *, B, N, num_heads, exact_softmax):
    D = h.shape[-1]
    L = prep["qkv_w"].shape[0]
    Hf = prep["fc1_w"].shape[-1]
    kernel = functools.partial(_m2stack_kernel, num_heads=num_heads,
                               exact_softmax=exact_softmax)

    row = pl.BlockSpec((N, D), lambda b, l: (b, 0))

    def per_layer(*shape):
        return pl.BlockSpec((1,) + shape, lambda b, l: (l,) + (0,) * len(shape))

    return pl.pallas_call(
        kernel,
        out_shape=jax.ShapeDtypeStruct((B * N, D), jnp.float32),
        grid=(B, L),
        in_specs=[row,
                  per_layer(1, D), per_layer(1, D),
                  per_layer(D, 3 * D), per_layer(D, D), per_layer(1, D),
                  per_layer(1, D), per_layer(1, D),
                  per_layer(D, Hf), per_layer(1, Hf),
                  per_layer(Hf, D), per_layer(1, D)],
        out_specs=row,
        scratch_shapes=[pltpu.VMEM((N, D), jnp.float32)],
        compiler_params=pltpu.CompilerParams(
            dimension_semantics=("parallel", "arbitrary"),
            vmem_limit_bytes=32 * 1024 * 1024),
    )(h, prep["ln1_g"], prep["ln1_b"], prep["qkv_w"], prep["proj_w"],
      prep["proj_b"], prep["ln2_g"], prep["ln2_b"], prep["fc1_w"],
      prep["fc1_b"], prep["fc2_w"], prep["fc2_b"])


def pallas_patch_unembed(h, pu_w, pu_b, *, B, N):
    D = h.shape[-1]
    Co = pu_w.shape[0]
    return pl.pallas_call(
        _patch_unembed_kernel,
        out_shape=jax.ShapeDtypeStruct((B, Co, N), jnp.float32),
        grid=(B,),
        in_specs=[pl.BlockSpec((N, D), lambda b: (b, 0)),
                  pl.BlockSpec((Co, D), lambda b: (0, 0)),
                  pl.BlockSpec((Co, 1), lambda b: (0, 0))],
        out_specs=pl.BlockSpec((1, Co, N), lambda b: (b, 0, 0)),
        compiler_params=pltpu.CompilerParams(dimension_semantics=("parallel",)),
    )(h, pu_w, pu_b)


# ----------------------------- parameters ------------------------------

def init_params(key, *, in_chans, embed_dim, out_chans, img_sz, patch_size,
                m2block_n, hidden_features):
    """Parameters in PyTorch layout ((out, in) linear weights, conv weight tensors)."""
    N = (img_sz // patch_size) ** 2
    keys = iter(jax.random.split(key, 8 + 8 * m2block_n))

    def lin(fan_in, shape):
        return jax.random.normal(next(keys), shape, jnp.float32) / jnp.sqrt(float(fan_in))

    p = {
        "pe_w": lin(in_chans, (embed_dim, in_chans, 1, 1)),    # Conv2d(in, D, 1, 1)
        "pe_b": lin(in_chans, (embed_dim,)),
        # zeros in the module; random here so the pos-embed add is actually exercised
        "pos": 0.02 * jax.random.normal(next(keys), (1, N, embed_dim), jnp.float32),
        "layers": [],
    }
    for _ in range(m2block_n):
        p["layers"].append(dict(
            ln1_g=jnp.ones((embed_dim,), jnp.float32),
            ln1_b=jnp.zeros((embed_dim,), jnp.float32),
            qkv_w=lin(embed_dim, (3 * embed_dim, embed_dim)),      # nn.Linear, bias=False
            proj_w=lin(embed_dim, (embed_dim, embed_dim)),
            proj_b=lin(embed_dim, (embed_dim,)),
            ln2_g=jnp.ones((embed_dim,), jnp.float32),
            ln2_b=jnp.zeros((embed_dim,), jnp.float32),
            fc1_w=lin(embed_dim, (hidden_features, embed_dim)),
            fc1_b=lin(embed_dim, (hidden_features,)),
            fc2_w=lin(hidden_features, (embed_dim, hidden_features)),
            fc2_b=lin(hidden_features, (embed_dim,)),
        ))
    p["pu_w"] = lin(embed_dim, (embed_dim, out_chans, 1, 1))       # ConvTranspose2d(D, out, 1, 1)
    p["pu_b"] = lin(embed_dim, (out_chans,))
    return p


def prepare_params(params, *, num_heads, weight_dtype=jnp.bfloat16):
    """One-time layout conversion: (in, out) weights in the matmul dtype, 2-D f32
    biases / LN params, per-layer weights stacked along a leading L axis, softmax
    scale folded into the Q columns of qkv_w."""
    D = params["pe_w"].shape[0]
    scale = (D // num_heads) ** (-0.5)
    wd = weight_dtype
    layers = params["layers"]

    def row(v):
        return v.reshape(1, -1)

    def stack(fn):
        return jnp.stack([fn(l) for l in layers], axis=0)

    def qkv_scaled(l):
        w = l["qkv_w"].T                                             # (D, 3D)
        return jnp.concatenate([w[:, :D] * scale, w[:, D:]], axis=1)

    return {
        "pe_w": params["pe_w"][:, :, 0, 0].T.astype(wd),             # (C, D)
        "pe_b": row(params["pe_b"]),                                 # (1, D)  f32
        "pos":  params["pos"][0],                                    # (N, D)  f32
        "pu_w": params["pu_w"][:, :, 0, 0].T.astype(wd),             # (C_out, D)
        "pu_b": params["pu_b"].reshape(-1, 1),                       # (C_out, 1) f32
        "ln1_g": stack(lambda l: row(l["ln1_g"])),                   # (L, 1, D)
        "ln1_b": stack(lambda l: row(l["ln1_b"])),
        "qkv_w": stack(qkv_scaled).astype(wd),                       # (L, D, 3D)
        "proj_w": stack(lambda l: l["proj_w"].T).astype(wd),         # (L, D, D)
        "proj_b": stack(lambda l: row(l["proj_b"])),                 # (L, 1, D)
        "ln2_g": stack(lambda l: row(l["ln2_g"])),
        "ln2_b": stack(lambda l: row(l["ln2_b"])),
        "fc1_w": stack(lambda l: l["fc1_w"].T).astype(wd),           # (L, D, Hf)
        "fc1_b": stack(lambda l: row(l["fc1_b"])),                   # (L, 1, Hf)
        "fc2_w": stack(lambda l: l["fc2_w"].T).astype(wd),           # (L, Hf, D)
        "fc2_b": stack(lambda l: row(l["fc2_b"])),                   # (L, 1, D)
    }


# ----------------------------- forward (Pallas) ------------------------------

def transformer_block_pallas(x, prep, *, num_heads, exact_softmax=False):
    B, C, H, W = x.shape
    N = H * W
    h = pallas_patch_embed(x.reshape(B, C, N), prep["pe_w"], prep["pe_b"],
                           prep["pos"])                                      # (B*N, D)
    h = pallas_m2block_stack(h, prep, B=B, N=N, num_heads=num_heads,
                             exact_softmax=exact_softmax)                    # (B*N, D)
    y = pallas_patch_unembed(h, prep["pu_w"], prep["pu_b"], B=B, N=N)        # (B, C_out, N)
    return y.reshape(B, -1, H, W)


# ----------------------------- pure-JAX reference ------------------------------

def _ln_ref(x, g, b, eps=_LN_EPS):
    mu = jnp.mean(x, axis=-1, keepdims=True)
    var = jnp.mean((x - mu) ** 2, axis=-1, keepdims=True)
    return (x - mu) * jax.lax.rsqrt(var + eps) * g + b


def transformer_block_ref(x, params, *, num_heads):
    B, C, H, W = x.shape
    N = H * W
    D = params["pe_w"].shape[0]
    hd = D // num_heads
    scale = hd ** (-0.5)

    tok = x.reshape(B, C, N).transpose(0, 2, 1)                              # (B, N, C)
    h = tok @ params["pe_w"][:, :, 0, 0].T + params["pe_b"] + params["pos"]

    for layer in params["layers"]:
        ln = _ln_ref(h, layer["ln1_g"], layer["ln1_b"])
        qkv = ln @ layer["qkv_w"].T
        qkv = qkv.reshape(B, N, 3, num_heads, hd).transpose(2, 0, 3, 1, 4)
        q, k, v = qkv[0], qkv[1], qkv[2]
        attn = jax.nn.softmax(jnp.einsum("bhqd,bhkd->bhqk", q, k) * scale, axis=-1)
        a = jnp.einsum("bhqk,bhkd->bhqd", attn, v).transpose(0, 2, 1, 3).reshape(B, N, D)
        h = h + a @ layer["proj_w"].T + layer["proj_b"]

        ln = _ln_ref(h, layer["ln2_g"], layer["ln2_b"])
        m = ln @ layer["fc1_w"].T + layer["fc1_b"]
        m = 0.5 * m * (1.0 + jax.lax.erf(m * _SQRT1_2))
        h = h + m @ layer["fc2_w"].T + layer["fc2_b"]

    y = h @ params["pu_w"][:, :, 0, 0] + params["pu_b"]                      # (B, N, C_out)
    out_chans = params["pu_w"].shape[1]
    return y.transpose(0, 2, 1).reshape(B, out_chans, H, W)


# ----------------------------- main ------------------------------

if __name__ == "__main__":
    B = 2
    IN_CHANS = 32
    EMBED_DIM = 64
    OUT_CHANS = 32
    IMG_SZ = 8            # -> N = 64 tokens
    PATCH = 1
    NUM_HEADS = 4         # head_dim = 16, scale = 0.25 (power of two -> exact fold)
    HIDDEN = 128
    M2BLOCK_N = 3

    key = jax.random.PRNGKey(0)
    kx, kp = jax.random.split(key)
    x = jax.random.normal(kx, (B, IN_CHANS, IMG_SZ, IMG_SZ), jnp.float32)
    params = init_params(kp, in_chans=IN_CHANS, embed_dim=EMBED_DIM,
                         out_chans=OUT_CHANS, img_sz=IMG_SZ, patch_size=PATCH,
                         m2block_n=M2BLOCK_N, hidden_features=HIDDEN)

    ref = jax.block_until_ready(transformer_block_ref(x, params, num_heads=NUM_HEADS))

    # f32 weights + exact softmax division: tight correctness check of the fused kernels.
    prep_f32 = prepare_params(params, num_heads=NUM_HEADS, weight_dtype=jnp.float32)
    fwd_f32 = jax.jit(functools.partial(transformer_block_pallas,
                                        num_heads=NUM_HEADS, exact_softmax=True))
    out_f32 = jax.block_until_ready(fwd_f32(x, prep_f32))
    assert out_f32.shape == (B, OUT_CHANS, IMG_SZ, IMG_SZ)
    err_f32 = float(jnp.max(jnp.abs(out_f32 - ref)))
    assert err_f32 < 2e-3, err_f32

    # bf16 pre-cast weights + approx-reciprocal softmax: MXU fast path (v5e/v6e/v7x).
    # Loose, magnitude-scaled sanity bound — the tight check is the f32 path above.
    prep_bf16 = prepare_params(params, num_heads=NUM_HEADS, weight_dtype=jnp.bfloat16)
    fwd_bf16 = jax.jit(functools.partial(transformer_block_pallas,
                                         num_heads=NUM_HEADS, exact_softmax=False))
    out_bf16 = jax.block_until_ready(fwd_bf16(x, prep_bf16))
    err_bf16 = float(jnp.max(jnp.abs(out_bf16 - ref)))
    ref_scale = float(jnp.max(jnp.abs(ref)))
    assert err_bf16 < 0.05 * ref_scale + 0.1, (err_bf16, ref_scale)

    print("KERNEL_OK")
</pallas_src>

<mosaic_0001>
module attributes {stable_mosaic.version = 11 : i64} {
  func.func @_patch_embed_kernel(%arg0: i32, %arg1: memref<1x32x64xf32, #tpu.memory_space<vmem>>, %arg2: memref<32x64xf32, #tpu.memory_space<vmem>>, %arg3: memref<1x64xf32, #tpu.memory_space<vmem>>, %arg4: memref<64x64xf32, #tpu.memory_space<vmem>>, %arg5: memref<64x64xf32, #tpu.memory_space<vmem>>) attributes {dimension_semantics = [#tpu.dimension_semantics<parallel>], iteration_bounds = array<i64: 2>, scalar_prefetch = 0 : i64, scratch_operands = 0 : i64, tpu.core_type = #tpu.core_type<tc>, window_params = [{transform_indices = @transform_0, window_bounds = array<i64: 1, 32, 64>}, {pipeline_mode = #tpu.pipeline_mode<synchronous>, transform_indices = @transform_1, window_bounds = array<i64: 32, 64>}, {pipeline_mode = #tpu.pipeline_mode<synchronous>, transform_indices = @transform_2, window_bounds = array<i64: 1, 64>}, {pipeline_mode = #tpu.pipeline_mode<synchronous>, transform_indices = @transform_3, window_bounds = array<i64: 64, 64>}, {transform_indices = @transform_4, window_bounds = array<i64: 64, 64>}]} {
    %c0 = arith.constant 0 : index
    %c0_0 = arith.constant 0 : index
    %c0_1 = arith.constant 0 : index
    %0 = vector.load %arg1[%c0, %c0_0, %c0_1] : memref<1x32x64xf32, #tpu.memory_space<vmem>>, vector<1x32x64xf32>
    %1 = vector.shape_cast %0 : vector<1x32x64xf32> to vector<32x64xf32>
    %2 = tpu.transpose %1, [1, 0] : vector<32x64xf32> -> vector<64x32xf32>
    %c0_2 = arith.constant 0 : index
    %c0_3 = arith.constant 0 : index
    %3 = vector.load %arg2[%c0_2, %c0_3] : memref<32x64xf32, #tpu.memory_space<vmem>>, vector<32x64xf32>
    %cst = arith.constant dense<0.000000e+00> : vector<64x64xf32>
    %4 = tpu.matmul %2, %3, %cst {dimension_numbers = #tpu.dot_dimension_numbers<[1], [0], [0], [1], [0, 0, 1, 1], [], []>} : vector<64x32xf32>, vector<32x64xf32>, vector<64x64xf32> -> vector<64x64xf32>
    %c0_4 = arith.constant 0 : index
    %c0_5 = arith.constant 0 : index
    %5 = vector.load %arg3[%c0_4, %c0_5] : memref<1x64xf32, #tpu.memory_space<vmem>>, vector<1x64xf32>
    %6 = vector.broadcast %5 : vector<1x64xf32> to vector<64x64xf32>
    %7 = arith.addf %4, %6 : vector<64x64xf32>
    %c0_6 = arith.constant 0 : index
    %c0_7 = arith.constant 0 : index
    %8 = vector.load %arg4[%c0_6, %c0_7] : memref<64x64xf32, #tpu.memory_space<vmem>>, vector<64x64xf32>
    %9 = arith.addf %7, %8 : vector<64x64xf32>
    %c0_8 = arith.constant 0 : index
    %c0_9 = arith.constant 0 : index
    %10 = vector.load %arg5[%c0_8, %c0_9] : memref<64x64xf32, #tpu.memory_space<vmem>>, vector<64x64xf32>
    tpu.vector_store %arg5[%c0_8, %c0_9], %9 {strides = array<i32>} : memref<64x64xf32, #tpu.memory_space<vmem>>, vector<64x64xf32>,
    return
  }
  func.func @transform_0(%arg0: i32) -> (i32, i32, i32) {
    %c0_i32 = arith.constant 0 : i32
    %c0_i32_0 = arith.constant 0 : i32
    %c0_i32_1 = arith.constant 0 : i32
    return %arg0, %c0_i32, %c0_i32_0 : i32, i32, i32
  }
  func.func @transform_1(%arg0: i32) -> (i32, i32) {
    %c0_i32 = arith.constant 0 : i32
    %c0_i32_0 = arith.constant 0 : i32
    %c0_i32_1 = arith.constant 0 : i32
    return %c0_i32, %c0_i32_0 : i32, i32
  }
  func.func @transform_2(%arg0: i32) -> (i32, i32) {
    %c0_i32 = arith.constant 0 : i32
    %c0_i32_0 = arith.constant 0 : i32
    %c0_i32_1 = arith.constant 0 : i32
    return %c0_i32, %c0_i32_0 : i32, i32
  }
  func.func @transform_3(%arg0: i32) -> (i32, i32) {
    %c0_i32 = arith.constant 0 : i32
    %c0_i32_0 = arith.constant 0 : i32
    %c0_i32_1 = arith.constant 0 : i32
    return %c0_i32, %c0_i32_0 : i32, i32
  }
  func.func @transform_4(%arg0: i32) -> (i32, i32) {
    %c0_i32 = arith.constant 0 : i32
    %c0_i32_0 = arith.constant 0 : i32
    return %arg0, %c0_i32 : i32, i32
  }
}

module attributes {stable_mosaic.version = 11 : i64} {
  func.func @_m2stack_kernel(%arg0: i32, %arg1: i32, %arg2: memref<64x64xf32, #tpu.memory_space<vmem>>, %arg3: memref<1x1x64xf32, #tpu.memory_space<vmem>>, %arg4: memref<1x1x64xf32, #tpu.memory_space<vmem>>, %arg5: memref<1x64x192xf32, #tpu.memory_space<vmem>>, %arg6: memref<1x64x64xf32, #tpu.memory_space<vmem>>, %arg7: memref<1x1x64xf32, #tpu.memory_space<vmem>>, %arg8: memref<1x1x64xf32, #tpu.memory_space<vmem>>, %arg9: memref<1x1x64xf32, #tpu.memory_space<vmem>>, %arg10: memref<1x64x128xf32, #tpu.memory_space<vmem>>, %arg11: memref<1x1x128xf32, #tpu.memory_space<vmem>>, %arg12: memref<1x128x64xf32, #tpu.memory_space<vmem>>, %arg13: memref<1x1x64xf32, #tpu.memory_space<vmem>>, %arg14: memref<64x64xf32, #tpu.memory_space<vmem>>, %arg15: memref<64x64xf32, #tpu.memory_space<vmem>>) attributes {dimension_semantics = [#tpu.dimension_semantics<parallel>, #tpu.dimension_semantics<arbitrary>], iteration_bounds = array<i64: 2, 3>, scalar_prefetch = 0 : i64, scratch_operands = 1 : i64, tpu.core_type = #tpu.core_type<tc>, window_params = [{transform_indices = @transform_0, window_bounds = array<i64: 64, 64>}, {transform_indices = @transform_1, window_bounds = array<i64: 1, 1, 64>}, {transform_indices = @transform_2, window_bounds = array<i64: 1, 1, 64>}, {transform_indices = @transform_3, window_bounds = array<i64: 1, 64, 192>}, {transform_indices = @transform_4, window_bounds = array<i64: 1, 64, 64>}, {transform_indices = @transform_5, window_bounds = array<i64: 1, 1, 64>}, {transform_indices = @transform_6, window_bounds = array<i64: 1, 1, 64>}, {transform_indices = @transform_7, window_bounds = array<i64: 1, 1, 64>}, {transform_indices = @transform_8, window_bounds = array<i64: 1, 64, 128>}, {transform_indices = @transform_9, window_bounds = array<i64: 1, 1, 128>}, {transform_indices = @transform_10, window_bounds = array<i64: 1, 128, 64>}, {transform_indices = @transform_11, window_bounds = array<i64: 1, 1, 64>}, {transform_indices = @transform_12, window_bounds = array<i64: 64, 64>}]} {
    %c0_i32 = arith.constant 0 : i32
    %0 = arith.cmpi eq, %arg1, %c0_i32 : i32
    %1 = arith.extui %0 : i1 to i32
    %c0_i32_0 = arith.constant 0 : i32
    %2 = arith.cmpi ne, %1, %c0_i32_0 : i32
    scf.if %2 {
      %c0_70 = arith.constant 0 : index
      %c0_71 = arith.constant 0 : index
      %169 = vector.load %arg2[%c0_70, %c0_71] : memref<64x64xf32, #tpu.memory_space<vmem>>, vector<64x64xf32>
      %c0_72 = arith.constant 0 : index
      %c0_73 = arith.constant 0 : index
      %170 = vector.load %arg15[%c0_72, %c0_73] : memref<64x64xf32, #tpu.memory_space<vmem>>, vector<64x64xf32>
      tpu.vector_store %arg15[%c0_72, %c0_73], %169 {strides = array<i32>} : memref<64x64xf32, #tpu.memory_space<vmem>>, vector<64x64xf32>,
    } else {
    }
    %c0 = arith.constant 0 : index
    %c0_1 = arith.constant 0 : index
    %3 = vector.load %arg15[%c0, %c0_1] : memref<64x64xf32, #tpu.memory_space<vmem>>, vector<64x64xf32>
    %c0_2 = arith.constant 0 : index
    %c0_3 = arith.constant 0 : index
    %c0_4 = arith.constant 0 : index
    %4 = vector.load %arg3[%c0_2, %c0_3, %c0_4] : memref<1x1x64xf32, #tpu.memory_space<vmem>>, vector<1x1x64xf32>
    %5 = vector.shape_cast %4 : vector<1x1x64xf32> to vector<1x64xf32>
    %c0_5 = arith.constant 0 : index
    %c0_6 = arith.constant 0 : index
    %c0_7 = arith.constant 0 : index
    %6 = vector.load %arg4[%c0_5, %c0_6, %c0_7] : memref<1x1x64xf32, #tpu.memory_space<vmem>>, vector<1x1x64xf32>
    %7 = vector.shape_cast %6 : vector<1x1x64xf32> to vector<1x64xf32>
    %cst = arith.constant dense<0.000000e+00> : vector<64xf32>
    %8 = vector.multi_reduction <add>, %3, %cst [1] : vector<64x64xf32> to vector<64xf32>
    %9 = vector.shape_cast %8 : vector<64xf32> to vector<64x1xf32>
    %cst_8 = arith.constant 6.400000e+01 : f32
    %10 = vector.broadcast %cst_8 : f32 to vector<64x1xf32>
    %11 = arith.divf %9, %10 : vector<64x1xf32>
    %12 = vector.broadcast %11 : vector<64x1xf32> to vector<64x64xf32>
    %13 = arith.subf %3, %12 : vector<64x64xf32>
    %14 = arith.mulf %13, %13 : vector<64x64xf32>
    %cst_9 = arith.constant dense<0.000000e+00> : vector<64xf32>
    %15 = vector.multi_reduction <add>, %14, %cst_9 [1] : vector<64x64xf32> to vector<64xf32>
    %16 = vector.shape_cast %15 : vector<64xf32> to vector<64x1xf32>
    %cst_10 = arith.constant 6.400000e+01 : f32
    %17 = vector.broadcast %cst_10 : f32 to vector<64x1xf32>
    %18 = arith.divf %16, %17 : vector<64x1xf32>
    %cst_11 = arith.constant 9.99999974E-6 : f32
    %19 = vector.broadcast %cst_11 : f32 to vector<64x1xf32>
    %20 = arith.addf %18, %19 : vector<64x1xf32>
    %21 = math.rsqrt %20 : vector<64x1xf32>
    %22 = vector.broadcast %21 : vector<64x1xf32> to vector<64x64xf32>
    %23 = arith.mulf %13, %22 : vector<64x64xf32>
    %24 = vector.broadcast %5 : vector<1x64xf32> to vector<64x64xf32>
    %25 = arith.mulf %23, %24 : vector<64x64xf32>
    %26 = vector.broadcast %7 : vector<1x64xf32> to vector<64x64xf32>
    %27 = arith.addf %25, %26 : vector<64x64xf32>
    %c0_12 = arith.constant 0 : index
    %c0_13 = arith.constant 0 : index
    %c0_14 = arith.constant 0 : index
    %28 = vector.load %arg5[%c0_12, %c0_13, %c0_14] : memref<1x64x192xf32, #tpu.memory_space<vmem>>, vector<1x64x192xf32>
    %29 = vector.shape_cast %28 : vector<1x64x192xf32> to vector<64x192xf32>
    %c0_15 = arith.constant 0 : index
    %c0_16 = arith.constant 0 : index
    %c0_17 = arith.constant 0 : index
    %30 = vector.load %arg6[%c0_15, %c0_16, %c0_17] : memref<1x64x64xf32, #tpu.memory_space<vmem>>, vector<1x64x64xf32>
    %31 = vector.shape_cast %30 : vector<1x64x64xf32> to vector<64x64xf32>
    %c0_18 = arith.constant 0 : index
    %c0_19 = arith.constant 0 : index
    %c0_20 = arith.constant 0 : index
    %32 = vector.load %arg7[%c0_18, %c0_19, %c0_20] : memref<1x1x64xf32, #tpu.memory_space<vmem>>, vector<1x1x64xf32>
    %33 = vector.shape_cast %32 : vector<1x1x64xf32> to vector<1x64xf32>
    %cst_21 = arith.constant dense<0.000000e+00> : vector<64x192xf32>
    %34 = tpu.matmul %27, %29, %cst_21 {dimension_numbers = #tpu.dot_dimension_numbers<[1], [0], [0], [1], [0, 0, 1, 1], [], []>} : vector<64x64xf32>, vector<64x192xf32>, vector<64x192xf32> -> vector<64x192xf32>
    %35 = vector.extract_strided_slice %34 {offsets = [0, 0], sizes = [64, 16], strides = [1, 1]} : vector<64x192xf32> to vector<64x16xf32>
    %36 = vector.extract_strided_slice %34 {offsets = [0, 16], sizes = [64, 16], strides = [1, 1]} : vector<64x192xf32> to vector<64x16xf32>
    %37 = vector.extract_strided_slice %34 {offsets = [0, 32], sizes = [64, 16], strides = [1, 1]} : vector<64x192xf32> to vector<64x16xf32>
    %38 = vector.extract_strided_slice %34 {offsets = [0, 48], sizes = [64, 16], strides = [1, 1]} : vector<64x192xf32> to vector<64x16xf32>
    %39 = vector.shape_cast %35 : vector<64x16xf32> to vector<1x64x16xf32>
    %40 = vector.shape_cast %36 : vector<64x16xf32> to vector<1x64x16xf32>
    %41 = vector.shape_cast %37 : vector<64x16xf32> to vector<1x64x16xf32>
    %42 = vector.shape_cast %38 : vector<64x16xf32> to vector<1x64x16xf32>
    %43 = tpu.concatenate %39, %40, %41, %42 in 0 : vector<1x64x16xf32>, vector<1x64x16xf32>, vector<1x64x16xf32>, vector<1x64x16xf32> -> vector<4x64x16xf32>
    %44 = vector.extract_strided_slice %34 {offsets = [0, 64], sizes = [64, 16], strides = [1, 1]} : vector<64x192xf32> to vector<64x16xf32>
    %45 = vector.extract_strided_slice %34 {offsets = [0, 80], sizes = [64, 16], strides = [1, 1]} : vector<64x192xf32> to vector<64x16xf32>
    %46 = vector.extract_strided_slice %34 {offsets = [0, 96], sizes = [64, 16], strides = [1, 1]} : vector<64x192xf32> to vector<64x16xf32>
    %47 = vector.extract_strided_slice %34 {offsets = [0, 112], sizes = [64, 16], strides = [1, 1]} : vector<64x192xf32> to vector<64x16xf32>
    %48 = vector.shape_cast %44 : vector<64x16xf32> to vector<1x64x16xf32>
    %49 = vector.shape_cast %45 : vector<64x16xf32> to vector<1x64x16xf32>
    %50 = vector.shape_cast %46 : vector<64x16xf32> to vector<1x64x16xf32>
    %51 = vector.shape_cast %47 : vector<64x16xf32> to vector<1x64x16xf32>
    %52 = tpu.concatenate %48, %49, %50, %51 in 0 : vector<1x64x16xf32>, vector<1x64x16xf32>, vector<1x64x16xf32>, vector<1x64x16xf32> -> vector<4x64x16xf32>
    %53 = vector.extract_strided_slice %34 {offsets = [0, 128], sizes = [64, 16], strides = [1, 1]} : vector<64x192xf32> to vector<64x16xf32>
    %54 = vector.extract_strided_slice %34 {offsets = [0, 144], sizes = [64, 16], strides = [1, 1]} : vector<64x192xf32> to vector<64x16xf32>
    %55 = vector.extract_strided_slice %34 {offsets = [0, 160], sizes = [64, 16], strides = [1, 1]} : vector<64x192xf32> to vector<64x16xf32>
    %56 = vector.extract_strided_slice %34 {offsets = [0, 176], sizes = [64, 16], strides = [1, 1]} : vector<64x192xf32> to vector<64x16xf32>
    %57 = vector.shape_cast %53 : vector<64x16xf32> to vector<1x64x16xf32>
    %58 = vector.shape_cast %54 : vector<64x16xf32> to vector<1x64x16xf32>
    %59 = vector.shape_cast %55 : vector<64x16xf32> to vector<1x64x16xf32>
    %60 = vector.shape_cast %56 : vector<64x16xf32> to vector<1x64x16xf32>
    %61 = tpu.concatenate %57, %58, %59, %60 in 0 : vector<1x64x16xf32>, vector<1x64x16xf32>, vector<1x64x16xf32>, vector<1x64x16xf32> -> vector<4x64x16xf32>
    "tpu.trace_start"() <{level = 10 : i32, message = "hqd,hkd->hqk"}> : () -> ()
    %cst_22 = arith.constant dense<0.000000e+00> : vector<4x64x64xf32>
    %62 = tpu.matmul %43, %52, %cst_22 {dimension_numbers = #tpu.dot_dimension_numbers<[2], [2], [1], [1], [0, 0, 0, 1, 1, 1], [0], [0]>} : vector<4x64x16xf32>, vector<4x64x16xf32>, vector<4x64x64xf32> -> vector<4x64x64xf32>
    "tpu.trace_stop"() : () -> ()
    %cst_23 = arith.constant dense<0xFF800000> : vector<4x64xf32>
    %63 = vector.multi_reduction <maximumf>, %62, %cst_23 [2] : vector<4x64x64xf32> to vector<4x64xf32>
    %64 = vector.shape_cast %63 : vector<4x64xf32> to vector<4x64x1xf32>
    %65 = vector.broadcast %64 : vector<4x64x1xf32> to vector<4x64x64xf32>
    %66 = arith.subf %62, %65 : vector<4x64x64xf32>
    %67 = math.exp %66 : vector<4x64x64xf32>
    %cst_24 = arith.constant dense<0.000000e+00> : vector<4x64xf32>
    %68 = vector.multi_reduction <add>, %67, %cst_24 [2] : vector<4x64x64xf32> to vector<4x64xf32>
    %69 = vector.shape_cast %68 : vector<4x64xf32> to vector<4x64x1xf32>
    %70 = vector.broadcast %69 : vector<4x64x1xf32> to vector<4x64x64xf32>
    %71 = arith.divf %67, %70 : vector<4x64x64xf32>
    "tpu.trace_start"() <{level = 10 : i32, message = "hqk,hkd->hqd"}> : () -> ()
    %cst_25 = arith.constant dense<0.000000e+00> : vector<4x64x16xf32>
    %72 = tpu.matmul %71, %61, %cst_25 {dimension_numbers = #tpu.dot_dimension_numbers<[2], [1], [1], [2], [0, 0, 0, 1, 1, 2], [0], [0]>} : vector<4x64x64xf32>, vector<4x64x16xf32>, vector<4x64x16xf32> -> vector<4x64x16xf32>
    "tpu.trace_stop"() : () -> ()
    %73 = vector.extract_strided_slice %72 {offsets = [0, 0, 0], sizes = [1, 64, 16], strides = [1, 1, 1]} : vector<4x64x16xf32> to vector<1x64x16xf32>
    %74 = vector.shape_cast %73 : vector<1x64x16xf32> to vector<64x16xf32>
    %75 = vector.extract_strided_slice %72 {offsets = [1, 0, 0], sizes = [1, 64, 16], strides = [1, 1, 1]} : vector<4x64x16xf32> to vector<1x64x16xf32>
    %76 = vector.shape_cast %75 : vector<1x64x16xf32> to vector<64x16xf32>
    %77 = vector.extract_strided_slice %72 {offsets = [2, 0, 0], sizes = [1, 64, 16], strides = [1, 1, 1]} : vector<4x64x16xf32> to vector<1x64x16xf32>
    %78 = vector.shape_cast %77 : vector<1x64x16xf32> to vector<64x16xf32>
    %79 = vector.extract_strided_slice %72 {offsets = [3, 0, 0], sizes = [1, 64, 16], strides = [1, 1, 1]} : vector<4x64x16xf32> to vector<1x64x16xf32>
    %80 = vector.shape_cast %79 : vector<1x64x16xf32> to vector<64x16xf32>
    %81 = tpu.concatenate %74, %76, %78, %80 in 1 : vector<64x16xf32>, vector<64x16xf32>, vector<64x16xf32>, vector<64x16xf32> -> vector<64x64xf32>
    %cst_26 = arith.constant dense<0.000000e+00> : vector<64x64xf32>
    %82 = tpu.matmul %81, %31, %cst_26 {dimension_numbers = #tpu.dot_dimension_numbers<[1], [0], [0], [1], [0, 0, 1, 1], [], []>} : vector<64x64xf32>, vector<64x64xf32>, vector<64x64xf32> -> vector<64x64xf32>
    %83 = vector.broadcast %33 : vector<1x64xf32> to vector<64x64xf32>
    %84 = arith.addf %82, %83 : vector<64x64xf32>
    %85 = arith.addf %3, %84 : vector<64x64xf32>
    %c0_27 = arith.constant 0 : index
    %c0_28 = arith.constant 0 : index
    %c0_29 = arith.constant 0 : index
    %86 = vector.load %arg8[%c0_27, %c0_28, %c0_29] : memref<1x1x64xf32, #tpu.memory_space<vmem>>, vector<1x1x64xf32>
    %87 = vector.shape_cast %86 : vector<1x1x64xf32> to vector<1x64xf32>
    %c0_30 = arith.constant 0 : index
    %c0_31 = arith.constant 0 : index
    %c0_32 = arith.constant 0 : index
    %88 = vector.load %arg9[%c0_30, %c0_31, %c0_32] : memref<1x1x64xf32, #tpu.memory_space<vmem>>, vector<1x1x64xf32>
    %89 = vector.shape_cast %88 : vector<1x1x64xf32> to vector<1x64xf32>
    %cst_33 = arith.constant dense<0.000000e+00> : vector<64xf32>
    %90 = vector.multi_reduction <add>, %85, %cst_33 [1] : vector<64x64xf32> to vector<64xf32>
    %91 = vector.shape_cast %90 : vector<64xf32> to vector<64x1xf32>
    %cst_34 = arith.constant 6.400000e+01 : f32
    %92 = vector.broadcast %cst_34 : f32 to vector<64x1xf32>
    %93 = arith.divf %91, %92 : vector<64x1xf32>
    %94 = vector.broadcast %93 : vector<64x1xf32> to vector<64x64xf32>
    %95 = arith.subf %85, %94 : vector<64x64xf32>
    %96 = arith.mulf %95, %95 : vector<64x64xf32>
    %cst_35 = arith.constant dense<0.000000e+00> : vector<64xf32>
    %97 = vector.multi_reduction <add>, %96, %cst_35 [1] : vector<64x64xf32> to vector<64xf32>
    %98 = vector.shape_cast %97 : vector<64xf32> to vector<64x1xf32>
    %cst_36 = arith.constant 6.400000e+01 : f32
    %99 = vector.broadcast %cst_36 : f32 to vector<64x1xf32>
    %100 = arith.divf %98, %99 : vector<64x1xf32>
    %cst_37 = arith.constant 9.99999974E-6 : f32
    %101 = vector.broadcast %cst_37 : f32 to vector<64x1xf32>
    %102 = arith.addf %100, %101 : vector<64x1xf32>
    %103 = math.rsqrt %102 : vector<64x1xf32>
    %104 = vector.broadcast %103 : vector<64x1xf32> to vector<64x64xf32>
    %105 = arith.mulf %95, %104 : vector<64x64xf32>
    %106 = vector.broadcast %87 : vector<1x64xf32> to vector<64x64xf32>
    %107 = arith.mulf %105, %106 : vector<64x64xf32>
    %108 = vector.broadcast %89 : vector<1x64xf32> to vector<64x64xf32>
    %109 = arith.addf %107, %108 : vector<64x64xf32>
    %c0_38 = arith.constant 0 : index
    %c0_39 = arith.constant 0 : index
    %c0_40 = arith.constant 0 : index
    %110 = vector.load %arg10[%c0_38, %c0_39, %c0_40] : memref<1x64x128xf32, #tpu.memory_space<vmem>>, vector<1x64x128xf32>
    %111 = vector.shape_cast %110 : vector<1x64x128xf32> to vector<64x128xf32>
    %c0_41 = arith.constant 0 : index
    %c0_42 = arith.constant 0 : index
    %c0_43 = arith.constant 0 : index
    %112 = vector.load %arg11[%c0_41, %c0_42, %c0_43] : memref<1x1x128xf32, #tpu.memory_space<vmem>>, vector<1x1x128xf32>
    %113 = vector.shape_cast %112 : vector<1x1x128xf32> to vector<1x128xf32>
    %c0_44 = arith.constant 0 : index
    %c0_45 = arith.constant 0 : index
    %c0_46 = arith.constant 0 : index
    %114 = vector.load %arg12[%c0_44, %c0_45, %c0_46] : memref<1x128x64xf32, #tpu.memory_space<vmem>>, vector<1x128x64xf32>
    %115 = vector.shape_cast %114 : vector<1x128x64xf32> to vector<128x64xf32>
    %c0_47 = arith.constant 0 : index
    %c0_48 = arith.constant 0 : index
    %c0_49 = arith.constant 0 : index
    %116 = vector.load %arg13[%c0_47, %c0_48, %c0_49] : memref<1x1x64xf32, #tpu.memory_space<vmem>>, vector<1x1x64xf32>
    %117 = vector.shape_cast %116 : vector<1x1x64xf32> to vector<1x64xf32>
    %cst_50 = arith.constant dense<0.000000e+00> : vector<64x128xf32>
    %118 = tpu.matmul %109, %111, %cst_50 {dimension_numbers = #tpu.dot_dimension_numbers<[1], [0], [0], [1], [0, 0, 1, 1], [], []>} : vector<64x64xf32>, vector<64x128xf32>, vector<64x128xf32> -> vector<64x128xf32>
    %119 = vector.broadcast %113 : vector<1x128xf32> to vector<64x128xf32>
    %120 = arith.addf %118, %119 : vector<64x128xf32>
    %cst_51 = arith.constant 5.000000e-01 : f32
    %121 = vector.broadcast %cst_51 : f32 to vector<64x128xf32>
    %122 = arith.mulf %121, %120 : vector<64x128xf32>
    %cst_52 = arith.constant 0.707106769 : f32
    %123 = vector.broadcast %cst_52 : f32 to vector<64x128xf32>
    %124 = arith.mulf %120, %123 : vector<64x128xf32>
    %125 = math.absf %124 : vector<64x128xf32>
    %cst_53 = arith.constant 0.327591091 : f32
    %126 = vector.broadcast %cst_53 : f32 to vector<64x128xf32>
    %127 = arith.mulf %126, %125 : vector<64x128xf32>
    %cst_54 = arith.constant 1.000000e+00 : f32
    %128 = vector.broadcast %cst_54 : f32 to vector<64x128xf32>
    %129 = arith.addf %128, %127 : vector<64x128xf32>
    %cst_55 = arith.constant 1.000000e+00 : f32
    %130 = vector.broadcast %cst_55 : f32 to vector<64x128xf32>
    %131 = arith.divf %130, %129 : vector<64x128xf32>
    %cst_56 = arith.constant 1.06140542 : f32
    %132 = vector.broadcast %cst_56 : f32 to vector<64x128xf32>
    %133 = arith.mulf %131, %132 : vector<64x128xf32>
    %cst_57 = arith.constant -1.45315206 : f32
    %134 = vector.broadcast %cst_57 : f32 to vector<64x128xf32>
    %135 = arith.addf %134, %133 : vector<64x128xf32>
    %136 = arith.mulf %131, %135 : vector<64x128xf32>
    %cst_58 = arith.constant 1.42141378 : f32
    %137 = vector.broadcast %cst_58 : f32 to vector<64x128xf32>
    %138 = arith.addf %137, %136 : vector<64x128xf32>
    %139 = arith.mulf %131, %138 : vector<64x128xf32>
    %cst_59 = arith.constant -0.284496725 : f32
    %140 = vector.broadcast %cst_59 : f32 to vector<64x128xf32>
    %141 = arith.addf %140, %139 : vector<64x128xf32>
    %142 = arith.mulf %131, %141 : vector<64x128xf32>
    %cst_60 = arith.constant 0.254829586 : f32
    %143 = vector.broadcast %cst_60 : f32 to vector<64x128xf32>
    %144 = arith.addf %143, %142 : vector<64x128xf32>
    %145 = arith.mulf %131, %144 : vector<64x128xf32>
    %cst_61 = arith.constant 0.000000e+00 : f32
    %146 = vector.broadcast %cst_61 : f32 to vector<64x128xf32>
    %147 = arith.subf %146, %125 : vector<64x128xf32>
    %148 = arith.mulf %147, %125 : vector<64x128xf32>
    %149 = math.exp %148 : vector<64x128xf32>
    %150 = arith.mulf %145, %149 : vector<64x128xf32>
    %cst_62 = arith.constant 1.000000e+00 : f32
    %151 = vector.broadcast %cst_62 : f32 to vector<64x128xf32>
    %152 = arith.subf %151, %150 : vector<64x128xf32>
    %cst_63 = arith.constant 0.000000e+00 : f32
    %153 = vector.broadcast %cst_63 : f32 to vector<64x128xf32>
    %154 = arith.cmpf olt, %124, %153 : vector<64x128xf32>
    %cst_64 = arith.constant 0.000000e+00 : f32
    %155 = vector.broadcast %cst_64 : f32 to vector<64x128xf32>
    %156 = arith.subf %155, %152 : vector<64x128xf32>
    %157 = arith.select %154, %156, %152 : vector<64x128xi1>, vector<64x128xf32>
    %cst_65 = arith.constant 1.000000e+00 : f32
    %158 = vector.broadcast %cst_65 : f32 to vector<64x128xf32>
    %159 = arith.addf %158, %157 : vector<64x128xf32>
    %160 = arith.mulf %122, %159 : vector<64x128xf32>
    %cst_66 = arith.constant dense<0.000000e+00> : vector<64x64xf32>
    %161 = tpu.matmul %160, %115, %cst_66 {dimension_numbers = #tpu.dot_dimension_numbers<[1], [0], [0], [1], [0, 0, 1, 1], [], []>} : vector<64x128xf32>, vector<128x64xf32>, vector<64x64xf32> -> vector<64x64xf32>
    %162 = vector.broadcast %117 : vector<1x64xf32> to vector<64x64xf32>
    %163 = arith.addf %161, %162 : vector<64x64xf32>
    %164 = arith.addf %85, %163 : vector<64x64xf32>
    %c0_67 = arith.constant 0 : index
    %c0_68 = arith.constant 0 : index
    %165 = vector.load %arg15[%c0_67, %c0_68] : memref<64x64xf32, #tpu.memory_space<vmem>>, vector<64x64xf32>
    tpu.vector_store %arg15[%c0_67, %c0_68], %164 {strides = array<i32>} : memref<64x64xf32, #tpu.memory_space<vmem>>, vector<64x64xf32>,
    %c2_i32 = arith.constant 2 : i32
    %166 = arith.cmpi eq, %arg1, %c2_i32 : i32
    %167 = arith.extui %166 : i1 to i32
    %c0_i32_69 = arith.constant 0 : i32
    %168 = arith.cmpi ne, %167, %c0_i32_69 : i32
    scf.if %168 {
      %c0_70 = arith.constant 0 : index
      %c0_71 = arith.constant 0 : index
      %169 = vector.load %arg14[%c0_70, %c0_71] : memref<64x64xf32, #tpu.memory_space<vmem>>, vector<64x64xf32>
      tpu.vector_store %arg14[%c0_70, %c0_71], %164 {strides = array<i32>} : memref<64x64xf32, #tpu.memory_space<vmem>>, vector<64x64xf32>,
    } else {
    }
    return
  }
  func.func @transform_0(%arg0: i32, %arg1: i32) -> (i32, i32) {
    %c0_i32 = arith.constant 0 : i32
    %c0_i32_0 = arith.constant 0 : i32
    return %arg0, %c0_i32 : i32, i32
  }
  func.func @transform_1(%arg0: i32, %arg1: i32) -> (i32, i32, i32) {
    %c0_i32 = arith.constant 0 : i32
    %c0_i32_0 = arith.constant 0 : i32
    %c0_i32_1 = arith.constant 0 : i32
    return %arg1, %c0_i32, %c0_i32_0 : i32, i32, i32
  }
  func.func @transform_2(%arg0: i32, %arg1: i32) -> (i32, i32, i32) {
    %c0_i32 = arith.constant 0 : i32
    %c0_i32_0 = arith.constant 0 : i32
    %c0_i32_1 = arith.constant 0 : i32
    return %arg1, %c0_i32, %c0_i32_0 : i32, i32, i32
  }
  func.func @transform_3(%arg0: i32, %arg1: i32) -> (i32, i32, i32) {
    %c0_i32 = arith.constant 0 : i32
    %c0_i32_0 = arith.constant 0 : i32
    %c0_i32_1 = arith.constant 0 : i32
    return %arg1, %c0_i32, %c0_i32_0 : i32, i32, i32
  }
  func.func @transform_4(%arg0: i32, %arg1: i32) -> (i32, i32, i32) {
    %c0_i32 = arith.constant 0 : i32
    %c0_i32_0 = arith.constant 0 : i32
    %c0_i32_1 = arith.constant 0 : i32
    return %arg1, %c0_i32, %c0_i32_0 : i32, i32, i32
  }
  func.func @transform_5(%arg0: i32, %arg1: i32) -> (i32, i32, i32) {
    %c0_i32 = arith.constant 0 : i32
    %c0_i32_0 = arith.constant 0 : i32
    %c0_i32_1 = arith.constant 0 : i32
    return %arg1, %c0_i32, %c0_i32_0 : i32, i32, i32
  }
  func.func @transform_6(%arg0: i32, %arg1: i32) -> (i32, i32, i32) {
    %c0_i32 = arith.constant 0 : i32
    %c0_i32_0 = arith.constant 0 : i32
    %c0_i32_1 = arith.constant 0 : i32
    return %arg1, %c0_i32, %c0_i32_0 : i32, i32, i32
  }
  func.func @transform_7(%arg0: i32, %arg1: i32) -> (i32, i32, i32) {
    %c0_i32 = arith.constant 0 : i32
    %c0_i32_0 = arith.constant 0 : i32
    %c0_i32_1 = arith.constant 0 : i32
    return %arg1, %c0_i32, %c0_i32_0 : i32, i32, i32
  }
  func.func @transform_8(%arg0: i32, %arg1: i32) -> (i32, i32, i32) {
    %c0_i32 = arith.constant 0 : i32
    %c0_i32_0 = arith.constant 0 : i32
    %c0_i32_1 = arith.constant 0 : i32
    return %arg1, %c0_i32, %c0_i32_0 : i32, i32, i32
  }
  func.func @transform_9(%arg0: i32, %arg1: i32) -> (i32, i32, i32) {
    %c0_i32 = arith.constant 0 : i32
    %c0_i32_0 = arith.constant 0 : i32
    %c0_i32_1 = arith.constant 0 : i32
    return %arg1, %c0_i32, %c0_i32_0 : i32, i32, i32
  }
  func.func @transform_10(%arg0: i32, %arg1: i32) -> (i32, i32, i32) {
    %c0_i32 = arith.constant 0 : i32
    %c0_i32_0 = arith.constant 0 : i32
    %c0_i32_1 = arith.constant 0 : i32
    return %arg1, %c0_i32, %c0_i32_0 : i32, i32, i32
  }
  func.func @transform_11(%arg0: i32, %arg1: i32) -> (i32, i32, i32) {
    %c0_i32 = arith.constant 0 : i32
    %c0_i32_0 = arith.constant 0 : i32
    %c0_i32_1 = arith.constant 0 : i32
    return %arg1, %c0_i32, %c0_i32_0 : i32, i32, i32
  }
  func.func @transform_12(%arg0: i32, %arg1: i32) -> (i32, i32) {
    %c0_i32 = arith.constant 0 : i32
    %c0_i32_0 = arith.constant 0 : i32
    return %arg0, %c0_i32 : i32, i32
  }
}

module attributes {stable_mosaic.version = 11 : i64} {
  func.func @_patch_unembed_kernel(%arg0: i32, %arg1: memref<64x64xf32, #tpu.memory_space<vmem>>, %arg2: memref<32x64xf32, #tpu.memory_space<vmem>>, %arg3: memref<32x1xf32, #tpu.memory_space<vmem>>, %arg4: memref<1x32x64xf32, #tpu.memory_space<vmem>>) attributes {dimension_semantics = [#tpu.dimension_semantics<parallel>], iteration_bounds = array<i64: 2>, scalar_prefetch = 0 : i64, scratch_operands = 0 : i64, tpu.core_type = #tpu.core_type<tc>, window_params = [{transform_indices = @transform_0, window_bounds = array<i64: 64, 64>}, {pipeline_mode = #tpu.pipeline_mode<synchronous>, transform_indices = @transform_1, window_bounds = array<i64: 32, 64>}, {pipeline_mode = #tpu.pipeline_mode<synchronous>, transform_indices = @transform_2, window_bounds = array<i64: 32, 1>}, {transform_indices = @transform_3, window_bounds = array<i64: 1, 32, 64>}]} {
    %c0 = arith.constant 0 : index
    %c0_0 = arith.constant 0 : index
    %0 = vector.load %arg2[%c0, %c0_0] : memref<32x64xf32, #tpu.memory_space<vmem>>, vector<32x64xf32>
    %c0_1 = arith.constant 0 : index
    %c0_2 = arith.constant 0 : index
    %1 = vector.load %arg1[%c0_1, %c0_2] : memref<64x64xf32, #tpu.memory_space<vmem>>, vector<64x64xf32>
    %cst = arith.constant dense<0.000000e+00> : vector<32x64xf32>
    %2 = tpu.matmul %0, %1, %cst {dimension_numbers = #tpu.dot_dimension_numbers<[1], [1], [0], [0], [0, 0, 1, 0], [], []>} : vector<32x64xf32>, vector<64x64xf32>, vector<32x64xf32> -> vector<32x64xf32>
    %c0_3 = arith.constant 0 : index
    %c0_4 = arith.constant 0 : index
    %3 = vector.load %arg3[%c0_3, %c0_4] : memref<32x1xf32, #tpu.memory_space<vmem>>, vector<32x1xf32>
    %4 = vector.broadcast %3 : vector<32x1xf32> to vector<32x64xf32>
    %5 = arith.addf %2, %4 : vector<32x64xf32>
    %c0_5 = arith.constant 0 : index
    %c0_6 = arith.constant 0 : index
    %c0_7 = arith.constant 0 : index
    %6 = vector.load %arg4[%c0_5, %c0_6, %c0_7] : memref<1x32x64xf32, #tpu.memory_space<vmem>>, vector<1x32x64xf32>
    %7 = vector.shape_cast %6 : vector<1x32x64xf32> to vector<32x64xf32>
    %8 = vector.shape_cast %5 : vector<32x64xf32> to vector<1x32x64xf32>
    tpu.vector_store %arg4[%c0_5, %c0_6, %c0_7], %8 {strides = array<i32>} : memref<1x32x64xf32, #tpu.memory_space<vmem>>, vector<1x32x64xf32>,
    return
  }
  func.func @transform_0(%arg0: i32) -> (i32, i32) {
    %c0_i32 = arith.constant 0 : i32
    %c0_i32_0 = arith.constant 0 : i32
    return %arg0, %c0_i32 : i32, i32
  }
  func.func @transform_1(%arg0: i32) -> (i32, i32) {
    %c0_i32 = arith.constant 0 : i32
    %c0_i32_0 = arith.constant 0 : i32
    %c0_i32_1 = arith.constant 0 : i32
    return %c0_i32, %c0_i32_0 : i32, i32
  }
  func.func @transform_2(%arg0: i32) -> (i32, i32) {
    %c0_i32 = arith.constant 0 : i32
    %c0_i32_0 = arith.constant 0 : i32
    %c0_i32_1 = arith.constant 0 : i32
    return %c0_i32, %c0_i32_0 : i32, i32
  }
  func.func @transform_3(%arg0: i32) -> (i32, i32, i32) {
    %c0_i32 = arith.constant 0 : i32
    %c0_i32_0 = arith.constant 0 : i32
    %c0_i32_1 = arith.constant 0 : i32
    return %arg0, %c0_i32, %c0_i32_0 : i32, i32, i32
  }
}

</mosaic_0001>

<bundles_post_ra>
// kernel: transformer_block_pallas.3
= control target key start
LH: loop header
LB: loop body
LE: loop exit
PB: predicated region body
PF: predicated region fallthrough
CT: control target
= control target key end

     0   :  { %9 = vsyncpa [#allocation3], 0  ;;  %s546_s15 = smov 0   ;;  %s625_s0 = inlined_call_operand.vmem [shape: f32[2,32,64], index: 0, kind: input, shape index: {}]   ;;  %s626_s1 = inlined_call_operand.hbm [shape: f32[32,64], index: 1, kind: input, shape index: {}]   ;;  %s627_s2 = inlined_call_operand.vmem [shape: f32[1,64], index: 2, kind: input, shape index: {}]   ;;  %s628_s3 = inlined_call_operand.vmem [shape: f32[64,64], index: 3, kind: input, shape index: {}]   ;;  %s629_s4 = inlined_call_operand.vmem [shape: f32[128,64], index: 4, kind: output, shape index: {}]  }
   0x1 LB: > { %s146_s18 = sshll.u32 %s626_s1, 4  ;;  %s555_s19 = sadd.s32 4294967295, %s516_s15   ;;  %s516_s15 = sphi %s546_s15, %s15_s15   ;;  %s147_s18 = int_to_ptr.hbm [resolvable:$true] %s146_s18 }
   0x2   : > { %p421_p0 = scmp.ge.s32.totalorder %s516_s15, 1  ;;  %p135_p1 = scmp.lt.s32.totalorder %s516_s15, 3 }
   0x3   : > { %p461_p2 = scmp.eq.s32.totalorder %s555_s19, 0  ;;  %s518_s20 = smov [#allocation2]  }
   0x4   : > { %p136_p3 = pnand %p421_p0, %p135_p1  ;;  %s148_s21 = sshll.u32 %s518_s20, 4  ;;  %s149_s21 = int_to_ptr.vmem [resolvable:$true] %s148_s21 }
   0x5   : > { %s519_s22 = smov 128   ;;  %s520_s23 = smov 8  }
   0x6   : > { %p457_p4 = pneg %p136_p3  ;;  %178 = sbr.rel (%p136_p3) target bundleno = 377 (0x179), region = 36 }
   0x8   : > { %p458_p5 = pnand %p461_p2, %p457_p4 }
   0xa   : > { %460 = dma.hbm_to_vmem [thread:$0]  (!%p458_p5), %s147_s18, 512, %s149_s21, [#allocation3], %s519_s22, %s519_s22, %s520_s23  }
   0xb   : > { %511 = dma.done.wait (%p461_p2), [#allocation3], 512  }
   0xc   : > { %513 = vsyncadd (%p461_p2), [#allocation3], 4294966784  ;;  %p205_p6 = scmp.lt.s32.totalorder %s555_s19, 1  ;;  %v255_v1 = vld [vmem:[#allocation2 + $0x18] sm:$0xff]  ;;  %v254_v2 = vld [vmem:[#allocation2 + $0x10] sm:$0xff]  ;;  %vm260_vm0 = vcmask 261120  }
   0xd   : > { %297 = vmatpush.msra.mxu0 %v255_v1  ;;  %441 = vmatpush.msra.mxu1 %v255_v1  ;;  %v253_v3 = vld [vmem:[#allocation2 + $0x8] sm:$0xff]  ;;  %v252_v4 = vld [vmem:[#allocation2] sm:$0xff]  ;;  %s428_s29 = sshll.u32 %s555_s19, 3  ;;  %vm342_vm1 = vcmask 523264   ;;  %v328_v26 = vld [vmem:[%s628_s3 + $0x10] sm:$0xff] }
   0xe   : > { %s206_s24 = scalar_select %p205_p6, %s555_s19, 1  ;;  %442 = vmatpush.msra.mxu2 %v255_v1  ;;  %443 = vmatpush.msra.mxu3 %v255_v1  ;;  %v475_v16 = vld [vmem:[%s627_s2] ss:$0 sm:$0xff]  ;;  %v327_v22 = vld [vmem:[%s628_s3 + $0x8] sm:$0xff]  ;;  %v329_v30 = vld [vmem:[%s628_s3 + $0x18] sm:$0xff] }
   0xf   : > { %298 = vmatpush.msra.mxu0 %v254_v2  ;;  %444 = vmatpush.msra.mxu1 %v254_v2  ;;  %p211_p7 = scmp.lt.s32.totalorder %s428_s29, 15  ;;  %v326_v18 = vld [vmem:[%s628_s3] sm:$0xff]  ;;  %v331_v38 = vld [vmem:[%s628_s3 + $0x28] sm:$0xff]  ;;  %v332_v42 = vld [vmem:[%s628_s3 + $0x30] sm:$0xff] }
  0x10   : > { %s440_s25 = sshll.u32 %s206_s24, 5  ;;  %445 = vmatpush.msra.mxu2 %v254_v2  ;;  %446 = vmatpush.msra.mxu3 %v254_v2  ;;  %v330_v34 = vld [vmem:[%s628_s3 + $0x20] sm:$0xff]  ;;  %v333_v46 = vld [vmem:[%s628_s3 + $0x38] sm:$0xff] }
  0x11   : > { %s209_s28 = scalar_lea.vmem %s625_s0, %s440_s25  ;;  %299 = vmatpush.msra.mxu0 %v253_v3  ;;  %447 = vmatpush.msra.mxu1 %v253_v3  ;;  %s631_s29 = smov (!%p211_p7, %s428_s29), 15 }
  0x12   : > { %v216_v0 = vld [vmem:[%s209_s28] sm:$0xff]  ;;  %v217_v5 = vld [vmem:[%s209_s28 + $0x8] sm:$0xff]  ;;  %448 = vmatpush.msra.mxu2 %v253_v3  ;;  %449 = vmatpush.msra.mxu3 %v253_v3  ;;  %v218_v6 = vld [vmem:[%s209_s28 + $0x10] sm:$0xff]  ;;  %s429_s6 = sshll.u32 %s631_s29, 3 }
  0x13   : > { %220 = vxpose.xlu0.b32.start [1/4] (short) (narrow) %v216_v0, 64  ;;  %300 = vmatpush.msra.mxu0 %v252_v4  ;;  %v219_v7 = vld [vmem:[%s209_s28 + $0x18] sm:$0xff]  ;;  %s583_s11 = scalar_lea.vmem %s629_s4, %s429_s6 }
  0x14   : > { %450 = vmatpush.msra.mxu1 %v252_v4  ;;  %451 = vmatpush.msra.mxu2 %v252_v4 }
  0x15   : > { %452 = vmatpush.msra.mxu3 %v252_v4 }
  0x1b   : > { %221 = vxpose.xlu0.b32.cont [2/4] (short) (narrow) %v217_v5, 64 }
  0x23   : > { %222 = vxpose.xlu0.b32.cont [3/4] (short) (narrow) %v218_v6, 64 }
  0x2b   : > { %223 = vxpose.xlu0.b32.end [4/4] (short) (narrow) %v219_v7, 64 }
  0xb7   : > { %v236_v8 = vpop.trf.xlu0 }
  0xb8   : > { %430 = vmatmul.msk.f32.vlgmr.msra.gmra.mxu0 %vm260_vm0, %v236_v8 }
  0xbf   : > { %v237_v9 = vpop.trf.xlu0 }
  0xc0   : > { %431 = vmatmul.msk.f32.gmra.mxu0 %vm260_vm0, %v237_v9 }
  0xc7   : > { %v238_v10 = vpop.trf.xlu0 }
  0xc8   : > { %432 = vmatmul.msk.f32.vlgmr.msra.gmra.mxu1 %vm260_vm0, %v238_v10 }
  0xcf   : > { %v239_v11 = vpop.trf.xlu0 }
  0xd0   : > { %433 = vmatmul.msk.f32.gmra.mxu1 %vm260_vm0, %v239_v11 }
  0xd7   : > { %v240_v12 = vpop.trf.xlu0 }
  0xd8   : > { %434 = vmatmul.msk.f32.vlgmr.msra.gmra.mxu2 %vm260_vm0, %v240_v12 }
  0xdf   : > { %v241_v13 = vpop.trf.xlu0 }
  0xe0   : > { %435 = vmatmul.msk.f32.gmra.mxu2 %vm260_vm0, %v241_v13 }
  0xe7   : > { %v242_v14 = vpop.trf.xlu0 }
  0xe8   : > { %436 = vmatmul.msk.f32.vlgmr.msra.gmra.mxu3 %vm260_vm0, %v242_v14 }
  0xef   : > { %v243_v15 = vpop.trf.xlu0 }
  0xf0   : > { %437 = vmatmul.msk.f32.gmra.mxu3 %vm260_vm0, %v243_v15 }
 0x135   : > { %v302_v17 = vpop.f32.mrf.mxu0 }
 0x136   : > { %v303_v19 = vadd.f32 %v475_v16, %v302_v17 }
 0x138   : > { %v334_v20 = vadd.f32 %v326_v18, %v303_v19 }
 0x13a   : > { %343 = vst.msk [vmem:[%s583_s11] sm:$0xff] %vm342_vm1, %v334_v20 }
 0x13d   : > { %v305_v21 = vpop.f32.mrf.mxu0 }
 0x13e   : > { %v306_v23 = vadd.f32 %v475_v16, %v305_v21 }
 0x140   : > { %v335_v24 = vadd.f32 %v327_v22, %v306_v23 }
 0x142   : > { %344 = vst.msk [vmem:[%s583_s11 + $0x8] sm:$0xff] %vm342_vm1, %v335_v24 }
 0x145   : > { %v308_v25 = vpop.f32.mrf.mxu1 }
 0x146   : > { %v309_v27 = vadd.f32 %v475_v16, %v308_v25 }
 0x148   : > { %v336_v28 = vadd.f32 %v328_v26, %v309_v27 }
 0x14a   : > { %345 = vst.msk [vmem:[%s583_s11 + $0x10] sm:$0xff] %vm342_vm1, %v336_v28 }
 0x14d   : > { %v311_v29 = vpop.f32.mrf.mxu1 }
 0x14e   : > { %v312_v31 = vadd.f32 %v475_v16, %v311_v29 }
 0x150   : > { %v337_v32 = vadd.f32 %v329_v30, %v312_v31 }
 0x152   : > { %346 = vst.msk [vmem:[%s583_s11 + $0x18] sm:$0xff] %vm342_vm1, %v337_v32 }
 0x15b   : > { %v314_v33 = vpop.f32.mrf.mxu2 }
 0x15c   : > { %v315_v35 = vadd.f32 %v475_v16, %v314_v33 }
 0x15e   : > { %v338_v36 = vadd.f32 %v330_v34, %v315_v35 }
 0x160   : > { %347 = vst.msk [vmem:[%s583_s11 + $0x20] sm:$0xff] %vm342_vm1, %v338_v36 }
 0x163   : > { %v317_v37 = vpop.f32.mrf.mxu2 }
 0x164   : > { %v318_v39 = vadd.f32 %v475_v16, %v317_v37 }
 0x166   : > { %v339_v40 = vadd.f32 %v331_v38, %v318_v39 }
 0x168   : > { %348 = vst.msk [vmem:[%s583_s11 + $0x28] sm:$0xff] %vm342_vm1, %v339_v40 }
 0x16b   : > { %v320_v41 = vpop.f32.mrf.mxu3 }
 0x16c   : > { %v321_v43 = vadd.f32 %v475_v16, %v320_v41 }
 0x16e   : > { %v340_v44 = vadd.f32 %v332_v42, %v321_v43 }
 0x170   : > { %349 = vst.msk [vmem:[%s583_s11 + $0x30] sm:$0xff] %vm342_vm1, %v340_v44 }
 0x173   : > { %v323_v45 = vpop.f32.mrf.mxu3 }
 0x174   : > { %v324_v47 = vadd.f32 %v475_v16, %v323_v45 }
 0x176   : > { %v341_v48 = vadd.f32 %v333_v46, %v324_v47 }
 0x178   : > { %350 = vst.msk [vmem:[%s583_s11 + $0x38] sm:$0xff] %vm342_vm1, %v341_v48 }
 0x179 PF: > { %s15_s15 = sadd.s32 1, %s516_s15  }
 0x17a   : > { %p12_p8 = scmp.ge.s32.totalorder %s15_s15, 4  }
 0x17c   :  { %14 = sbr.rel (!%p12_p8) target bundleno = 1 (0x1), region = 71 }
 0x181   :  { %373 = vsyncpa [#allocation3], 1 }
 0x182   :  { %375 = vsyncpa [#allocation3 + $0x1], 1 }

// kernel: transformer_block_pallas.5
= control target key start
LH: loop header
LB: loop body
LE: loop exit
PB: predicated region body
PF: predicated region fallthrough
CT: control target
= control target key end

     0   :  { %s422_s12 = smov 0   ;;  %s518_s0 = inlined_call_operand.vmem [shape: f32[128,64], index: 0, kind: input, shape index: {}]   ;;  %s519_s1 = inlined_call_operand.vmem [shape: f32[32,64], index: 1, kind: input, shape index: {}]   ;;  %s520_s2 = inlined_call_operand.vmem [shape: f32[32,1], index: 2, kind: input, shape index: {}]   ;;  %s521_s3 = inlined_call_operand.vmem [shape: f32[2,32,64], index: 3, kind: output, shape index: {}]  }
   0x1 LB: > { %s428_s13 = sadd.s32 4294967295, %s399_s12   ;;  %p338_p0 = scmp.ge.s32.totalorder %s399_s12, 1  ;;  %s399_s12 = sphi %s422_s12, %s13_s12  }
   0x2   : > { %p138_p1 = scmp.lt.s32.totalorder %s399_s12, 3 }
   0x4   : > { %p139_p2 = pnand %p338_p0, %p138_p1 }
   0x5   : > { %s339_s14 = sshll.u32 (!%p139_p2), %s428_s13, 3  ;;  %p168_p4 = scmp.lt.s32.totalorder (!%p139_p2), %s428_s13, 1 }
   0x6   : > { %142 = sbr.rel (%p139_p2) target bundleno = 183 (0xb7), region = 32  ;;  %p163_p3 = scmp.lt.s32.totalorder (!%p139_p2), %s339_s14, 15 }
   0xb   : > { %s523_s14 = smov (!%p163_p3, %s339_s14), 15  ;;  %vm209_vm0 = vcmask 523264   ;;  %v401_v0 = vmov 0   ;;  %v187_v3 = vld [vmem:[%s520_s2 + $0x10] sm:$0xff]  ;;  %v185_v4 = vld [vmem:[%s520_s2] sm:$0xff]  ;;  %v188_v6 = vld [vmem:[%s520_s2 + $0x18] sm:$0xff] }
   0xc   : > { %s340_s15 = sshll.u32 %s523_s14, 3  ;;  %392 = vset.pattern.permute.xlu1 %v401_v0  ;;  %391 = vset.pattern.permute.xlu0 %v401_v0  ;;  %v186_v8 = vld [vmem:[%s520_s2 + $0x8] sm:$0xff]  ;;  %v173_v13 = vld [vmem:[%s519_s1] sm:$0xff]  ;;  %v175_v15 = vld [vmem:[%s519_s1 + $0x10] sm:$0xff]  ;;  %s525_s13 = smov (!%p168_p4, %s428_s13), 1 }
   0xd   : > { %s436_s18 = scalar_lea.vmem %s518_s0, %s340_s15  ;;  %201 = vperm.xlu1 %392, %v187_v3   ;;  %191 = vperm.xlu0 %391, %v185_v4   ;;  %v174_v14 = vld [vmem:[%s519_s1 + $0x8] sm:$0xff]  ;;  %v176_v16 = vld [vmem:[%s519_s1 + $0x18] sm:$0xff]  ;;  %s357_s8 = sshll.u32 %s525_s13, 5 }
   0xe   : > { %v184_v1 = vld [vmem:[%s436_s18 + $0x38] sm:$0xff]  ;;  %v183_v2 = vld [vmem:[%s436_s18 + $0x30] sm:$0xff]  ;;  %v182_v5 = vld [vmem:[%s436_s18 + $0x28] sm:$0xff]  ;;  %s172_s11 = scalar_lea.vmem %s521_s3, %s357_s8 }
   0xf   : > { %343 = vmatpush.xpose.msk.msra.mxu0 %vm209_vm0, %v184_v1  ;;  %358 = vmatpush.xpose.msk.msra.mxu1 %vm209_vm0, %v184_v1  ;;  %v181_v7 = vld [vmem:[%s436_s18 + $0x20] sm:$0xff]  ;;  %v180_v9 = vld [vmem:[%s436_s18 + $0x18] sm:$0xff]  ;;  %v179_v10 = vld [vmem:[%s436_s18 + $0x10] sm:$0xff] }
  0x10   : > { %359 = vmatpush.xpose.msk.msra.mxu2 %vm209_vm0, %v184_v1  ;;  %360 = vmatpush.xpose.msk.msra.mxu3 %vm209_vm0, %v184_v1  ;;  %v178_v11 = vld [vmem:[%s436_s18 + $0x8] sm:$0xff]  ;;  %v177_v12 = vld [vmem:[%s436_s18] sm:$0xff] }
  0x13   : > { %344 = vmatpush.xpose.msk.msra.mxu0 %vm209_vm0, %v183_v2  ;;  %361 = vmatpush.xpose.msk.msra.mxu1 %vm209_vm0, %v183_v2 }
  0x14   : > { %362 = vmatpush.xpose.msk.msra.mxu2 %vm209_vm0, %v183_v2  ;;  %363 = vmatpush.xpose.msk.msra.mxu3 %vm209_vm0, %v183_v2 }
  0x15   : > { %206 = vperm.xlu1 %392, %v188_v6   ;;  %196 = vperm.xlu0 %391, %v186_v8  }
  0x17   : > { %345 = vmatpush.xpose.msk.msra.mxu0 %vm209_vm0, %v182_v5  ;;  %364 = vmatpush.xpose.msk.msra.mxu1 %vm209_vm0, %v182_v5 }
  0x18   : > { %365 = vmatpush.xpose.msk.msra.mxu2 %vm209_vm0, %v182_v5  ;;  %366 = vmatpush.xpose.msk.msra.mxu3 %vm209_vm0, %v182_v5 }
  0x1b   : > { %346 = vmatpush.xpose.msk.msra.mxu0 %vm209_vm0, %v181_v7  ;;  %367 = vmatpush.xpose.msk.msra.mxu1 %vm209_vm0, %v181_v7 }
  0x1c   : > { %368 = vmatpush.xpose.msk.msra.mxu2 %vm209_vm0, %v181_v7  ;;  %369 = vmatpush.xpose.msk.msra.mxu3 %vm209_vm0, %v181_v7 }
  0x1f   : > { %347 = vmatpush.xpose.msk.msra.mxu0 %vm209_vm0, %v180_v9  ;;  %370 = vmatpush.xpose.msk.msra.mxu1 %vm209_vm0, %v180_v9 }
  0x20   : > { %371 = vmatpush.xpose.msk.msra.mxu2 %vm209_vm0, %v180_v9  ;;  %372 = vmatpush.xpose.msk.msra.mxu3 %vm209_vm0, %v180_v9 }
  0x23   : > { %348 = vmatpush.xpose.msk.msra.mxu0 %vm209_vm0, %v179_v10  ;;  %373 = vmatpush.xpose.msk.msra.mxu1 %vm209_vm0, %v179_v10 }
  0x24   : > { %374 = vmatpush.xpose.msk.msra.mxu2 %vm209_vm0, %v179_v10  ;;  %375 = vmatpush.xpose.msk.msra.mxu3 %vm209_vm0, %v179_v10 }
  0x27   : > { %349 = vmatpush.xpose.msk.msra.mxu0 %vm209_vm0, %v178_v11  ;;  %376 = vmatpush.xpose.msk.msra.mxu1 %vm209_vm0, %v178_v11 }
  0x28   : > { %377 = vmatpush.xpose.msk.msra.mxu2 %vm209_vm0, %v178_v11  ;;  %378 = vmatpush.xpose.msk.msra.mxu3 %vm209_vm0, %v178_v11 }
  0x2b   : > { %350 = vmatpush.xpose.msk.msra.mxu0 %vm209_vm0, %v177_v12  ;;  %379 = vmatpush.xpose.msk.msra.mxu1 %vm209_vm0, %v177_v12 }
  0x2c   : > { %380 = vmatpush.xpose.msk.msra.mxu2 %vm209_vm0, %v177_v12  ;;  %381 = vmatpush.xpose.msk.msra.mxu3 %vm209_vm0, %v177_v12 }
  0x2e   : > { %351 = vmatmul.msk.f32.vlgmr.msra.gmra.mxu0 %vm209_vm0, %v173_v13  ;;  %352 = vmatmul.msk.f32.vlgmr.msra.gmra.mxu1 %vm209_vm0, %v174_v14 }
  0x2f   : > { %353 = vmatmul.msk.f32.vlgmr.msra.gmra.mxu2 %vm209_vm0, %v175_v15  ;;  %354 = vmatmul.msk.f32.vlgmr.msra.gmra.mxu3 %vm209_vm0, %v176_v16 }
  0x7f   : > { %v192_v17 = vpop.permute.xlu0 %191  ;;  %v202_v18 = vpop.permute.xlu1 %201 }
  0x87   : > { %v197_v19 = vpop.permute.xlu0 %196  ;;  %v207_v24 = vpop.permute.xlu1 %206 }
  0xab   : > { %v263_v20 = vpop.f32.mrf.mxu0  ;;  %v266_v21 = vpop.f32.mrf.mxu1 }
  0xac   : > { %v264_v22 = vadd.f32 %v263_v20, %v192_v17  ;;  %v267_v23 = vadd.f32 %v266_v21, %v197_v19 }
  0xae   : > { %275 = vst.msk [vmem:[%s172_s11] sm:$0xff] %vm209_vm0, %v264_v22 }
  0xaf   : > { %276 = vst.msk [vmem:[%s172_s11 + $0x8] sm:$0xff] %vm209_vm0, %v267_v23 }
  0xb2   : > { %v269_v25 = vpop.f32.mrf.mxu2  ;;  %v272_v26 = vpop.f32.mrf.mxu3 }
  0xb3   : > { %v270_v27 = vadd.f32 %v269_v25, %v202_v18  ;;  %v273_v28 = vadd.f32 %v272_v26, %v207_v24 }
  0xb5   : > { %277 = vst.msk [vmem:[%s172_s11 + $0x10] sm:$0xff] %vm209_vm0, %v270_v27 }
  0xb6   : > { %278 = vst.msk [vmem:[%s172_s11 + $0x18] sm:$0xff] %vm209_vm0, %v273_v28 }
  0xb7 PF: > { %s13_s12 = sadd.s32 1, %s399_s12  }
  0xb8   : > { %p10_p5 = scmp.ge.s32.totalorder %s13_s12, 4  }
  0xba   :  { %12 = sbr.rel (!%p10_p5) target bundleno = 1 (0x1), region = 62 }

// kernel: transformer_block_pallas.4
= control target key start
LH: loop header
LB: loop body
LE: loop exit
PB: predicated region body
PF: predicated region fallthrough
CT: control target
= control target key end

     0   :  { %s6645_s0 = inlined_call_operand.vmem [shape: f32[128,64], index: 0, kind: input, shape index: {}]   ;;  %s6646_s1 = inlined_call_operand.hbm [shape: f32[3,1,64], index: 1, kind: input, shape index: {}]   ;;  %s6647_s2 = inlined_call_operand.hbm [shape: f32[3,1,64], index: 2, kind: input, shape index: {}]   ;;  %s6648_s3 = inlined_call_operand.vmem [shape: f32[3,64,192], index: 3, kind: input, shape index: {}]   ;;  %s6649_s4 = inlined_call_operand.vmem [shape: f32[3,64,64], index: 4, kind: input, shape index: {}]   ;;  %s6650_s5 = inlined_call_operand.hbm [shape: f32[3,1,64], index: 5, kind: input, shape index: {}]   ;;  %s6651_s6 = inlined_call_operand.hbm [shape: f32[3,1,64], index: 6, kind: input, shape index: {}]   ;;  %s6652_s7 = inlined_call_operand.hbm [shape: f32[3,1,64], index: 7, kind: input, shape index: {}]   ;;  %s6653_s8 = inlined_call_operand.hbm [shape: f32[3,64,128], index: 8, kind: input, shape index: {}]   ;;  %s6654_s9 = inlined_call_operand.vmem [shape: f32[3,1,128], index: 9, kind: input, shape index: {}]   ;;  %s6655_s10 = inlined_call_operand.vmem [shape: f32[3,128,64], index: 10, kind: input, shape index: {}]   ;;  %s6656_s11 = inlined_call_operand.vmem [shape: f32[3,1,64], index: 11, kind: input, shape index: {}]   ;;  %s6657_s12 = inlined_call_operand.vmem [shape: f32[128,64], index: 12, kind: output, shape index: {}]  }
   0x1   :  { %6663 = sst [smem:[#allocation23_spill]] %s6645_s0 }
   0x2   :  { %6664 = sst [smem:[#allocation24_spill]] %s6646_s1 }
   0x3   :  { %6665 = sst [smem:[#allocation25_spill]] %s6647_s2 }
   0x4   :  { %6666 = sst [smem:[#allocation26_spill]] %s6648_s3 }
   0x5   :  { %6667 = sst [smem:[#allocation27_spill]] %s6650_s5 }
   0x6   :  { %6668 = sst [smem:[#allocation28_spill]] %s6651_s6 }
   0x7   :  { %6669 = sst [smem:[#allocation29_spill]] %s6652_s7 }
   0x8   :  { %6670 = sst [smem:[#allocation30_spill]] %s6653_s8 }
   0x9   :  { %6671 = sst [smem:[#allocation31_spill]] %s6654_s9 }
   0xa   :  { %6672 = sst [smem:[#allocation32_spill]] %s6655_s10 }
   0xb   :  { %6673 = sst [smem:[#allocation33_spill]] %s6656_s11 }
   0xc   :  { %6674 = sst [smem:[#allocation34_spill]] %s6657_s12 }
   0xd   :  { %17 = vsyncpa [#allocation4], 0 }
   0xe   :  { %19 = vsyncpa [#allocation4 + $0x1], 0 }
   0xf   :  { %20 = vsyncpa [#allocation6], 0 }
  0x10   :  { %22 = vsyncpa [#allocation6 + $0x1], 0 }
  0x11   :  { %23 = vsyncpa [#allocation9], 0 }
  0x12   :  { %25 = vsyncpa [#allocation9 + $0x1], 0 }
  0x13   :  { %26 = vsyncpa [#allocation12], 0 }
  0x14   :  { %28 = vsyncpa [#allocation12 + $0x1], 0  ;;  %s4624_s21 = smov 0   ;;  %s4626_s22 = smov 0  }
  0x15   :  { %s4628_s23 = smov 0   ;;  %s4630_s24 = smov 0  }
  0x16   :  { %s4632_s25 = smov 0   ;;  %s4634_s26 = smov 0  }
  0x17   :  { %s4636_s27 = smov 0   ;;  %s4638_s28 = smov 0  }
  0x18 LB: > { %6675 = sst [smem:[#allocation17_spill]] %s4527_s23  ;;  %s6658_s29 = sadd.s32 4294967295, %s4547_s28   ;;  %s4547_s28 = sphi %s4638_s28, %s34_s28   ;;  %s4543_s27 = sphi %s4636_s27, %s6757_s27   ;;  %s4539_s26 = sphi %s4634_s26, %s6756_s26   ;;  %s4535_s25 = sphi %s4632_s25, %s6755_s25   ;;  %s4531_s24 = sphi %s4630_s24, %s6754_s24   ;;  %s4527_s23 = sphi %s4628_s23, %s6753_s23   ;;  %s4523_s22 = sphi %s4626_s22, %s6759_s22   ;;  %s4519_s21 = sphi %s4624_s21, %s6758_s21  }
  0x19   : > { %6676 = sst [smem:[#allocation18_spill]] %s4539_s26  ;;  %s43_s30 = sadd.s32 1, %s4539_s26 }
  0x1a   : > { %6677 = sst [smem:[#allocation19_spill]] %s4543_s27  ;;  %p44_p0 = scmp.ge.s32.totalorder %s43_s30, 3 }
  0x1b   : > { %s46_s13 = sadd.s32 1, %s4543_s27  ;;  %s79_s14 = sadd.s32 1, %s4527_s23 }
  0x1c   : > { %p86_p1 = scmp.ne.s32.totalorder %s4527_s23, %s4523_s22  ;;  %s6761_s30 = smov (%p44_p0, %s43_s30), 0 }
  0x1d   : > { %6678 = sst [smem:[#allocation20_spill]] %s6761_s30  ;;  %s6763_s13 = smov (!%p44_p0, %s46_s13), %s4543_s27 }
  0x1e   : > { %s76_s15 = ssub.s32 %s4539_s26, %s6761_s30  ;;  %p87_p2 = scmp.eq.s32.totalorder %s4547_s28, 0 }
  0x1f   : > { %p48_p3 = scmp.ge.s32.totalorder %s6763_s13, 2  ;;  %p77_p4 = scmp.eq.s32.totalorder %s76_s15, 0 }
  0x20   : > { %p88_p5 = por %p87_p2, %p86_p1  ;;  %p92_p6 = scmp.ne.s32.totalorder %s4523_s22, %s4519_s21 }
  0x21   : > { %s6765_s13 = smov (%p48_p3, %s6763_s13), 0  ;;  %p93_p7 = scmp.eq.s32.totalorder %s6658_s29, 0 }
  0x22   : > { %6679 = sst [smem:[#allocation21_spill]] %s6765_s13  ;;  %p3945_p8 = scmp.lt.s32.totalorder %s4547_s28, 6 }
  0x23   : > { %s4678_s16 = scalar_select %p77_p4, %s4527_s23, %s79_s14  }
  0x24   : > { %s4684_s17 = sand.u32 1, %s4527_s23   ;;  %p4686_p9 = por %p93_p7, %p92_p6 }
  0x25   : > { %6680 = sst [smem:[#allocation22_spill]] %s4678_s16  ;;  %s428_s19 = sand.u32 1, %s4547_s28  }
  0x26   : > { %p4691_p10 = pnand %p3945_p8, %p88_p5  ;;  %s6683_s2 = sld [smem:[#allocation25_spill]] }
  0x27   : > { %s431_s13 = scalar_lea.vmem [#allocation5], %s4684_s17  ;;  %p3742_p11 = scmp.ge.s32.totalorder %s4547_s28, 1 }
  0x28   : > { %s438_s30 = sshll.u32 %s431_s13, 4  ;;  %s429_s27 = scalar_lea.sflag [#allocation6], %s428_s19  ;;  %s439_s30 = int_to_ptr.vmem [resolvable:$true] %s438_s30 }
  0x29   : > { %p552_p12 = scmp.lt.s32.totalorder %s4547_s28, 7  ;;  %s6684_s6 = sld [smem:[#allocation28_spill]] }
  0x2a   : > { %s481_s13 = scalar_lea.vmem [#allocation8], %s4684_s17  ;;  %s479_s12 = scalar_lea.sflag [#allocation9], %s428_s19 }
  0x2b   : > { %p4708_p13 = pnand %p3742_p11, %p552_p12  ;;  %s6686_s1 = sld [smem:[#allocation24_spill]] }
  0x2c   : > { %s434_s15 = scalar_lea.hbm %s6683_s2, %s4539_s26  ;;  %s488_s2 = sshll.u32 %s481_s13, 4  ;;  %s489_s2 = int_to_ptr.vmem [resolvable:$true] %s488_s2 }
  0x2d   : > { %s436_s29 = sshll.u32 %s434_s15, 4  ;;  %s6687_s5 = sld [smem:[#allocation27_spill]]  ;;  %s437_s29 = int_to_ptr.hbm [resolvable:$true] %s436_s29 }
  0x2e   : > { %3932 = dma.hbm_to_vmem [thread:$0]  (!%p4691_p10), %s437_s29, 16, %s439_s30, %s429_s27  }
  0x2f   : > { %s484_s21 = scalar_lea.hbm %s6684_s6, %s4539_s26  ;;  %s414_s6 = scalar_lea.vmem [#allocation3], %s4684_s17 }
  0x30   : > { %s486_s15 = sshll.u32 %s484_s21, 4  ;;  %s421_s11 = sshll.u32 %s414_s6, 4  ;;  %s487_s15 = int_to_ptr.hbm [resolvable:$true] %s486_s15  ;;  %s422_s11 = int_to_ptr.vmem [resolvable:$true] %s421_s11 }
  0x31   : > { %3938 = dma.hbm_to_vmem [thread:$0]  (!%p4691_p10), %s487_s15, 16, %s489_s2, %s479_s12  }
  0x32   : > { %s417_s30 = scalar_lea.hbm %s6686_s1, %s4539_s26  ;;  %s412_s21 = scalar_lea.sflag [#allocation4], %s4684_s17 }
  0x33   : > { %s419_s16 = sshll.u32 %s417_s30, 4  ;;  %s467_s2 = scalar_lea.hbm %s6687_s5, %s4539_s26  ;;  %s420_s16 = int_to_ptr.hbm [resolvable:$true] %s419_s16 }
  0x34   : > { %3929 = dma.hbm_to_vmem [thread:$0]  (!%p4691_p10), %s420_s16, 16, %s422_s11, %s412_s21  }
  0x35   : > { %s469_s15 = sshll.u32 %s467_s2, 4  ;;  %s464_s29 = scalar_lea.vmem [#allocation7], %s4684_s17  ;;  %s470_s15 = int_to_ptr.hbm [resolvable:$true] %s469_s15 }
  0x36   : > { %s471_s23 = sshll.u32 %s464_s29, 4  ;;  %s6688_s7 = sld [smem:[#allocation29_spill]]  ;;  %s472_s23 = int_to_ptr.vmem [resolvable:$true] %s471_s23 }
  0x37   : > { %3935 = dma.hbm_to_vmem [thread:$0]  (!%p4691_p10), %s470_s15, 16, %s472_s23, %s429_s27  }
  0x38   : > { %s498_s9 = scalar_lea.vmem [#allocation10], %s4684_s17  ;;  %s3739_s16 = sshll.u32 %s4684_s17, 6 }
  0x39   : > { %s505_s11 = sshll.u32 %s498_s9, 4  ;;  %s3886_s21 = sshll.u32 %s4539_s26, 6  ;;  %s506_s11 = int_to_ptr.vmem [resolvable:$true] %s505_s11 }
  0x3a   : > { %s6689_s8 = sld [smem:[#allocation30_spill]]  ;;  %s516_s27 = scalar_lea.vmem [#allocation11], %s3739_s16 }
  0x3b   : > { %s524_s15 = sshll.u32 %s516_s27, 4  ;;  %s513_s23 = scalar_lea.sflag [#allocation12], %s4684_s17  ;;  %s525_s15 = int_to_ptr.vmem [resolvable:$true] %s524_s15 }
  0x3c   : > { %s501_s1 = scalar_lea.hbm %s6688_s7, %s4539_s26  ;;  %s4550_s6 = smov 8  }
  0x3d   : > { %s503_s10 = sshll.u32 %s501_s1, 4  ;;  %s4549_s1 = smov 128   ;;  %s504_s10 = int_to_ptr.hbm [resolvable:$true] %s503_s10 }
  0x3e   : > { %3941 = dma.hbm_to_vmem [thread:$0]  (!%p4691_p10), %s504_s10, 16, %s506_s11, %s479_s12  }
  0x3f   : > { %556 = sbr.rel (%p4708_p13) target bundleno = 2381 (0x94d), region = 68  ;;  %s4748_s9 = sand.u32 (!%p4708_p13), 1, %s4523_s22  }
  0x40   : > { %s521_s2 = scalar_lea.hbm %s6689_s8, %s3886_s21  ;;  %s559_s10 = scalar_lea.sflag (!%p4708_p13), [#allocation4], %s4748_s9 }
  0x41   : > { %s522_s29 = sshll.u32 %s521_s2, 4  ;;  %s523_s29 = int_to_ptr.hbm [resolvable:$true] %s522_s29 }
  0x42   : > { %3944 = dma.hbm_to_vmem [thread:$0]  (!%p4691_p10), %s523_s29, 1024, %s525_s15, %s513_s23, %s4549_s1, %s4549_s1, %s4550_s6  }
  0x44   : > { %4502 = dma.done.wait (%p4686_p9), %s559_s10, 16  }
  0x45   : > { %4504 = vsyncadd (%p4686_p9), %s559_s10, 4294967280  ;;  %s6690_s17 = sadd.s32 4294967295, %s4547_s28  }
  0x46   : > { %s567_s20 = sand.u32 1, %s6690_s17  }
  0x47   : > { %s568_s14 = scalar_lea.sflag [#allocation6], %s567_s20 }
  0x48   : > { %4506 = dma.done.wait (%p4686_p9), %s568_s14, 32  }
  0x49   : > { %4508 = vsyncadd (%p4686_p9), %s568_s14, 4294967264  ;;  %s586_s16 = scalar_lea.sflag [#allocation9], %s567_s20 }
  0x4a   : > { %4510 = dma.done.wait (%p4686_p9), %s586_s16, 32  }
  0x4b   : > { %4512 = vsyncadd (%p4686_p9), %s586_s16, 4294967264  ;;  %s3743_s19 = sshll.u32 %s4748_s9, 6  ;;  %s604_s2 = scalar_lea.sflag [#allocation12], %s4748_s9 }
  0x4c   : > { %s4772_s27 = scalar_lea.vmem [#allocation11], %s3743_s19 }
  0x4d   : > { %4514 = dma.done.wait (%p4686_p9), %s604_s2, 1024  }
  0x4e   : > { %4516 = vsyncadd (%p4686_p9), %s604_s2, 4294966272  ;;  %s3744_s15 = sshll.u32 %s4535_s25, 3  ;;  %p701_p0 = scmp.lt.s32.totalorder %s4531_s24, 2 }
  0x4f   : > { %p696_p1 = scmp.lt.s32.totalorder %s3744_s15, 15  ;;  %s6691_s3 = sld [smem:[#allocation26_spill]] }
  0x50   : > { %s4781_s29 = scalar_select %p701_p0, %s4531_s24, 2 }
  0x51   : > { %s6767_s15 = smov (!%p696_p1, %s3744_s15), 15  ;;  %s6692_s0 = sld [smem:[#allocation23_spill]] }
  0x52   : > { %s3887_s23 = sshll.u32 %s4781_s29, 7  ;;  %s3888_s1 = sshll.u32 %s4781_s29, 6 }
  0x53   : > { %s3745_s6 = sshll.u32 %s6767_s15, 3  ;;  %s4796_s2 = scalar_lea.vmem %s6649_s4, %s3888_s1 }
  0x54   : > { %s6693_s11 = sld [smem:[#allocation31_spill]]  ;;  %p3754_p2 = scmp.ne.s32.totalorder %s4531_s24, 0 }
  0x55   : > { %s4788_s18 = scalar_lea.vmem %s6691_s3, %s3887_s23  ;;  %s6694_s5 = sld [smem:[#allocation32_spill]] }
  0x56   : > { %s6695_s3 = sld [smem:[#allocation33_spill]] }
  0x57   : > { %s699_s25 = scalar_lea.vmem %s6692_s0, %s3745_s6  ;;  %s6696_s0 = sld [smem:[#allocation34_spill]] }
  0x59   : > { %731 = sbr.rel (%p3754_p2) target bundleno = 103 (0x67), region = 96 }
  0x5a   : > { %s713_s30 = scalar_lea.vmem %s6693_s11, %s4781_s29 }
  0x5b   : > { %s4805_s7 = scalar_lea.vmem %s6694_s5, %s3887_s23 }
  0x5c   : > { %s721_s8 = scalar_lea.vmem %s6695_s3, %s4781_s29 }
  0x5d   : > { %s4814_s26 = scalar_lea.vmem %s6696_s0, %s3745_s6 }
  0x5e   : > { %v732_v0 = vld [vmem:[%s699_s25] sm:$0xff]  ;;  %vm740_vm0 = vcmask 523264   ;;  %v733_v1 = vld [vmem:[%s699_s25 + $0x8] sm:$0xff]  ;;  %v734_v2 = vld [vmem:[%s699_s25 + $0x10] sm:$0xff] }
  0x5f   : > { %741 = vst.msk [vmem:[#allocation2] sm:$0xff] %vm740_vm0, %v732_v0  ;;  %v735_v3 = vld [vmem:[%s699_s25 + $0x18] sm:$0xff]  ;;  %v736_v4 = vld [vmem:[%s699_s25 + $0x20] sm:$0xff]  ;;  %v737_v5 = vld [vmem:[%s699_s25 + $0x28] sm:$0xff] }
  0x60   : > { %742 = vst.msk [vmem:[#allocation2 + $0x8] sm:$0xff] %vm740_vm0, %v733_v1  ;;  %v738_v6 = vld [vmem:[%s699_s25 + $0x30] sm:$0xff]  ;;  %v739_v7 = vld [vmem:[%s699_s25 + $0x38] sm:$0xff] }
  0x61   : > { %743 = vst.msk [vmem:[#allocation2 + $0x10] sm:$0xff] %vm740_vm0, %v734_v2 }
  0x62   : > { %744 = vst.msk [vmem:[#allocation2 + $0x18] sm:$0xff] %vm740_vm0, %v735_v3 }
  0x63   : > { %745 = vst.msk [vmem:[#allocation2 + $0x20] sm:$0xff] %vm740_vm0, %v736_v4 }
  0x64   : > { %746 = vst.msk [vmem:[#allocation2 + $0x28] sm:$0xff] %vm740_vm0, %v737_v5 }
  0x65   : > { %747 = vst.msk [vmem:[#allocation2 + $0x30] sm:$0xff] %vm740_vm0, %v738_v6 }
  0x66   : > { %748 = vst.msk [vmem:[#allocation2 + $0x38] sm:$0xff] %vm740_vm0, %v739_v7 }
  0x67 PF: > { %vm759_vm1 = vcmask 523264   ;;  %v750_v9 = vld [vmem:[#allocation2 + $0x8] sm:$0xff]  ;;  %v749_v10 = vld [vmem:[#allocation2] sm:$0xff]  ;;  %v4551_v24 = vmov 64.0   ;;  %v979_v7 = vld [vmem:[%s4788_s18 + $0x70] sm:$0xff]  ;;  %s6697_s0 = scalar_lea.vmem [#allocation3], %s4748_s9 }
  0x68   : > { %v763_v12 = vsel %vm759_vm1, %v750_v9, 0.0  ;;  %v760_v13 = vsel %vm759_vm1, %v749_v10, 0.0  ;;  %v751_v20 = vld [vmem:[#allocation2 + $0x10] sm:$0xff]  ;;  %4087 = vrcp.f32 %v4551_v24  ;;  %1022 = vmatpush.msra.mxu0 %v979_v7  ;;  %3890 = vmatpush.msra.mxu1 %v979_v7  ;;  %s6698_s3 = scalar_lea.vmem [#allocation5], %s4748_s9  ;;  %s4552_s5 = smov 96  }
  0x69   : > { %764 = vadd.xlane.f32.xlu2 %v763_v12  ;;  %761 = vadd.xlane.f32.xlu1 %v760_v13  ;;  %v752_v21 = vld [vmem:[#allocation2 + $0x18] sm:$0xff]  ;;  %v766_v22 = vsel %vm759_vm1, %v751_v20, 0.0  ;;  %v969_v12 = vld [vmem:[%s4788_s18 + $0x20] sm:$0xff]  ;;  %v967_v13 = vld [vmem:[%s4788_s18 + $0x10] sm:$0xff]  ;;  %s4553_s12 = smov 112   ;;  %s4554_s11 = smov 80  }
  0x6a   : > { %v753_v8 = vld [vmem:[#allocation2 + $0x20] sm:$0xff]  ;;  %v769_v23 = vsel %vm759_vm1, %v752_v21, 0.0  ;;  %s4555_s21 = smov 64   ;;  %s4556_s13 = smov 32  }
  0x6b   : > { %v772_v11 = vsel %vm759_vm1, %v753_v8, 0.0  ;;  %v754_v14 = vld [vmem:[#allocation2 + $0x28] sm:$0xff]  ;;  %s4557_s23 = smov 48   ;;  %s4558_s1 = smov 16  }
  0x6c   : > { %773 = vadd.xlane.f32.xlu0 %v772_v11  ;;  %v755_v16 = vld [vmem:[#allocation2 + $0x30] sm:$0xff]  ;;  %v775_v17 = vsel %vm759_vm1, %v754_v14, 0.0  ;;  %s6747_s6 = scalar_lea.vmem [#allocation7], %s4748_s9  ;;  %s6749_s25 = scalar_lea.vmem [#allocation10], %s4748_s9 }
  0x6d   : > { %v756_v15 = vld [vmem:[#allocation2 + $0x38] sm:$0xff]  ;;  %v778_v19 = vsel %vm759_vm1, %v755_v16, 0.0  ;;  %v971_v11 = vld [vmem:[%s4788_s18 + $0x30] sm:$0xff]  ;;  %p3883_p3 = scmp.ne.s32.totalorder %s4531_s24, 2 }
  0x6e   : > { %v781_v18 = vsel %vm759_vm1, %v756_v15, 0.0  ;;  %v4088_v25 = vpop.eup %4087 }
  0x6f   : > { %v785_v26 = vmul.f32 64.0, %v4088_v25  ;;  %vm789_vm2 = vweird.f32 %v4088_v25 }
  0x71   : > { %782 = vadd.xlane.f32.xlu2 %v781_v18  ;;  %779 = vadd.xlane.f32.xlu1 %v778_v19  ;;  %v786_v27 = vsub.f32 1.0, %v785_v26 }
  0x73   : > { %v787_v28 = vmul.f32 %v4088_v25, %v786_v27 }
  0x74   : > { %776 = vadd.xlane.f32.xlu0 %v775_v17 }
  0x75   : > { %v788_v29 = vadd.f32 %v4088_v25, %v787_v28 }
  0x77   : > { %v4825_v30 = vsel %vm789_vm2, %v4088_v25, %v788_v29 }
  0x79   : > { %770 = vadd.xlane.f32.xlu1 %v769_v23 }
  0x7c   : > { %767 = vadd.xlane.f32.xlu0 %v766_v22 }
  0xdc   : > { %v765_v32 = vpop.xlane.xlu2 %764  ;;  %v762_v34 = vpop.xlane.xlu1 %761 }
  0xdd   : > { %v791_v35 = vmul.f32 %v4825_v30, %v762_v34  ;;  %v792_v44 = vmul.f32 %v4825_v30, %v765_v32 }
  0xdf   : > { %v774_v31 = vpop.xlane.xlu0 %773  ;;  %v4831_v37 = vsub.f32 %v749_v10, %v791_v35  ;;  %v4849_v52 = vsub.f32 %v750_v9, %v792_v44  ;;  %v975_v9 = vld [vmem:[%s4788_s18 + $0x50] sm:$0xff]  ;;  %v973_v10 = vld [vmem:[%s4788_s18 + $0x40] sm:$0xff]  ;;  %v980_v44 = vld [vmem:[%s4788_s18 + $0x78] sm:$0xff] }
  0xe0   : > { %v795_v33 = vmul.f32 %v4825_v30, %v774_v31 }
  0xe1   : > { %v807_v39 = vmul.f32 %v4831_v37, %v4831_v37  ;;  %v808_v61 = vmul.f32 %v4849_v52, %v4849_v52 }
  0xe2   : > { %v4829_v36 = vsub.f32 %v753_v8, %v795_v33  ;;  %v977_v8 = vld [vmem:[%s4788_s18 + $0x60] sm:$0xff] }
  0xe3   : > { %v815_v43 = vsel %vm759_vm1, %v807_v39, 0.0  ;;  %v818_v1 = vsel %vm759_vm1, %v808_v61, 0.0  ;;  %1023 = vmatpush.msra.mxu0 %v977_v8  ;;  %3891 = vmatpush.msra.mxu1 %v977_v8 }
  0xe4   : > { %v811_v38 = vmul.f32 %v4829_v36, %v4829_v36  ;;  %v783_v42 = vpop.xlane.xlu2 %782  ;;  %816 = vadd.xlane.f32.xlu1 %v815_v43  ;;  %v780_v47 = vpop.xlane.xlu1 %779 }
  0xe5   : > { %v798_v46 = vmul.f32 %v4825_v30, %v783_v42  ;;  %v797_v48 = vmul.f32 %v4825_v30, %v780_v47  ;;  %1024 = vmatpush.msra.mxu0 %v975_v9  ;;  %3892 = vmatpush.msra.mxu1 %v975_v9 }
  0xe6   : > { %v827_v40 = vsel %vm759_vm1, %v811_v38, 0.0 }
  0xe7   : > { %v777_v41 = vpop.xlane.xlu0 %776  ;;  %828 = vadd.xlane.f32.xlu2 %v827_v40  ;;  %v4845_v50 = vsub.f32 %v756_v15, %v798_v46  ;;  %v4847_v51 = vsub.f32 %v755_v16, %v797_v48  ;;  %1025 = vmatpush.msra.mxu0 %v973_v10 }
  0xe8   : > { %v796_v45 = vmul.f32 %v4825_v30, %v777_v41  ;;  %3893 = vmatpush.msra.mxu1 %v973_v10 }
  0xe9   : > { %v814_v54 = vmul.f32 %v4845_v50, %v4845_v50  ;;  %v813_v55 = vmul.f32 %v4847_v51, %v4847_v51  ;;  %1026 = vmatpush.msra.mxu0 %v971_v11 }
  0xea   : > { %v4843_v49 = vsub.f32 %v754_v14, %v796_v45  ;;  %3894 = vmatpush.msra.mxu1 %v971_v11  ;;  %v965_v14 = vld [vmem:[%s4788_s18] sm:$0xff]  ;;  %v978_v45 = vld [vmem:[%s4788_s18 + $0x68] sm:$0xff] }
  0xeb   : > { %v836_v57 = vsel %vm759_vm1, %v814_v54, 0.0  ;;  %v833_v59 = vsel %vm759_vm1, %v813_v55, 0.0  ;;  %1027 = vmatpush.msra.mxu0 %v969_v12  ;;  %v976_v55 = vld [vmem:[%s4788_s18 + $0x58] sm:$0xff] }
  0xec   : > { %v812_v53 = vmul.f32 %v4843_v49, %v4843_v49  ;;  %837 = vadd.xlane.f32.xlu1 %v836_v57  ;;  %v771_v62 = vpop.xlane.xlu1 %770  ;;  %3895 = vmatpush.msra.mxu1 %v969_v12 }
  0xed   : > { %v794_v63 = vmul.f32 %v4825_v30, %v771_v62  ;;  %1028 = vmatpush.msra.mxu0 %v967_v13 }
  0xee   : > { %v830_v56 = vsel %vm759_vm1, %v812_v53, 0.0  ;;  %3896 = vmatpush.msra.mxu1 %v967_v13  ;;  %v4933_v13 = vld [vmem:[%s6698_s3] ss:$0 sm:$0xff] }
  0xef   : > { %831 = vadd.xlane.f32.xlu0 %v830_v56  ;;  %v768_v58 = vpop.xlane.xlu0 %767  ;;  %834 = vadd.xlane.f32.xlu2 %v833_v59  ;;  %v4869_v3 = vsub.f32 %v752_v21, %v794_v63  ;;  %v974_v63 = vld [vmem:[%s4788_s18 + $0x48] sm:$0xff] }
  0xf0   : > { %v793_v60 = vmul.f32 %v4825_v30, %v768_v58  ;;  %1029 = vmatpush.msra.mxu0 %v965_v14  ;;  %3897 = vmatpush.msra.mxu1 %v965_v14 }
  0xf1   : > { %v810_v5 = vmul.f32 %v4869_v3, %v4869_v3 }
  0xf2   : > { %v4864_v0 = vsub.f32 %v751_v20, %v793_v60  ;;  %1063 = vmatpush.msrb.mxu1 %v980_v44 }
  0xf3   : > { %v824_v6 = vsel %vm759_vm1, %v810_v5, 0.0 }
  0xf4   : > { %v809_v2 = vmul.f32 %v4864_v0, %v4864_v0  ;;  %1064 = vmatpush.msrb.mxu1 %v978_v45 }
  0xf6   : > { %v821_v4 = vsel %vm759_vm1, %v809_v2, 0.0  ;;  %v4923_v2 = vld [vmem:[%s6697_s0] ss:$0 sm:$0xff]  ;;  %1065 = vmatpush.msrb.mxu1 %v976_v55 }
  0xf7   : > { %819 = vadd.xlane.f32.xlu0 %v818_v1  ;;  %822 = vadd.xlane.f32.xlu2 %v821_v4 }
  0xf8   : > { %1066 = vmatpush.msrb.mxu1 %v974_v63 }
  0xff   : > { %825 = vadd.xlane.f32.xlu0 %v824_v6 }
 0x157   : > { %v817_v17 = vpop.xlane.xlu1 %816 }
 0x158   : > { %v839_v18 = vmul.f32 %v817_v17, %v4825_v30 }
 0x15a   : > { %v829_v15 = vpop.xlane.xlu2 %828  ;;  %v847_v20 = vadd.f32 1e-05, %v839_v18 }
 0x15b   : > { %v843_v16 = vmul.f32 %v829_v15, %v4825_v30  ;;  %v972_v15 = vld [vmem:[%s4788_s18 + $0x38] sm:$0xff] }
 0x15c   : > { %vm861_vm3 = vweird.f32 %v847_v20  ;;  %1067 = vmatpush.msrb.mxu1 %v972_v15 }
 0x15d   : > { %v851_v19 = vadd.f32 1e-05, %v843_v16  ;;  %v970_v16 = vld [vmem:[%s4788_s18 + $0x28] sm:$0xff] }
 0x15e   : > { %1068 = vmatpush.msrb.mxu1 %v970_v16 }
 0x15f   : > { %4089 = vrsqrt.f32 %v851_v19  ;;  %v838_v24 = vpop.xlane.xlu1 %837  ;;  %vm901_vm6 = vweird.f32 %v851_v19 }
 0x160   : > { %4091 = vrsqrt.f32 %v847_v20  ;;  %v846_v26 = vmul.f32 %v838_v24, %v4825_v30 }
 0x162   : > { %v832_v21 = vpop.xlane.xlu0 %831  ;;  %v835_v23 = vpop.xlane.xlu2 %834  ;;  %v4892_v33 = vadd.f32 1e-05, %v846_v26 }
 0x163   : > { %v844_v22 = vmul.f32 %v832_v21, %v4825_v30  ;;  %v845_v25 = vmul.f32 %v835_v23, %v4825_v30 }
 0x165   : > { %v4090_v27 = vpop.eup %4089  ;;  %v4888_v28 = vadd.f32 1e-05, %v844_v22  ;;  %v4890_v32 = vadd.f32 1e-05, %v845_v25  ;;  %v968_v22 = vld [vmem:[%s4788_s18 + $0x18] sm:$0xff] }
 0x166   : > { %v4092_v29 = vpop.eup %4091  ;;  %v896_v31 = vmul.f32 %v4090_v27, %v851_v19  ;;  %vm902_vm5 = vweird.f32 %v4090_v27  ;;  %1069 = vmatpush.msrb.mxu1 %v968_v22 }
 0x167   : > { %v856_v34 = vmul.f32 %v4092_v29, %v847_v20  ;;  %4093 = vrsqrt.f32 %v4888_v28  ;;  %vm862_vm4 = vweird.f32 %v4092_v29  ;;  %vm903_vm8 = vmor %vm901_vm6, %vm902_vm5  ;;  %vm911_vm10 = vweird.f32 %v4888_v28 }
 0x168   : > { %v897_v35 = vmul.f32 %v4090_v27, %v896_v31  ;;  %4095 = vrsqrt.f32 %v4890_v32  ;;  %vm863_vm7 = vmor %vm861_vm3, %vm862_vm4  ;;  %vm921_vm12 = vweird.f32 %v4890_v32  ;;  %vm931_vm4 = vweird.f32 %v4892_v33 }
 0x169   : > { %v857_v38 = vmul.f32 %v4092_v29, %v856_v34  ;;  %4097 = vrsqrt.f32 %v4892_v33 }
 0x16a   : > { %v898_v39 = vmul.f32 0.5, %v897_v35  ;;  %v820_v40 = vpop.xlane.xlu0 %819  ;;  %v823_v43 = vpop.xlane.xlu2 %822 }
 0x16b   : > { %v858_v41 = vmul.f32 0.5, %v857_v38  ;;  %v840_v42 = vmul.f32 %v820_v40, %v4825_v30  ;;  %v841_v47 = vmul.f32 %v823_v43, %v4825_v30 }
 0x16c   : > { %v899_v46 = vsub.f32 1.5, %v898_v39 }
 0x16d   : > { %v4901_v48 = vpop.eup %4093  ;;  %v859_v53 = vsub.f32 1.5, %v858_v41  ;;  %v4903_v54 = vadd.f32 1e-05, %v840_v42  ;;  %v4910_v59 = vadd.f32 1e-05, %v841_v47 }
 0x16e   : > { %v4906_v56 = vpop.eup %4095  ;;  %v900_v57 = vmul.f32 %v4090_v27, %v899_v46  ;;  %v906_v58 = vmul.f32 %v4901_v48, %v4888_v28  ;;  %vm912_vm9 = vweird.f32 %v4901_v48 }
 0x16f   : > { %v4912_v60 = vpop.eup %4097  ;;  %v860_v61 = vmul.f32 %v4092_v29, %v859_v53  ;;  %v916_v62 = vmul.f32 %v4906_v56, %v4890_v32  ;;  %4099 = vrsqrt.f32 %v4903_v54  ;;  %vm913_vm11 = vmor %vm911_vm10, %vm912_vm9  ;;  %vm922_vm13 = vweird.f32 %v4906_v56 }
 0x170   : > { %v907_v1 = vmul.f32 %v4901_v48, %v906_v58  ;;  %v926_v5 = vmul.f32 %v4912_v60, %v4892_v33  ;;  %4101 = vrsqrt.f32 %v4910_v59  ;;  %v904_v10 = vsel %vm903_vm8, %v4090_v27, %v900_v57  ;;  %v966_v27 = vld [vmem:[%s4788_s18 + $0x8] sm:$0xff]  ;;  %vm4971_vm15 = vmor %vm921_vm12, %vm922_vm13  ;;  %s6748_s18 = scalar_lea.vmem [#allocation8], %s4748_s9 }
 0x171   : > { %v917_v4 = vmul.f32 %v4906_v56, %v916_v62  ;;  %v864_v6 = vsel %vm863_vm7, %v4092_v29, %v860_v61  ;;  %v939_v14 = vmul.f32 %v904_v10, %v4829_v36  ;;  %1070 = vmatpush.msrb.mxu1 %v966_v27  ;;  %vm871_vm0 = vweird.f32 %v4903_v54 }
 0x172   : > { %v908_v7 = vmul.f32 0.5, %v907_v1  ;;  %v826_v8 = vpop.xlane.xlu0 %825  ;;  %v935_v9 = vmul.f32 %v864_v6, %v4831_v37  ;;  %v927_v37 = vmul.f32 %v4912_v60, %v926_v5  ;;  %vm881_vm2 = vweird.f32 %v4910_v59 }
 0x173   : > { %v918_v11 = vmul.f32 0.5, %v917_v4  ;;  %v842_v12 = vmul.f32 %v826_v8, %v4825_v30  ;;  %v950_v21 = vmul.f32 %v4923_v2, %v939_v14  ;;  %vm932_vm6 = vweird.f32 %v4912_v60 }
 0x174   : > { %v909_v17 = vsub.f32 1.5, %v908_v7  ;;  %v946_v18 = vmul.f32 %v4923_v2, %v935_v9  ;;  %v928_v34 = vmul.f32 0.5, %v927_v37  ;;  %vm933_vm8 = vmor %vm931_vm4, %vm932_vm6  ;;  %vm1248_vm12 = vcmask 130048  }
 0x175   : > { %v4100_v19 = vpop.eup %4099  ;;  %v4941_v20 = vadd.f32 1e-05, %v842_v12  ;;  %v919_v36 = vsub.f32 1.5, %v918_v11  ;;  %v4959_v28 = vadd.f32 %v4933_v13, %v950_v21 }
 0x176   : > { %v910_v23 = vmul.f32 %v4901_v48, %v909_v17  ;;  %v866_v24 = vmul.f32 %v4100_v19, %v4903_v54  ;;  %v4102_v25 = vpop.eup %4101  ;;  %v4950_v26 = vadd.f32 %v4933_v13, %v946_v18  ;;  %vm872_vm14 = vweird.f32 %v4100_v19 }
 0x177   : > { %4103 = vrsqrt.f32 %v4941_v20  ;;  %v876_v31 = vmul.f32 %v4102_v25, %v4910_v59  ;;  %v920_v38 = vmul.f32 %v4906_v56, %v919_v36  ;;  %3759 = vmatmul.msk.f32.vlgmr.msra.gmra.mxu1 %vm759_vm1, %v4959_v28  ;;  %v929_v47 = vsub.f32 1.5, %v928_v34  ;;  %vm873_vm5 = vmor %vm871_vm0, %vm872_vm14 }
 0x178   : > { %v867_v29 = vmul.f32 %v4100_v19, %v866_v24  ;;  %3755 = vmatmul.msk.f32.vlgmr.msra.gmra.mxu0 %vm759_vm1, %v4950_v26  ;;  %v914_v35 = vsel %vm913_vm11, %v4901_v48, %v910_v23  ;;  %vm882_vm3 = vweird.f32 %v4102_v25  ;;  %vm891_vm9 = vweird.f32 %v4941_v20 }
 0x179   : > { %v877_v40 = vmul.f32 %v4102_v25, %v876_v31  ;;  %v940_v41 = vmul.f32 %v914_v35, %v4843_v49  ;;  %v924_v55 = vsel %vm4971_vm15, %v4906_v56, %v920_v38  ;;  %vm883_vm7 = vmor %vm881_vm2, %vm882_vm3  ;;  %v930_v62 = vmul.f32 %v4912_v60, %v929_v47 }
 0x17a   : > { %v868_v39 = vmul.f32 0.5, %v867_v29  ;;  %v941_v61 = vmul.f32 %v924_v55, %v4847_v51 }
 0x17b   : > { %v878_v43 = vmul.f32 0.5, %v877_v40  ;;  %v951_v44 = vmul.f32 %v4923_v2, %v940_v41  ;;  %v934_v6 = vsel %vm933_vm8, %v4912_v60, %v930_v62 }
 0x17c   : > { %v869_v42 = vsub.f32 1.5, %v868_v39  ;;  %v952_v5 = vmul.f32 %v4923_v2, %v941_v61  ;;  %v942_v9 = vmul.f32 %v934_v6, %v4845_v50 }
 0x17d   : > { %v4104_v45 = vpop.eup %4103  ;;  %v879_v48 = vsub.f32 1.5, %v878_v43  ;;  %v962_v32 = vadd.f32 %v4933_v13, %v951_v44 }
 0x17e   : > { %v870_v49 = vmul.f32 %v4100_v19, %v869_v42  ;;  %v886_v53 = vmul.f32 %v4104_v45, %v4941_v20  ;;  %vm892_vm10 = vweird.f32 %v4104_v45  ;;  %v963_v7 = vadd.f32 %v4933_v13, %v952_v5 }
 0x17f   : > { %v880_v57 = vmul.f32 %v4102_v25, %v879_v48  ;;  %3760 = vmatmul.msk.f32.gmra.mxu1 %vm759_vm1, %v962_v32  ;;  %vm893_vm11 = vmor %vm891_vm9, %vm892_vm10  ;;  %v953_v12 = vmul.f32 %v4923_v2, %v942_v9 }
 0x180   : > { %v887_v54 = vmul.f32 %v4104_v45, %v886_v53  ;;  %v874_v58 = vsel %vm873_vm5, %v4100_v19, %v870_v49 }
 0x181   : > { %v936_v59 = vmul.f32 %v874_v58, %v4849_v52  ;;  %v884_v1 = vsel %vm883_vm7, %v4102_v25, %v880_v57  ;;  %v964_v60 = vadd.f32 %v4933_v13, %v953_v12 }
 0x182   : > { %v888_v63 = vmul.f32 0.5, %v887_v54  ;;  %v937_v52 = vmul.f32 %v884_v1, %v4864_v0 }
 0x183   : > { %v947_v33 = vmul.f32 %v4923_v2, %v936_v59 }
 0x184   : > { %v889_v56 = vsub.f32 1.5, %v888_v63  ;;  %v948_v8 = vmul.f32 %v4923_v2, %v937_v52 }
 0x185   : > { %v958_v4 = vadd.f32 %v4933_v13, %v947_v33 }
 0x186   : > { %v890_v51 = vmul.f32 %v4104_v45, %v889_v56  ;;  %v959_v11 = vadd.f32 %v4933_v13, %v948_v8 }
 0x187   : > { %3756 = vmatmul.msk.f32.gmra.mxu0 %vm759_vm1, %v958_v4  ;;  %3761 = vmatmul.msk.f32.gmra.mxu1 %vm759_vm1, %v963_v7 }
 0x188   : > { %v894_v10 = vsel %vm893_vm11, %v4104_v45, %v890_v51 }
 0x189   : > { %v938_v0 = vmul.f32 %v894_v10, %v4869_v3 }
 0x18b   : > { %v949_v14 = vmul.f32 %v4923_v2, %v938_v0 }
 0x18d   : > { %v960_v15 = vadd.f32 %v4933_v13, %v949_v14 }
 0x18f   : > { %3757 = vmatmul.msk.f32.gmra.mxu0 %vm759_vm1, %v959_v11  ;;  %3762 = vmatmul.msk.f32.gmra.mxu1 %vm759_vm1, %v964_v60 }
 0x197   : > { %3758 = vmatmul.msk.f32.gmra.mxu0 %vm759_vm1, %v960_v15  ;;  %3763 = vmatmul.msk.f32.vlgmr.msrb.gmra.mxu1 %vm759_vm1, %v4950_v26 }
 0x19f   : > { %3764 = vmatmul.msk.f32.gmra.mxu1 %vm759_vm1, %v958_v4 }
 0x1a7   : > { %3765 = vmatmul.msk.f32.gmra.mxu1 %vm759_vm1, %v959_v11 }
 0x1af   : > { %3766 = vmatmul.msk.f32.gmra.mxu1 %vm759_vm1, %v960_v15 }
 0x1b7   : > { %3767 = vmatmul.msk.f32.gmra.mxu1 %vm759_vm1, %v4959_v28 }
 0x1bf   : > { %3768 = vmatmul.msk.f32.gmra.mxu1 %vm759_vm1, %v962_v32 }
 0x1c7   : > { %3769 = vmatmul.msk.f32.gmra.mxu1 %vm759_vm1, %v963_v7 }
 0x1cf   : > { %3770 = vmatmul.msk.f32.gmra.mxu1 %vm759_vm1, %v964_v60 }
 0x1f4   : > { %v5018_v50 = vpop.f32.mrf.mxu1 }
 0x1f5   : > { %1128 = vrot.lane.b32.xlu1 %v5018_v50, %s4552_s5  ;;  %1112 = vrot.lane.b32.xlu2 %v5018_v50, %s4553_s12  ;;  %v5026_v3 = vpop.f32.mrf.mxu0 }
 0x1f6   : > { %1144 = vrot.lane.b32.xlu0 %v5018_v50, %s4554_s11 }
 0x1fc   : > { %v5028_v2 = vpop.f32.mrf.mxu1 }
 0x1fd   : > { %1130 = vrot.lane.b32.xlu1 %v5028_v2, %s4552_s5  ;;  %1104 = vrot.lane.b32.xlu2 %v5026_v3, %s4553_s12 }
 0x1fe   : > { %1120 = vrot.lane.b32.xlu0 %v5026_v3, %s4552_s5 }
 0x204   : > { %v5036_v13 = vpop.f32.mrf.mxu0  ;;  %v5038_v16 = vpop.f32.mrf.mxu1 }
 0x205   : > { %1132 = vrot.lane.b32.xlu1 %v5038_v16, %s4552_s5  ;;  %1106 = vrot.lane.b32.xlu2 %v5036_v13, %s4553_s12 }
 0x206   : > { %1114 = vrot.lane.b32.xlu0 %v5028_v2, %s4553_s12 }
 0x20c   : > { %v5046_v17 = vpop.f32.mrf.mxu0  ;;  %v5054_v18 = vpop.f32.mrf.mxu1 }
 0x20d   : > { %1138 = vrot.lane.b32.xlu2 %v5036_v13, %s4554_s11  ;;  %1140 = vrot.lane.b32.xlu1 %v5046_v17, %s4554_s11 }
 0x20e   : > { %1146 = vrot.lane.b32.xlu0 %v5028_v2, %s4554_s11 }
 0x214   : > { %v5068_v19 = vpop.f32.mrf.mxu0  ;;  %v5128_v38 = vpop.f32.mrf.mxu1 }
 0x215   : > { %1116 = vrot.lane.b32.xlu2 %v5038_v16, %s4553_s12  ;;  %1118 = vrot.lane.b32.xlu1 %v5054_v18, %s4553_s12 }
 0x216   : > { %1122 = vrot.lane.b32.xlu0 %v5036_v13, %s4552_s5 }
 0x21c   : > { %v5140_v42 = vpop.f32.mrf.mxu1 }
 0x21d   : > { %1108 = vrot.lane.b32.xlu2 %v5046_v17, %s4553_s12  ;;  %1134 = vrot.lane.b32.xlu1 %v5054_v18, %s4552_s5  ;;  %v5223_v62 = vpack.i.bf16 %v5128_v38, %v5140_v42 }
 0x21e   : > { %1148 = vrot.lane.b32.xlu0 %v5038_v16, %s4554_s11 }
 0x224   : > { %v5158_v46 = vpop.f32.mrf.mxu1 }
 0x225   : > { %1124 = vrot.lane.b32.xlu2 %v5046_v17, %s4552_s5  ;;  %1126 = vrot.lane.b32.xlu1 %v5068_v19, %s4552_s5 }
 0x226   : > { %1150 = vrot.lane.b32.xlu0 %v5054_v18, %s4554_s11 }
 0x22c   : > { %v5168_v47 = vpop.f32.mrf.mxu1 }
 0x22d   : > { %1110 = vrot.lane.b32.xlu2 %v5068_v19, %s4553_s12  ;;  %v4065_v59 = vpack.i.bf16 %v5158_v46, %v5168_v47 }
 0x22e   : > { %1142 = vrot.lane.b32.xlu0 %v5068_v19, %s4554_s11 }
 0x234   : > { %v5182_v55 = vpop.f32.mrf.mxu1 }
 0x235   : > { %1136 = vrot.lane.b32.xlu2 %v5026_v3, %s4554_s11 }
 0x23c   : > { %v5190_v32 = vpop.f32.mrf.mxu1 }
 0x23d   : > { %v4025_v57 = vpack.i.bf16 %v5182_v55, %v5190_v32 }
 0x244   : > { %v5203_v54 = vpop.f32.mrf.mxu1 }
 0x24c   : > { %v5212_v58 = vpop.f32.mrf.mxu1 }
 0x24d   : > { %v4020_v61 = vpack.i.bf16 %v5203_v54, %v5212_v58 }
 0x24f   : > { %v5082_v37 = vpop.permute.xlu2 %1112 }
 0x250   : > { %1330 = vrot.lane.b32.xlu2 %v5082_v37, %s4555_s21 }
 0x257   : > { %v5086_v20 = vpop.permute.xlu2 %1104 }
 0x25f   : > { %v5088_v21 = vpop.permute.xlu2 %1106 }
 0x260   : > { %1324 = vrot.lane.b32.xlu2 %v5088_v21, %s4555_s21 }
 0x267   : > { %v5092_v22 = vpop.permute.xlu2 %1138  ;;  %v5094_v23 = vpop.permute.xlu1 %1128 }
 0x268   : > { %v5096_v36 = vpop.permute.xlu0 %1144 }
 0x26f   : > { %v5098_v24 = vpop.permute.xlu2 %1116  ;;  %v5100_v25 = vpop.permute.xlu1 %1130 }
 0x270   : > { %v5102_v26 = vpop.permute.xlu0 %1120  ;;  %1421 = vrot.lane.b32.xlu1 %v5100_v25, %s4555_s21 }
 0x277   : > { %v5106_v27 = vpop.permute.xlu2 %1108  ;;  %v5108_v29 = vpop.permute.xlu1 %1132 }
 0x278   : > { %v5110_v31 = vpop.permute.xlu0 %1114  ;;  %1326 = vrot.lane.b32.xlu2 %v5106_v27, %s4555_s21  ;;  %1334 = vrot.lane.b32.xlu1 %v5098_v24, %s4555_s21 }
 0x279   : > { %1332 = vrot.lane.b32.xlu0 %v5110_v31, %s4555_s21 }
 0x27f   : > { %v5118_v34 = vpop.permute.xlu2 %1124  ;;  %v5120_v28 = vpop.permute.xlu1 %1140 }
 0x280   : > { %v5122_v35 = vpop.permute.xlu0 %1146  ;;  %1423 = vrot.lane.b32.xlu1 %v5108_v29, %s4555_s21 }
 0x281   : > { %1510 = vrot.lane.b32.xlu0 %v5122_v35, %s4555_s21 }
 0x287   : > { %v5130_v39 = vpop.permute.xlu2 %1110  ;;  %v5132_v40 = vpop.permute.xlu1 %1118 }
 0x288   : > { %v5134_v41 = vpop.permute.xlu0 %1122  ;;  %1328 = vrot.lane.b32.xlu2 %v5130_v39, %s4555_s21  ;;  %1336 = vrot.lane.b32.xlu1 %v5132_v40, %s4555_s21 }
 0x28f   : > { %v5150_v44 = vpop.permute.xlu1 %1134  ;;  %v5170_v49 = vpop.permute.xlu2 %1136 }
 0x290   : > { %v5142_v43 = vpop.permute.xlu0 %1148  ;;  %1322 = vrot.lane.b32.xlu2 %v5086_v20, %s4555_s21  ;;  %1419 = vrot.lane.b32.xlu1 %v5094_v23, %s4555_s21 }
 0x291   : > { %1512 = vrot.lane.b32.xlu0 %v5142_v43, %s4555_s21 }
 0x297   : > { %v5172_v48 = vpop.permute.xlu1 %1126 }
 0x298   : > { %v5152_v45 = vpop.permute.xlu0 %1150  ;;  %1415 = vrot.lane.b32.xlu2 %v5118_v34, %s4555_s21  ;;  %1425 = vrot.lane.b32.xlu1 %v5150_v44, %s4555_s21 }
 0x299   : > { %1514 = vrot.lane.b32.xlu0 %v5152_v45, %s4555_s21 }
 0x2a0   : > { %1502 = vrot.lane.b32.xlu2 %v5092_v22, %s4555_s21  ;;  %1504 = vrot.lane.b32.xlu1 %v5120_v28, %s4555_s21  ;;  %v5174_v53 = vpop.permute.xlu0 %1142 }
 0x2a1   : > { %1508 = vrot.lane.b32.xlu0 %v5096_v36, %s4555_s21 }
 0x2a8   : > { %1500 = vrot.lane.b32.xlu2 %v5170_v49, %s4555_s21  ;;  %1417 = vrot.lane.b32.xlu1 %v5172_v48, %s4555_s21 }
 0x2a9   : > { %1506 = vrot.lane.b32.xlu0 %v5174_v53, %s4555_s21 }
 0x2aa   : > { %v1331_v63 = vpop.permute.xlu2 %1330 }
 0x2b0   : > { %1240 = vrot.lane.b32.xlu2 %v5018_v50, %s4555_s21  ;;  %1246 = vrot.lane.b32.xlu1 %v5054_v18, %s4555_s21 }
 0x2b1   : > { %1413 = vrot.lane.b32.xlu0 %v5134_v41, %s4555_s21 }
 0x2b8   : > { %1234 = vrot.lane.b32.xlu2 %v5036_v13, %s4555_s21  ;;  %1244 = vrot.lane.b32.xlu1 %v5038_v16, %s4555_s21 }
 0x2b9   : > { %1411 = vrot.lane.b32.xlu0 %v5102_v26, %s4555_s21 }
 0x2ba   : > { %v1325_v33 = vpop.permute.xlu2 %1324 }
 0x2c0   : > { %4026 = vrot.lane.b32.xlu2 %v4025_v57, %s4553_s12  ;;  %1238 = vrot.lane.b32.xlu1 %v5068_v19, %s4555_s21 }
 0x2c1   : > { %1242 = vrot.lane.b32.xlu0 %v5028_v2, %s4555_s21 }
 0x2c8   : > { %4056 = vrot.lane.b32.xlu2 %v4025_v57, %s4554_s11  ;;  %1232 = vrot.lane.b32.xlu1 %v5026_v3, %s4555_s21 }
 0x2c9   : > { %1236 = vrot.lane.b32.xlu0 %v5046_v17, %s4555_s21 }
 0x2d0   : > { %4066 = vrot.lane.b32.xlu2 %v4065_v59, %s4554_s11  ;;  %4021 = vrot.lane.b32.xlu1 %v4020_v61, %s4553_s12 }
 0x2d1   : > { %4031 = vrot.lane.b32.xlu0 %v4020_v61, %s4552_s5 }
 0x2d2   : > { %v1327_v4 = vpop.permute.xlu2 %1326 }
 0x2d8   : > { %4071 = vrot.lane.b32.xlu2 %v5223_v62, %s4552_s5  ;;  %4046 = vrot.lane.b32.xlu1 %v4025_v57, %s4552_s5 }
 0x2d9   : > { %4036 = vrot.lane.b32.xlu0 %v4065_v59, %s4553_s12 }
 0x2e0   : > { %4051 = vrot.lane.b32.xlu1 %v5223_v62, %s4553_s12 }
 0x2e1   : > { %4041 = vrot.lane.b32.xlu0 %v4020_v61, %s4554_s11 }
 0x2e2   : > { %v1422_v1 = vpop.permute.xlu1 %1421  ;;  %v1329_v51 = vpop.permute.xlu2 %1328 }
 0x2e9   : > { %4061 = vrot.lane.b32.xlu0 %v4065_v59, %s4552_s5 }
 0x2ea   : > { %v1335_v56 = vpop.permute.xlu1 %1334  ;;  %v1323_v9 = vpop.permute.xlu2 %1322 }
 0x2eb   : > { %v1333_v5 = vpop.permute.xlu0 %1332 }
 0x2f2   : > { %v1424_v52 = vpop.permute.xlu1 %1423  ;;  %v1416_v0 = vpop.permute.xlu2 %1415 }
 0x2f3   : > { %v1511_v7 = vpop.permute.xlu0 %1510 }
 0x2fa   : > { %v1337_v6 = vpop.permute.xlu1 %1336  ;;  %v1503_v15 = vpop.permute.xlu2 %1502 }
 0x2fb   : > { %3787 = vmatpush.xpose.msk.msra.mxu3 %vm1248_vm12, %v1337_v6 }
 0x2ff   : > { %3788 = vmatpush.xpose.msk.msra.mxu3 %vm1248_vm12, %v1335_v56 }
 0x302   : > { %v1420_v8 = vpop.permute.xlu1 %1419  ;;  %v1501_v61 = vpop.permute.xlu2 %1500 }
 0x303   : > { %v1513_v10 = vpop.permute.xlu0 %1512  ;;  %3789 = vmatpush.xpose.msk.msra.mxu3 %vm1248_vm12, %v1333_v5 }
 0x307   : > { %3790 = vmatpush.xpose.msk.msra.mxu3 %vm1248_vm12, %v1331_v63 }
 0x30a   : > { %v1426_v11 = vpop.permute.xlu1 %1425 }
 0x30b   : > { %v1515_v12 = vpop.permute.xlu0 %1514  ;;  %3791 = vmatpush.xpose.msk.msra.mxu3 %vm1248_vm12, %v1329_v51  ;;  %3803 = vmatpush.xpose.msk.msrb.mxu0 %vm1248_vm12, %v1426_v11 }
 0x30c   : > { %3819 = vmatpush.xpose.msk.msra.mxu1 %vm1248_vm12, %v1515_v12 }
 0x30f   : > { %3792 = vmatpush.xpose.msk.msra.mxu3 %vm1248_vm12, %v1327_v4  ;;  %3804 = vmatpush.xpose.msk.msrb.mxu0 %vm1248_vm12, %v1424_v52 }
 0x310   : > { %3820 = vmatpush.xpose.msk.msra.mxu1 %vm1248_vm12, %v1513_v10 }
 0x312   : > { %v1505_v60 = vpop.permute.xlu1 %1504 }
 0x313   : > { %v1509_v14 = vpop.permute.xlu0 %1508  ;;  %3793 = vmatpush.xpose.msk.msra.mxu3 %vm1248_vm12, %v1325_v33  ;;  %3805 = vmatpush.xpose.msk.msrb.mxu0 %vm1248_vm12, %v1422_v1  ;;  %v1241_v33 = vpop.permute.xlu2 %1240 }
 0x314   : > { %3821 = vmatpush.xpose.msk.msra.mxu1 %vm1248_vm12, %v1511_v7 }
 0x317   : > { %3794 = vmatpush.xpose.msk.msra.mxu3 %vm1248_vm12, %v1323_v9  ;;  %3806 = vmatpush.xpose.msk.msrb.mxu0 %vm1248_vm12, %v1420_v8 }
 0x318   : > { %3822 = vmatpush.xpose.msk.msra.mxu1 %vm1248_vm12, %v1509_v14 }
 0x31a   : > { %3795 = vmatmul.msk.f32.vlgmr.msra.gmra.mxu3 %vm1248_vm12, %v5086_v20  ;;  %v1418_v57 = vpop.permute.xlu1 %1417 }
 0x31b   : > { %v1507_v59 = vpop.permute.xlu0 %1506  ;;  %3807 = vmatpush.xpose.msk.msrb.mxu0 %vm1248_vm12, %v1418_v57 }
 0x31c   : > { %3823 = vmatpush.xpose.msk.msra.mxu1 %vm1248_vm12, %v1507_v59 }
 0x31f   : > { %3808 = vmatpush.xpose.msk.msrb.mxu0 %vm1248_vm12, %v1416_v0 }
 0x320   : > { %3824 = vmatpush.xpose.msk.msra.mxu1 %vm1248_vm12, %v1505_v60 }
 0x322   : > { %3796 = vmatmul.msk.f32.gmra.mxu3 %vm1248_vm12, %v5088_v21  ;;  %v1247_v63 = vpop.permute.xlu1 %1246 }
 0x323   : > { %v1414_v1 = vpop.permute.xlu0 %1413  ;;  %3771 = vmatpush.xpose.msk.msra.mxu2 %vm1248_vm12, %v1247_v63 }
 0x324   : > { %3809 = vmatpush.xpose.msk.msrb.mxu0 %vm1248_vm12, %v1414_v1  ;;  %3825 = vmatpush.xpose.msk.msra.mxu1 %vm1248_vm12, %v1503_v15 }
 0x328   : > { %3826 = vmatpush.xpose.msk.msra.mxu1 %vm1248_vm12, %v1501_v61 }
 0x32a   : > { %3797 = vmatmul.msk.f32.gmra.mxu3 %vm1248_vm12, %v5106_v27  ;;  %v1245_v20 = vpop.permute.xlu1 %1244  ;;  %v1235_v27 = vpop.permute.xlu2 %1234 }
 0x32b   : > { %v1412_v56 = vpop.permute.xlu0 %1411  ;;  %3827 = vmatmul.msk.f32.vlgmr.msra.gmra.mxu1 %vm1248_vm12, %v5170_v49  ;;  %3772 = vmatpush.xpose.msk.msra.mxu2 %vm1248_vm12, %v1245_v20 }
 0x32c   : > { %3810 = vmatpush.xpose.msk.msrb.mxu0 %vm1248_vm12, %v1412_v56 }
 0x32f   : > { %3811 = vmatmul.msk.f32.vlgmr.msrb.gmra.mxu0 %vm1248_vm12, %v5102_v26 }
 0x332   : > { %3798 = vmatmul.msk.f32.gmra.mxu3 %vm1248_vm12, %v5130_v39  ;;  %v1239_v21 = vpop.permute.xlu1 %1238  ;;  %v4027_v39 = vpop.permute.xlu2 %4026 }
 0x333   : > { %v1243_v4 = vpop.permute.xlu0 %1242  ;;  %3828 = vmatmul.msk.f32.gmra.mxu1 %vm1248_vm12, %v5092_v22  ;;  %v4029_v51 = vunpack.i.h.bf16 %v4027_v39 }
 0x334   : > { %3773 = vmatpush.xpose.msk.msra.mxu2 %vm1248_vm12, %v1243_v4 }
 0x337   : > { %3812 = vmatmul.msk.f32.gmra.mxu0 %vm1248_vm12, %v5134_v41 }
 0x338   : > { %3774 = vmatpush.xpose.msk.msra.mxu2 %vm1248_vm12, %v1241_v33 }
 0x33a   : > { %3799 = vmatmul.msk.f32.gmra.mxu3 %vm1248_vm12, %v5082_v37  ;;  %v1233_v26 = vpop.permute.xlu1 %1232 }
 0x33b   : > { %v1237_v49 = vpop.permute.xlu0 %1236  ;;  %3829 = vmatmul.msk.f32.gmra.mxu1 %vm1248_vm12, %v5120_v28 }
 0x33c   : > { %3775 = vmatpush.xpose.msk.msra.mxu2 %vm1248_vm12, %v1239_v21 }
 0x33f   : > { %3813 = vmatmul.msk.f32.gmra.mxu0 %vm1248_vm12, %v5118_v34  ;;  %v4028_v34 = vunpack.i.l.bf16 %v4027_v39 }
 0x340   : > { %3776 = vmatpush.xpose.msk.msra.mxu2 %vm1248_vm12, %v1237_v49 }
 0x342   : > { %3800 = vmatmul.msk.f32.gmra.mxu3 %vm1248_vm12, %v5110_v31  ;;  %v4022_v22 = vpop.permute.xlu1 %4021  ;;  %v4057_v31 = vpop.permute.xlu2 %4056 }
 0x343   : > { %v4032_v41 = vpop.permute.xlu0 %4031  ;;  %3830 = vmatmul.msk.f32.gmra.mxu1 %vm1248_vm12, %v5174_v53  ;;  %v4023_v37 = vunpack.i.l.bf16 %v4022_v22  ;;  %v4024_v28 = vunpack.i.h.bf16 %v4022_v22 }
 0x344   : > { %v4033_v5 = vunpack.i.l.bf16 %v4032_v41  ;;  %3777 = vmatpush.xpose.msk.msra.mxu2 %vm1248_vm12, %v1235_v27  ;;  %v4034_v52 = vunpack.i.h.bf16 %v4032_v41 }
 0x345   : > { %2454 = vmatpush.msrb.mxu3 %v4023_v37 }
 0x346   : > { %2519 = vmatpush.msra.mxu0 %v4033_v5 }
 0x347   : > { %3814 = vmatmul.msk.f32.gmra.mxu0 %vm1248_vm12, %v5172_v48  ;;  %2455 = vmatpush.msrb.mxu3 %v4024_v28 }
 0x348   : > { %3778 = vmatpush.xpose.msk.msra.mxu2 %vm1248_vm12, %v1233_v26  ;;  %2520 = vmatpush.msra.mxu0 %v4034_v52 }
 0x349   : > { %2456 = vmatpush.msrb.mxu3 %v4028_v34 }
 0x34a   : > { %3801 = vmatmul.msk.f32.gmra.mxu3 %vm1248_vm12, %v5098_v24  ;;  %v4047_v53 = vpop.permute.xlu1 %4046 }
 0x34b   : > { %v4037_v6 = vpop.permute.xlu0 %4036  ;;  %3779 = vmatmul.msk.f32.vlgmr.msra.gmra.mxu2 %vm1248_vm12, %v5026_v3  ;;  %3831 = vmatmul.msk.f32.gmra.mxu1 %vm1248_vm12, %v5096_v36  ;;  %v4048_v48 = vunpack.i.l.bf16 %v4047_v53  ;;  %v4049_v24 = vunpack.i.h.bf16 %v4047_v53  ;;  %v4067_v36 = vpop.permute.xlu2 %4066 }
 0x34c   : > { %2389 = vmatpush.msrb.mxu2 %v5212_v58  ;;  %2457 = vmatpush.msrb.mxu3 %v4029_v51  ;;  %v4038_v7 = vunpack.i.l.bf16 %v4037_v6  ;;  %v4039_v58 = vunpack.i.h.bf16 %v4037_v6  ;;  %v4069_v9 = vunpack.i.h.bf16 %v4067_v36 }
 0x34d   : > { %2521 = vmatpush.msra.mxu0 %v4048_v48 }
 0x34e   : > { %2390 = vmatpush.msrb.mxu2 %v5203_v54  ;;  %2458 = vmatpush.msrb.mxu3 %v4038_v7 }
 0x34f   : > { %3815 = vmatmul.msk.f32.gmra.mxu0 %vm1248_vm12, %v5094_v23 }
 0x350   : > { %2391 = vmatpush.msrb.mxu2 %v5190_v32  ;;  %2459 = vmatpush.msrb.mxu3 %v4039_v58 }
 0x351   : > { %2522 = vmatpush.msra.mxu0 %v4049_v24 }
 0x352   : > { %2392 = vmatpush.msrb.mxu2 %v5182_v55  ;;  %3802 = vmatmul.msk.f32.gmra.mxu3 %vm1248_vm12, %v5132_v40  ;;  %v4052_v3 = vpop.permute.xlu1 %4051  ;;  %v4058_v40 = vunpack.i.l.bf16 %v4057_v31 }
 0x353   : > { %v4042_v54 = vpop.permute.xlu0 %4041  ;;  %3780 = vmatmul.msk.f32.gmra.mxu2 %vm1248_vm12, %v5036_v13  ;;  %3832 = vmatmul.msk.f32.gmra.mxu1 %vm1248_vm12, %v5122_v35  ;;  %v4053_v32 = vunpack.i.l.bf16 %v4052_v3  ;;  %v4054_v55 = vunpack.i.h.bf16 %v4052_v3  ;;  %v4059_v13 = vunpack.i.h.bf16 %v4057_v31 }
 0x354   : > { %2393 = vmatpush.msrb.mxu2 %v5168_v47  ;;  %v4043_v23 = vunpack.i.l.bf16 %v4042_v54  ;;  %v4044_v8 = vunpack.i.h.bf16 %v4042_v54  ;;  %v4072_v47 = vpop.permute.xlu2 %4071 }
 0x355   : > { %2460 = vmatpush.msrb.mxu3 %v4053_v32  ;;  %v4074_v10 = vunpack.i.h.bf16 %v4072_v47 }
 0x356   : > { %2394 = vmatpush.msrb.mxu2 %v5158_v46  ;;  %2584 = vmatpush.msrb.mxu1 %v4043_v23  ;;  %v4068_v46 = vunpack.i.l.bf16 %v4067_v36 }
 0x357   : > { %3816 = vmatmul.msk.f32.gmra.mxu0 %vm1248_vm12, %v5100_v25  ;;  %2461 = vmatpush.msrb.mxu3 %v4054_v55 }
 0x358   : > { %2395 = vmatpush.msrb.mxu2 %v5140_v42  ;;  %2585 = vmatpush.msrb.mxu1 %v4044_v8 }
 0x35a   : > { %2396 = vmatpush.msrb.mxu2 %v5128_v38  ;;  %2586 = vmatpush.msrb.mxu1 %v4058_v40  ;;  %v4073_v38 = vunpack.i.l.bf16 %v4072_v47 }
 0x35b   : > { %v4062_v35 = vpop.permute.xlu0 %4061  ;;  %3781 = vmatmul.msk.f32.gmra.mxu2 %vm1248_vm12, %v5046_v17  ;;  %3833 = vmatmul.msk.f32.gmra.mxu1 %vm1248_vm12, %v5142_v43 }
 0x35c   : > { %v4063_v42 = vunpack.i.l.bf16 %v4062_v35  ;;  %2587 = vmatpush.msrb.mxu1 %v4059_v13  ;;  %v4064_v25 = vunpack.i.h.bf16 %v4062_v35 }
 0x35e   : > { %2523 = vmatpush.msra.mxu0 %v4063_v42  ;;  %2588 = vmatpush.msrb.mxu1 %v4068_v46 }
 0x35f   : > { %3817 = vmatmul.msk.f32.gmra.mxu0 %vm1248_vm12, %v5108_v29 }
 0x360   : > { %2524 = vmatpush.msra.mxu0 %v4064_v25  ;;  %2589 = vmatpush.msrb.mxu1 %v4069_v9 }
 0x362   : > { %2525 = vmatpush.msra.mxu0 %v4073_v38 }
 0x363   : > { %3782 = vmatmul.msk.f32.gmra.mxu2 %vm1248_vm12, %v5068_v19  ;;  %3834 = vmatmul.msk.f32.gmra.mxu1 %vm1248_vm12, %v5152_v45 }
 0x364   : > { %2526 = vmatpush.msra.mxu0 %v4074_v10 }
 0x367   : > { %3818 = vmatmul.msk.f32.gmra.mxu0 %vm1248_vm12, %v5150_v44 }
 0x36b   : > { %3783 = vmatmul.msk.f32.gmra.mxu2 %vm1248_vm12, %v5018_v50 }
 0x373   : > { %3784 = vmatmul.msk.f32.gmra.mxu2 %vm1248_vm12, %v5028_v2 }
 0x37b   : > { %3785 = vmatmul.msk.f32.gmra.mxu2 %vm1248_vm12, %v5038_v16 }
 0x383   : > { %3786 = vmatmul.msk.f32.gmra.mxu2 %vm1248_vm12, %v5054_v18 }
 0x39d   : > { %v5347_v2 = vpop.f32.mrf.mxu3 }
 0x39e   : > { %v1613_v4 = vsel %vm759_vm1, %v5347_v2, -inf }
 0x3a5   : > { %v5357_v11 = vpop.f32.mrf.mxu3 }
 0x3a6   : > { %v1616_v26 = vsel %vm759_vm1, %v5357_v11, -inf }
 0x3a8   : > { %v5341_v29 = vpop.f32.mrf.mxu1 }
 0x3a9   : > { %v1661_v1 = vsel %vm759_vm1, %v5341_v29, -inf }
 0x3ac   : > { %v5351_v44 = vpop.f32.mrf.mxu0 }
 0x3ad   : > { %v1637_v60 = vsel %vm759_vm1, %v5351_v44, -inf  ;;  %v5369_v57 = vpop.f32.mrf.mxu3 }
 0x3ae   : > { %v1619_v37 = vsel %vm759_vm1, %v5369_v57, -inf }
 0x3b0   : > { %v5349_v16 = vpop.f32.mrf.mxu1 }
 0x3b1   : > { %v1664_v22 = vsel %vm759_vm1, %v5349_v16, -inf }
 0x3b4   : > { %v5367_v15 = vpop.f32.mrf.mxu0 }
 0x3b5   : > { %v1640_v63 = vsel %vm759_vm1, %v5367_v15, -inf  ;;  %v5383_v56 = vpop.f32.mrf.mxu3 }
 0x3b6   : > { %v1622_v34 = vsel %vm759_vm1, %v5383_v56, -inf }
 0x3b8   : > { %v5359_v12 = vpop.f32.mrf.mxu1 }
 0x3b9   : > { %v1667_v52 = vsel %vm759_vm1, %v5359_v12, -inf }
 0x3bc   : > { %v5381_v33 = vpop.f32.mrf.mxu0 }
 0x3bd   : > { %v1643_v21 = vsel %vm759_vm1, %v5381_v33, -inf  ;;  %v5399_v41 = vpop.f32.mrf.mxu3 }
 0x3be   : > { %v1625_v54 = vsel %vm759_vm1, %v5399_v41, -inf }
 0x3c0   : > { %v5371_v59 = vpop.f32.mrf.mxu1 }
 0x3c1   : > { %v1670_v48 = vsel %vm759_vm1, %v5371_v59, -inf }
 0x3c4   : > { %v5393_v49 = vpop.f32.mrf.mxu0 }
 0x3c5   : > { %v1646_v39 = vsel %vm759_vm1, %v5393_v49, -inf  ;;  %v5411_v31 = vpop.f32.mrf.mxu3 }
 0x3c6   : > { %v1628_v55 = vsel %vm759_vm1, %v5411_v31, -inf }
 0x3c8   : > { %v5389_v27 = vpop.f32.mrf.mxu1 }
 0x3c9   : > { %v1673_v28 = vsel %vm759_vm1, %v5389_v27, -inf }
 0x3cc   : > { %v5413_v53 = vpop.f32.mrf.mxu0 }
 0x3cd   : > { %v1649_v7 = vsel %vm759_vm1, %v5413_v53, -inf  ;;  %v5423_v58 = vpop.f32.mrf.mxu3 }
 0x3ce   : > { %v5337_v17 = vpop.f32.mrf.mxu2  ;;  %v1631_v3 = vsel %vm759_vm1, %v5423_v58, -inf }
 0x3cf   : > { %v1589_v19 = vsel %vm759_vm1, %v5337_v17, -inf }
 0x3d0   : > { %1590 = vmax.xlane.f32.xlu2 %v1589_v19  ;;  %v5403_v5 = vpop.f32.mrf.mxu1 }
 0x3d1   : > { %v1676_v8 = vsel %vm759_vm1, %v5403_v5, -inf }
 0x3d4   : > { %v5425_v24 = vpop.f32.mrf.mxu0 }
 0x3d5   : > { %v1652_v36 = vsel %vm759_vm1, %v5425_v24, -inf  ;;  %v5449_v42 = vpop.f32.mrf.mxu3 }
 0x3d6   : > { %v5343_v43 = vpop.f32.mrf.mxu2  ;;  %v1634_v9 = vsel %vm759_vm1, %v5449_v42, -inf }
 0x3d7   : > { %v1592_v50 = vsel %vm759_vm1, %v5343_v43, -inf }
 0x3d8   : > { %1593 = vmax.xlane.f32.xlu1 %v1592_v50  ;;  %v5415_v51 = vpop.f32.mrf.mxu1 }
 0x3d9   : > { %v1679_v6 = vsel %vm759_vm1, %v5415_v51, -inf }
 0x3dc   : > { %v5441_v40 = vpop.f32.mrf.mxu0 }
 0x3dd   : > { %v1655_v46 = vsel %vm759_vm1, %v5441_v40, -inf }
 0x3de   : > { %v5353_v18 = vpop.f32.mrf.mxu2 }
 0x3df   : > { %v1595_v45 = vsel %vm759_vm1, %v5353_v18, -inf }
 0x3e0   : > { %1596 = vmax.xlane.f32.xlu2 %v1595_v45  ;;  %v5433_v32 = vpop.f32.mrf.mxu1 }
 0x3e1   : > { %v1682_v23 = vsel %vm759_vm1, %v5433_v32, -inf }
 0x3e4   : > { %v5451_v47 = vpop.f32.mrf.mxu0 }
 0x3e5   : > { %v1658_v25 = vsel %vm759_vm1, %v5451_v47, -inf }
 0x3e6   : > { %v5361_v0 = vpop.f32.mrf.mxu2 }
 0x3e7   : > { %v1598_v14 = vsel %vm759_vm1, %v5361_v0, -inf }
 0x3e8   : > { %1638 = vmax.xlane.f32.xlu2 %v1637_v60  ;;  %1599 = vmax.xlane.f32.xlu0 %v1598_v14 }
 0x3ee   : > { %v5373_v61 = vpop.f32.mrf.mxu2 }
 0x3ef   : > { %v1601_v20 = vsel %vm759_vm1, %v5373_v61, -inf }
 0x3f0   : > { %1641 = vmax.xlane.f32.xlu2 %v1640_v63  ;;  %1662 = vmax.xlane.f32.xlu0 %v1661_v1 }
 0x3f1   : > { %1602 = vmax.xlane.f32.xlu1 %v1601_v20 }
 0x3f6   : > { %v5443_v13 = vpop.f32.mrf.mxu2 }
 0x3f7   : > { %v1604_v35 = vsel %vm759_vm1, %v5443_v13, -inf }
 0x3f8   : > { %1644 = vmax.xlane.f32.xlu2 %v1643_v21  ;;  %1614 = vmax.xlane.f32.xlu0 %v1613_v4 }
 0x3f9   : > { %1617 = vmax.xlane.f32.xlu1 %v1616_v26 }
 0x400   : > { %1647 = vmax.xlane.f32.xlu2 %v1646_v39  ;;  %1665 = vmax.xlane.f32.xlu0 %v1664_v22 }
 0x401   : > { %1620 = vmax.xlane.f32.xlu1 %v1619_v37 }
 0x408   : > { %1674 = vmax.xlane.f32.xlu2 %v1673_v28  ;;  %1668 = vmax.xlane.f32.xlu0 %v1667_v52 }
 0x409   : > { %1623 = vmax.xlane.f32.xlu1 %v1622_v34 }
 0x410   : > { %1680 = vmax.xlane.f32.xlu2 %v1679_v6  ;;  %1671 = vmax.xlane.f32.xlu0 %v1670_v48 }
 0x411   : > { %1650 = vmax.xlane.f32.xlu1 %v1649_v7 }
 0x418   : > { %1632 = vmax.xlane.f32.xlu2 %v1631_v3  ;;  %1653 = vmax.xlane.f32.xlu0 %v1652_v36 }
 0x419   : > { %1626 = vmax.xlane.f32.xlu1 %v1625_v54 }
 0x420   : > { %1683 = vmax.xlane.f32.xlu2 %v1682_v23  ;;  %1629 = vmax.xlane.f32.xlu0 %v1628_v55 }
 0x421   : > { %1677 = vmax.xlane.f32.xlu1 %v1676_v8 }
 0x428   : > { %1605 = vmax.xlane.f32.xlu0 %v1604_v35 }
 0x429   : > { %1656 = vmax.xlane.f32.xlu1 %v1655_v46 }
 0x430   : > { %1635 = vmax.xlane.f32.xlu0 %v1634_v9 }
 0x431   : > { %1659 = vmax.xlane.f32.xlu1 %v1658_v25 }
 0x443   : > { %v5459_v38 = vpop.xlane.xlu2 %1590 }
 0x44a   : > { %4076 = vrot.lane.b32.xlu1 %v5223_v62, %s4554_s11 }
 0x44b   : > { %v5465_v45 = vpop.xlane.xlu1 %1593 }
 0x453   : > { %v5461_v10 = vpop.xlane.xlu2 %1596 }
 0x45b   : > { %v1639_v19 = vpop.xlane.xlu2 %1638  ;;  %v5463_v50 = vpop.xlane.xlu0 %1599 }
 0x45c   : > { %v1701_v60 = vsub.f32 %v5351_v44, %v1639_v19 }
 0x45e   : > { %v1749_v14 = vmul.f32 1.442695, %v1701_v60 }
 0x460   : > { %4105 = vpow2.f32 %v1749_v14 }
 0x463   : > { %v1642_v63 = vpop.xlane.xlu2 %1641  ;;  %v1663_v1 = vpop.xlane.xlu0 %1662 }
 0x464   : > { %v1709_v20 = vsub.f32 %v5341_v29, %v1663_v1  ;;  %v5469_v21 = vpop.xlane.xlu1 %1602  ;;  %v1702_v29 = vsub.f32 %v5367_v15, %v1642_v63 }
 0x466   : > { %v5471_v62 = vpop.eup %4105  ;;  %v1765_v4 = vmul.f32 1.442695, %v1709_v20  ;;  %v1751_v6 = vmul.f32 1.442695, %v1702_v29 }
 0x467   : > { %v1829_v26 = vsel %vm759_vm1, %v5471_v62, 0.0 }
 0x468   : > { %1830 = vadd.xlane.f32.xlu0 %v1829_v26  ;;  %4107 = vpow2.f32 %v1765_v4 }
 0x46b   : > { %v1645_v39 = vpop.xlane.xlu2 %1644  ;;  %v1615_v22 = vpop.xlane.xlu0 %1614 }
 0x46c   : > { %v1693_v44 = vsub.f32 %v5347_v2, %v1615_v22  ;;  %v1618_v37 = vpop.xlane.xlu1 %1617  ;;  %v1703_v2 = vsub.f32 %v5381_v33, %v1645_v39 }
 0x46d   : > { %v1694_v55 = vsub.f32 %v5357_v11, %v1618_v37 }
 0x46e   : > { %v1733_v28 = vmul.f32 1.442695, %v1693_v44  ;;  %v5476_v52 = vpop.eup %4107  ;;  %v1753_v8 = vmul.f32 1.442695, %v1703_v2 }
 0x46f   : > { %v1853_v34 = vsel %vm759_vm1, %v5476_v52, 0.0  ;;  %v1735_v46 = vmul.f32 1.442695, %v1694_v55 }
 0x470   : > { %4109 = vpow2.f32 %v1733_v28  ;;  %1854 = vadd.xlane.f32.xlu0 %v1853_v34 }
 0x471   : > { %4111 = vpow2.f32 %v1751_v6 }
 0x473   : > { %v1666_v48 = vpop.xlane.xlu0 %1665  ;;  %v1648_v36 = vpop.xlane.xlu2 %1647 }
 0x474   : > { %v1710_v7 = vsub.f32 %v5349_v16, %v1666_v48  ;;  %v1621_v3 = vpop.xlane.xlu1 %1620  ;;  %v1704_v33 = vsub.f32 %v5393_v49, %v1648_v36 }
 0x475   : > { %v1695_v14 = vsub.f32 %v5369_v57, %v1621_v3  ;;  %v1687_v3 = vsub.f32 %v5353_v18, %v5461_v10  ;;  %v5525_v18 = vpop.f32.mrf.mxu2 }
 0x476   : > { %v1767_v54 = vmul.f32 1.442695, %v1710_v7  ;;  %v5482_v23 = vpop.eup %4109 }
 0x477   : > { %v1805_v15 = vsel %vm759_vm1, %v5482_v23, 0.0  ;;  %v5489_v25 = vpop.eup %4111  ;;  %v1737_v20 = vmul.f32 1.442695, %v1695_v14 }
 0x478   : > { %4113 = vpow2.f32 %v1767_v54  ;;  %1806 = vadd.xlane.f32.xlu0 %v1805_v15  ;;  %v1832_v1 = vsel %vm759_vm1, %v5489_v25, 0.0 }
 0x479   : > { %4115 = vpow2.f32 %v1753_v8  ;;  %v1721_v8 = vmul.f32 1.442695, %v1687_v3 }
 0x47a   : > { %4117 = vpow2.f32 %v1735_v46 }
 0x47b   : > { %v1669_v35 = vpop.xlane.xlu0 %1668  ;;  %v1675_v11 = vpop.xlane.xlu2 %1674 }
 0x47c   : > { %v1711_v16 = vsub.f32 %v5359_v12, %v1669_v35  ;;  %v1624_v9 = vpop.xlane.xlu1 %1623  ;;  %v1755_v12 = vmul.f32 1.442695, %v1704_v33  ;;  %v1713_v10 = vsub.f32 %v5389_v27, %v1675_v11 }
 0x47d   : > { %v1696_v57 = vsub.f32 %v5383_v56, %v1624_v9 }
 0x47e   : > { %v1769_v19 = vmul.f32 1.442695, %v1711_v16  ;;  %v5491_v60 = vpop.eup %4113  ;;  %v1773_v27 = vmul.f32 1.442695, %v1713_v10 }
 0x47f   : > { %v1856_v63 = vsel %vm759_vm1, %v5491_v60, 0.0  ;;  %v5499_v26 = vpop.eup %4115  ;;  %v1739_v29 = vmul.f32 1.442695, %v1696_v57 }
 0x480   : > { %4119 = vpow2.f32 %v1769_v19  ;;  %1857 = vadd.xlane.f32.xlu2 %v1856_v63  ;;  %1833 = vadd.xlane.f32.xlu0 %v1832_v1  ;;  %v5501_v39 = vpop.eup %4117  ;;  %v1835_v44 = vsel %vm759_vm1, %v5499_v26, 0.0  ;;  %v1607_v19 = vsel %vm759_vm1, %v5525_v18, -inf }
 0x481   : > { %4121 = vpow2.f32 %v1755_v12  ;;  %v1808_v28 = vsel %vm759_vm1, %v5501_v39, 0.0  ;;  %v1686_v12 = vsub.f32 %v5343_v43, %v5465_v45 }
 0x482   : > { %4123 = vpow2.f32 %v1737_v20 }
 0x483   : > { %v1681_v37 = vpop.xlane.xlu2 %1680  ;;  %v1672_v48 = vpop.xlane.xlu0 %1671  ;;  %4125 = vpow2.f32 %v1739_v29 }
 0x484   : > { %v1651_v4 = vpop.xlane.xlu1 %1650  ;;  %v1712_v2 = vsub.f32 %v5371_v59, %v1672_v48  ;;  %v1685_v59 = vsub.f32 %v5337_v17, %v5459_v38  ;;  %v1715_v9 = vsub.f32 %v5415_v51, %v1681_v37 }
 0x485   : > { %v1705_v36 = vsub.f32 %v5413_v53, %v1651_v4 }
 0x486   : > { %v5503_v49 = vpop.eup %4119  ;;  %v1771_v46 = vmul.f32 1.442695, %v1712_v2  ;;  %v1717_v17 = vmul.f32 1.442695, %v1685_v59  ;;  %v1777_v11 = vmul.f32 1.442695, %v1715_v9 }
 0x487   : > { %v1859_v22 = vsel %vm759_vm1, %v5503_v49, 0.0  ;;  %v5512_v6 = vpop.eup %4121 }
 0x488   : > { %1860 = vadd.xlane.f32.xlu1 %v1859_v22  ;;  %1836 = vadd.xlane.f32.xlu0 %v1835_v44  ;;  %v5515_v7 = vpop.eup %4123  ;;  %v1838_v55 = vsel %vm759_vm1, %v5512_v6, 0.0 }
 0x489   : > { %1809 = vadd.xlane.f32.xlu2 %v1808_v28  ;;  %v1811_v15 = vsel %vm759_vm1, %v5515_v7, 0.0  ;;  %v5527_v53 = vpop.eup %4125  ;;  %v1719_v28 = vmul.f32 1.442695, %v1686_v12 }
 0x48a   : > { %v1814_v33 = vsel %vm759_vm1, %v5527_v53, 0.0 }
 0x48b   : > { %v1633_v35 = vpop.xlane.xlu2 %1632  ;;  %v1654_v20 = vpop.xlane.xlu0 %1653 }
 0x48c   : > { %v1627_v34 = vpop.xlane.xlu1 %1626  ;;  %v1706_v48 = vsub.f32 %v5425_v24, %v1654_v20 }
 0x48d   : > { %v1697_v56 = vsub.f32 %v5399_v41, %v1627_v34  ;;  %v1757_v41 = vmul.f32 1.442695, %v1705_v36  ;;  %v1699_v34 = vsub.f32 %v5423_v58, %v1633_v35 }
 0x48f   : > { %v1741_v54 = vmul.f32 1.442695, %v1697_v56 }
 0x490   : > { %1839 = vadd.xlane.f32.xlu0 %v1838_v55  ;;  %v1745_v55 = vmul.f32 1.442695, %v1699_v34 }
 0x491   : > { %4127 = vpow2.f32 %v1741_v54  ;;  %1812 = vadd.xlane.f32.xlu2 %v1811_v15  ;;  %v1759_v15 = vmul.f32 1.442695, %v1706_v48 }
 0x492   : > { %4129 = vpow2.f32 %v1721_v8  ;;  %v5574_v8 = vpop.f32.mrf.mxu2 }
 0x493   : > { %4131 = vpow2.f32 %v1757_v41  ;;  %v1684_v51 = vpop.xlane.xlu2 %1683  ;;  %v1630_v3 = vpop.xlane.xlu0 %1629  ;;  %v1610_v59 = vsel %vm759_vm1, %v5574_v8, -inf }
 0x494   : > { %4133 = vpow2.f32 %v1771_v46  ;;  %v1716_v4 = vsub.f32 %v5433_v32, %v1684_v51  ;;  %v1678_v57 = vpop.xlane.xlu1 %1677  ;;  %v1698_v35 = vsub.f32 %v5411_v31, %v1630_v3  ;;  %v1688_v31 = vsub.f32 %v5361_v0, %v5463_v50 }
 0x495   : > { %4135 = vpow2.f32 %v1717_v17 }
 0x496   : > { %4137 = vpow2.f32 %v1773_v27  ;;  %v1779_v45 = vmul.f32 1.442695, %v1716_v4  ;;  %v1714_v27 = vsub.f32 %v5403_v5, %v1678_v57  ;;  %v1723_v12 = vmul.f32 1.442695, %v1688_v31 }
 0x497   : > { %v5532_v16 = vpop.eup %4127  ;;  %4139 = vpow2.f32 %v1777_v11  ;;  %v1689_v5 = vsub.f32 %v5373_v61, %v5469_v21 }
 0x498   : > { %1608 = vmax.xlane.f32.xlu0 %v1607_v19  ;;  %v1817_v14 = vsel %vm759_vm1, %v5532_v16, 0.0  ;;  %v5541_v38 = vpop.eup %4129  ;;  %4141 = vpow2.f32 %v1719_v28  ;;  %v1775_v20 = vmul.f32 1.442695, %v1714_v27 }
 0x499   : > { %1815 = vadd.xlane.f32.xlu2 %v1814_v33  ;;  %1818 = vadd.xlane.f32.xlu1 %v1817_v14  ;;  %v5543_v63 = vpop.eup %4131  ;;  %v1787_v37 = vsel %vm759_vm1, %v5541_v38, 0.0  ;;  %4143 = vpow2.f32 %v1779_v45  ;;  %v1743_v33 = vmul.f32 1.442695, %v1698_v35  ;;  %v1725_v34 = vmul.f32 1.442695, %v1689_v5 }
 0x49a   : > { %v5545_v1 = vpop.eup %4133  ;;  %v1841_v22 = vsel %vm759_vm1, %v5543_v63, 0.0  ;;  %4145 = vpow2.f32 %v1745_v55 }
 0x49b   : > { %v1862_v44 = vsel %vm759_vm1, %v5545_v1, 0.0  ;;  %v5556_v43 = vpop.eup %4135  ;;  %4147 = vpow2.f32 %v1759_v15  ;;  %v1606_v9 = vpop.xlane.xlu0 %1605 }
 0x49c   : > { %v5558_v29 = vpop.eup %4137  ;;  %v1781_v36 = vsel %vm759_vm1, %v5556_v43, 0.0  ;;  %v1657_v2 = vpop.xlane.xlu1 %1656  ;;  %v1690_v55 = vsub.f32 %v5443_v13, %v1606_v9 }
 0x49d   : > { %v5560_v32 = vpop.eup %4139  ;;  %v1865_v56 = vsel %vm759_vm1, %v5558_v29, 0.0  ;;  %v1707_v41 = vsub.f32 %v5441_v40, %v1657_v2 }
 0x49e   : > { %v1871_v54 = vsel %vm759_vm1, %v5560_v32, 0.0  ;;  %v5570_v58 = vpop.eup %4141 }
 0x49f   : > { %v5572_v24 = vpop.eup %4143  ;;  %v1784_v46 = vsel %vm759_vm1, %v5570_v58, 0.0  ;;  %v1761_v19 = vmul.f32 1.442695, %v1707_v41  ;;  %v1727_v41 = vmul.f32 1.442695, %v1690_v55 }
 0x4a0   : > { %1842 = vadd.xlane.f32.xlu0 %v1841_v22  ;;  %v1874_v10 = vsel %vm759_vm1, %v5572_v24, 0.0  ;;  %v5584_v40 = vpop.eup %4145 }
 0x4a1   : > { %1863 = vadd.xlane.f32.xlu2 %v1862_v44  ;;  %1788 = vadd.xlane.f32.xlu1 %v1787_v37  ;;  %v5586_v17 = vpop.eup %4147  ;;  %4149 = vpow2.f32 %v1761_v19  ;;  %v1823_v11 = vsel %vm759_vm1, %v5584_v40, 0.0 }
 0x4a2   : > { %4151 = vpow2.f32 %v1743_v33  ;;  %v1844_v51 = vsel %vm759_vm1, %v5586_v17, 0.0 }
 0x4a3   : > { %v1636_v44 = vpop.xlane.xlu0 %1635  ;;  %4153 = vpow2.f32 %v1723_v12 }
 0x4a4   : > { %v1660_v14 = vpop.xlane.xlu1 %1659  ;;  %4155 = vpow2.f32 %v1775_v20  ;;  %v1700_v57 = vsub.f32 %v5449_v42, %v1636_v44 }
 0x4a5   : > { %4157 = vpow2.f32 %v1725_v34  ;;  %v1708_v61 = vsub.f32 %v5451_v47, %v1660_v14 }
 0x4a6   : > { %v1747_v48 = vmul.f32 1.442695, %v1700_v57 }
 0x4a7   : > { %v5595_v22 = vpop.eup %4149 }
 0x4a8   : > { %1866 = vadd.xlane.f32.xlu0 %v1865_v56  ;;  %v5597_v0 = vpop.eup %4151  ;;  %v1847_v28 = vsel %vm759_vm1, %v5595_v22, 0.0  ;;  %4159 = vpow2.f32 %v1747_v48 }
 0x4a9   : > { %1782 = vadd.xlane.f32.xlu2 %v1781_v36  ;;  %1872 = vadd.xlane.f32.xlu1 %v1871_v54  ;;  %v1820_v45 = vsel %vm759_vm1, %v5597_v0, 0.0  ;;  %v5606_v56 = vpop.eup %4153  ;;  %v1763_v36 = vmul.f32 1.442695, %v1708_v61 }
 0x4aa   : > { %v5608_v3 = vpop.eup %4155  ;;  %v1790_v42 = vsel %vm759_vm1, %v5606_v56, 0.0 }
 0x4ab   : > { %v1868_v21 = vsel %vm759_vm1, %v5608_v3, 0.0  ;;  %v5615_v54 = vpop.eup %4157  ;;  %4161 = vpow2.f32 %v1763_v36 }
 0x4ac   : > { %v1793_v15 = vsel %vm759_vm1, %v5615_v54, 0.0  ;;  %4163 = vpow2.f32 %v1727_v41 }
 0x4ae   : > { %v5617_v2 = vpop.eup %4159 }
 0x4af   : > { %v1826_v47 = vsel %vm759_vm1, %v5617_v2, 0.0 }
 0x4b0   : > { %1785 = vadd.xlane.f32.xlu0 %v1784_v46 }
 0x4b1   : > { %1611 = vmax.xlane.f32.xlu2 %v1610_v59  ;;  %1875 = vadd.xlane.f32.xlu1 %v1874_v10  ;;  %v5624_v35 = vpop.eup %4161 }
 0x4b2   : > { %v1850_v46 = vsel %vm759_vm1, %v5624_v35, 0.0  ;;  %v5628_v13 = vpop.eup %4163 }
 0x4b3   : > { %v1796_v10 = vsel %vm759_vm1, %v5628_v13, 0.0 }
 0x4b8   : > { %1824 = vadd.xlane.f32.xlu0 %v1823_v11 }
 0x4b9   : > { %1845 = vadd.xlane.f32.xlu2 %v1844_v51 }
 0x4bc   : > { %v4077_v4 = vpop.permute.xlu1 %4076 }
 0x4bd   : > { %v4078_v37 = vunpack.i.l.bf16 %v4077_v4  ;;  %v4079_v50 = vunpack.i.h.bf16 %v4077_v4 }
 0x4bf   : > { %2590 = vmatpush.msrb.mxu1 %v4078_v37 }
 0x4c0   : > { %1848 = vadd.xlane.f32.xlu0 %v1847_v28 }
 0x4c1   : > { %2591 = vmatpush.msrb.mxu1 %v4079_v50  ;;  %1821 = vadd.xlane.f32.xlu2 %v1820_v45 }
 0x4c8   : > { %1791 = vadd.xlane.f32.xlu0 %v1790_v42 }
 0x4c9   : > { %1869 = vadd.xlane.f32.xlu2 %v1868_v21 }
 0x4d0   : > { %1794 = vadd.xlane.f32.xlu0 %v1793_v15 }
 0x4d1   : > { %1827 = vadd.xlane.f32.xlu2 %v1826_v47 }
 0x4d9   : > { %1851 = vadd.xlane.f32.xlu2 %v1850_v46 }
 0x4db   : > { %v1831_v59 = vpop.xlane.xlu0 %1830 }
 0x4dc   : > { %4165 = vrcp.f32 %v1831_v59  ;;  %v2128_v31 = vand.u32 2147483648, %v1831_v59  ;;  %v2126_v11 = vand.u32 2147483647, %v1831_v59  ;;  %vm2122_vm14 = vweird.f32 %v1831_v59 }
 0x4de   : > { %v2129_v12 = vor.u32 1.1754944e-38, %v2128_v31  ;;  %vm2127_vm0 = vcmp.eq.f32.partialorder %v2126_v11, 8.507059e+37 }
 0x4e1   : > { %1797 = vadd.xlane.f32.xlu2 %v1796_v10 }
 0x4e2   : > { %v4166_v9 = vpop.eup %4165 }
 0x4e3   : > { %v2118_v19 = vmul.f32 %v4166_v9, %v1831_v59  ;;  %v1855_v33 = vpop.xlane.xlu0 %1854  ;;  %vm2123_vm13 = vweird.f32 %v4166_v9 }
 0x4e4   : > { %4167 = vrcp.f32 %v1855_v33  ;;  %vm2124_vm15 = vmor %vm2122_vm14, %vm2123_vm13  ;;  %v2248_v28 = vand.u32 2147483648, %v1855_v33  ;;  %v2246_v34 = vand.u32 2147483647, %v1855_v33  ;;  %vm2242_vm3 = vweird.f32 %v1855_v33 }
 0x4e5   : > { %v2119_v14 = vsub.f32 1.0, %v2118_v19 }
 0x4e6   : > { %v2249_v42 = vor.u32 1.1754944e-38, %v2248_v28  ;;  %vm2247_vm5 = vcmp.eq.f32.partialorder %v2246_v34, 8.507059e+37 }
 0x4e7   : > { %v2120_v27 = vmul.f32 %v4166_v9, %v2119_v14 }
 0x4e9   : > { %v2121_v51 = vadd.f32 %v4166_v9, %v2120_v27 }
 0x4ea   : > { %v4168_v20 = vpop.eup %4167 }
 0x4eb   : > { %v2125_v4 = vsel %vm2124_vm15, %v4166_v9, %v2121_v51  ;;  %v2238_v37 = vmul.f32 %v4168_v20, %v1855_v33  ;;  %v1807_v5 = vpop.xlane.xlu0 %1806  ;;  %vm2243_vm2 = vweird.f32 %v4168_v20 }
 0x4ec   : > { %v2130_v44 = vsel %vm2127_vm0, %v2129_v12, %v2125_v4  ;;  %4169 = vrcp.f32 %v1807_v5  ;;  %vm2244_vm4 = vmor %vm2242_vm3, %vm2243_vm2  ;;  %v2006_v10 = vand.u32 2147483647, %v1807_v5  ;;  %v2008_v9 = vand.u32 2147483648, %v1807_v5 }
 0x4ed   : > { %v2239_v50 = vsub.f32 1.0, %v2238_v37  ;;  %v2131_v57 = vmul.f32 %v5471_v62, %v2130_v44  ;;  %vm2002_vm7 = vweird.f32 %v1807_v5 }
 0x4ee   : > { %vm2007_vm9 = vcmp.eq.f32.partialorder %v2006_v10, 8.507059e+37 }
 0x4ef   : > { %v2240_v45 = vmul.f32 %v4168_v20, %v2239_v50  ;;  %3851 = vmatmul.msk.f32.vlgmr.msra.gmra.mxu0 %vm759_vm1, %v2131_v57 }
 0x4f1   : > { %v2241_v48 = vadd.f32 %v4168_v20, %v2240_v45 }
 0x4f2   : > { %v4170_v61 = vpop.eup %4169 }
 0x4f3   : > { %v2245_v21 = vsel %vm2244_vm4, %v4168_v20, %v2241_v48  ;;  %v1998_v36 = vmul.f32 %v4170_v61, %v1807_v5  ;;  %v1858_v55 = vpop.xlane.xlu2 %1857  ;;  %v5634_v15 = vpop.xlane.xlu0 %1833  ;;  %vm2003_vm6 = vweird.f32 %v4170_v61  ;;  %v2009_v20 = vor.u32 1.1754944e-38, %v2008_v9 }
 0x4f4   : > { %v2250_v47 = vsel %vm2247_vm5, %v2249_v42, %v2245_v21  ;;  %4171 = vrcp.f32 %v1858_v55  ;;  %vm5639_vm8 = vmor %vm2002_vm7, %vm2003_vm6  ;;  %v2263_v44 = vand.u32 2147483648, %v1858_v55  ;;  %v2143_v5 = vand.u32 2147483648, %v5634_v15 }
 0x4f5   : > { %v1999_v62 = vsub.f32 1.0, %v1998_v36  ;;  %4173 = vrcp.f32 %v5634_v15  ;;  %v2251_v41 = vmul.f32 %v5476_v52, %v2250_v47  ;;  %v2141_v28 = vand.u32 2147483647, %v5634_v15 }
 0x4f6   : > { %v2261_v45 = vand.u32 2147483647, %v1858_v55  ;;  %vm2257_vm11 = vweird.f32 %v1858_v55  ;;  %vm2137_vm13 = vweird.f32 %v5634_v15  ;;  %v2264_v21 = vor.u32 1.1754944e-38, %v2263_v44 }
 0x4f7   : > { %v2000_v46 = vmul.f32 %v4170_v61, %v1999_v62  ;;  %3859 = vmatmul.msk.f32.vlgmr.msrb.gmra.mxu1 %vm759_vm1, %v2251_v41  ;;  %v2144_v36 = vor.u32 1.1754944e-38, %v2143_v5  ;;  %vm5669_vm0 = vcmp.eq.f32.partialorder %v2141_v28, 8.507059e+37 }
 0x4f8   : > { %vm5678_vm3 = vcmp.eq.f32.partialorder %v2261_v45, 8.507059e+37 }
 0x4f9   : > { %v2001_v59 = vadd.f32 %v4170_v61, %v2000_v46 }
 0x4fa   : > { %v4172_v19 = vpop.eup %4171 }
 0x4fb   : > { %v4174_v33 = vpop.eup %4173  ;;  %v2253_v31 = vmul.f32 %v4172_v19, %v1858_v55  ;;  %v5643_v27 = vpop.xlane.xlu0 %1836  ;;  %v2005_v12 = vsel %vm5639_vm8, %v4170_v61, %v2001_v59  ;;  %vm2258_vm10 = vweird.f32 %v4172_v19 }
 0x4fc   : > { %v5645_v11 = vpop.xlane.xlu1 %1860  ;;  %v2133_v52 = vmul.f32 %v4174_v33, %v5634_v15  ;;  %4175 = vrcp.f32 %v5643_v27  ;;  %v5649_v51 = vpop.xlane.xlu2 %1809  ;;  %v2010_v57 = vsel %vm2007_vm9, %v2009_v20, %v2005_v12  ;;  %vm2138_vm14 = vweird.f32 %v4174_v33  ;;  %vm5674_vm2 = vmor %vm2257_vm11, %vm2258_vm10 }
 0x4fd   : > { %v2254_v4 = vsub.f32 1.0, %v2253_v31  ;;  %4177 = vrcp.f32 %v5649_v51  ;;  %v2011_v48 = vmul.f32 %v5482_v23, %v2010_v57  ;;  %vm2152_vm15 = vweird.f32 %v5643_v27  ;;  %vm2139_vm4 = vmor %vm2137_vm13, %vm2138_vm14 }
 0x4fe   : > { %v2134_v37 = vsub.f32 1.0, %v2133_v52  ;;  %4179 = vrcp.f32 %v5645_v11  ;;  %v2158_v9 = vand.u32 2147483648, %v5643_v27  ;;  %v2023_v20 = vand.u32 2147483648, %v5649_v51 }
 0x4ff   : > { %v2255_v50 = vmul.f32 %v4172_v19, %v2254_v4  ;;  %3843 = vmatmul.msk.f32.vlgmr.msrb.gmra.mxu3 %vm759_vm1, %v2011_v48  ;;  %v2156_v5 = vand.u32 2147483647, %v5643_v27  ;;  %vm2017_vm6 = vweird.f32 %v5649_v51  ;;  %vm2272_vm14 = vweird.f32 %v5645_v11 }
 0x500   : > { %v2135_v34 = vmul.f32 %v4174_v33, %v2134_v37 }
 0x501   : > { %v2256_v61 = vadd.f32 %v4172_v19, %v2255_v50  ;;  %vm2157_vm10 = vcmp.eq.f32.partialorder %v2156_v5, 8.507059e+37 }
 0x502   : > { %v5659_v42 = vpop.eup %4175  ;;  %v2136_v47 = vadd.f32 %v4174_v33, %v2135_v34  ;;  %v2159_v34 = vor.u32 1.1754944e-38, %v2158_v9 }
 0x503   : > { %v5662_v62 = vpop.eup %4177  ;;  %v2148_v41 = vmul.f32 %v5659_v42, %v5643_v27  ;;  %v5667_v23 = vpop.xlane.xlu0 %1839  ;;  %v2260_v52 = vsel %vm5674_vm2, %v4172_v19, %v2256_v61  ;;  %vm2153_vm5 = vweird.f32 %v5659_v42 }
 0x504   : > { %v5682_v10 = vpop.eup %4179  ;;  %v2013_v14 = vmul.f32 %v5662_v62, %v5649_v51  ;;  %4181 = vrcp.f32 %v5667_v23  ;;  %v5688_v31 = vpop.xlane.xlu2 %1812  ;;  %v2140_v37 = vsel %vm2139_vm4, %v4174_v33, %v2136_v47  ;;  %v2265_v28 = vsel %vm5678_vm3, %v2264_v21, %v2260_v52  ;;  %vm5724_vm8 = vmor %vm2152_vm15, %vm2153_vm5 }
 0x505   : > { %v2149_v12 = vsub.f32 1.0, %v2148_v41  ;;  %v2268_v4 = vmul.f32 %v5682_v10, %v5645_v11  ;;  %4183 = vrcp.f32 %v5688_v31  ;;  %v2145_v57 = vsel %vm5669_vm0, %v2144_v36, %v2140_v37 }
 0x506   : > { %v2014_v44 = vsub.f32 1.0, %v2013_v14  ;;  %v2146_v15 = vmul.f32 %v5489_v25, %v2145_v57  ;;  %v2266_v33 = vmul.f32 %v5491_v60, %v2265_v28  ;;  %vm2018_vm7 = vweird.f32 %v5662_v62 }
 0x507   : > { %v2150_v19 = vmul.f32 %v5659_v42, %v2149_v12  ;;  %v2269_v50 = vsub.f32 1.0, %v2268_v4  ;;  %v2024_v36 = vor.u32 1.1754944e-38, %v2023_v20  ;;  %v2278_v21 = vand.u32 2147483648, %v5645_v11  ;;  %vm5734_vm9 = vmor %vm2017_vm6, %vm2018_vm7 }
 0x508   : > { %v2015_v45 = vmul.f32 %v5662_v62, %v2014_v44  ;;  %3852 = vmatmul.msk.f32.gmra.mxu0 %vm759_vm1, %v2146_v15  ;;  %3860 = vmatmul.msk.f32.gmra.mxu1 %vm759_vm1, %v2266_v33  ;;  %v2021_v60 = vand.u32 2147483647, %v5649_v51  ;;  %v2276_v14 = vand.u32 2147483647, %v5645_v11  ;;  %vm2273_vm11 = vweird.f32 %v5682_v10 }
 0x509   : > { %v2270_v48 = vmul.f32 %v5682_v10, %v2269_v50  ;;  %v2151_v61 = vadd.f32 %v5659_v42, %v2150_v19  ;;  %vm2274_vm15 = vmor %vm2272_vm14, %vm2273_vm11  ;;  %v2173_v33 = vand.u32 2147483648, %v5667_v23  ;;  %v2038_v11 = vand.u32 2147483648, %v5688_v31 }
 0x50a   : > { %v5713_v47 = vpop.eup %4181  ;;  %v2016_v25 = vadd.f32 %v5662_v62, %v2015_v45  ;;  %vm2022_vm13 = vcmp.eq.f32.partialorder %v2021_v60, 8.507059e+37  ;;  %vm2277_vm0 = vcmp.eq.f32.partialorder %v2276_v14, 8.507059e+37  ;;  %vm2032_vm4 = vweird.f32 %v5688_v31 }
 0x50b   : > { %v5728_v55 = vpop.eup %4183  ;;  %v2163_v46 = vmul.f32 %v5713_v47, %v5667_v23  ;;  %v1609_v59 = vpop.xlane.xlu0 %1608  ;;  %v2155_v27 = vsel %vm5724_vm8, %v5659_v42, %v2151_v61  ;;  %v2271_v37 = vadd.f32 %v5682_v10, %v2270_v48  ;;  %v2036_v48 = vand.u32 2147483647, %v5688_v31 }
 0x50c   : > { %v2028_v52 = vmul.f32 %v5728_v55, %v5688_v31  ;;  %v1691_v12 = vsub.f32 %v5525_v18, %v1609_v59  ;;  %v5745_v20 = vpop.xlane.xlu2 %1815  ;;  %v5747_v4 = vpop.xlane.xlu1 %1818  ;;  %v2020_v51 = vsel %vm5734_vm9, %v5662_v62, %v2016_v25  ;;  %v2160_v42 = vsel %vm2157_vm10, %v2159_v34, %v2155_v27 }
 0x50d   : > { %v2164_v44 = vsub.f32 1.0, %v2163_v46  ;;  %4185 = vrcp.f32 %v5745_v20  ;;  %v2279_v18 = vor.u32 1.1754944e-38, %v2278_v21  ;;  %v2025_v57 = vsel %vm2022_vm13, %v2024_v36, %v2020_v51 }
 0x50e   : > { %v2029_v5 = vsub.f32 1.0, %v2028_v52  ;;  %v1729_v19 = vmul.f32 1.442695, %v1691_v12  ;;  %4187 = vrcp.f32 %v5747_v4  ;;  %v2026_v28 = vmul.f32 %v5501_v39, %v2025_v57 }
 0x50f   : > { %v2165_v50 = vmul.f32 %v5713_v47, %v2164_v44  ;;  %v2161_v45 = vmul.f32 %v5499_v26, %v2160_v42  ;;  %v2275_v15 = vsel %vm2274_vm15, %v5682_v10, %v2271_v37  ;;  %vm2033_vm2 = vweird.f32 %v5728_v55 }
 0x510   : > { %v2030_v62 = vmul.f32 %v5728_v55, %v2029_v5  ;;  %4189 = vpow2.f32 %v1729_v19  ;;  %3844 = vmatmul.msk.f32.gmra.mxu3 %vm759_vm1, %v2026_v28  ;;  %v2280_v34 = vsel %vm2277_vm0, %v2279_v18, %v2275_v15  ;;  %v2171_v36 = vand.u32 2147483647, %v5667_v23  ;;  %vm2034_vm6 = vmor %vm2032_vm4, %vm2033_vm2 }
 0x511   : > { %3853 = vmatmul.msk.f32.gmra.mxu0 %vm759_vm1, %v2161_v45  ;;  %v2281_v26 = vmul.f32 %v5503_v49, %v2280_v34  ;;  %v2166_v49 = vadd.f32 %v5713_v47, %v2165_v50  ;;  %vm2168_vm3 = vweird.f32 %v5713_v47  ;;  %vm2167_vm5 = vweird.f32 %v5667_v23 }
 0x512   : > { %v2031_v10 = vadd.f32 %v5728_v55, %v2030_v62  ;;  %v2174_v59 = vor.u32 1.1754944e-38, %v2173_v33  ;;  %v2039_v9 = vor.u32 1.1754944e-38, %v2038_v11  ;;  %vm2037_vm7 = vcmp.eq.f32.partialorder %v2036_v48, 8.507059e+37  ;;  %vm2169_vm8 = vmor %vm2167_vm5, %vm2168_vm3 }
 0x513   : > { %v5769_v39 = vpop.eup %4185  ;;  %v5772_v61 = vpop.xlane.xlu0 %1842  ;;  %3861 = vmatmul.msk.f32.gmra.mxu1 %vm759_vm1, %v2281_v26  ;;  %v2170_v12 = vsel %vm2169_vm8, %v5713_v47, %v2166_v49  ;;  %vm2172_vm9 = vcmp.eq.f32.partialorder %v2171_v36, 8.507059e+37  ;;  %v2068_v18 = vand.u32 2147483648, %v5747_v4  ;;  %v2051_v62 = vand.u32 2147483647, %v5745_v20 }
 0x514   : > { %v5777_v21 = vpop.eup %4187  ;;  %v2043_v25 = vmul.f32 %v5769_v39, %v5745_v20  ;;  %v5781_v60 = vpop.xlane.xlu2 %1863  ;;  %4191 = vrcp.f32 %v5772_v61  ;;  %v2035_v52 = vsel %vm2034_vm6, %v5728_v55, %v2031_v10  ;;  %v2175_v44 = vsel %vm2172_vm9, %v2174_v59, %v2170_v12 }
 0x515   : > { %v5784_v41 = vpop.xlane.xlu1 %1788  ;;  %v2058_v14 = vmul.f32 %v5777_v21, %v5747_v4  ;;  %4193 = vrcp.f32 %v5781_v60  ;;  %v2040_v31 = vsel %vm2037_vm7, %v2039_v9, %v2035_v52  ;;  %v2176_v5 = vmul.f32 %v5512_v6, %v2175_v44 }
 0x516   : > { %v5790_v46 = vpop.eup %4189  ;;  %v2044_v27 = vsub.f32 1.0, %v2043_v25  ;;  %v2041_v51 = vmul.f32 %v5515_v7, %v2040_v31  ;;  %4195 = vrcp.f32 %v5784_v41  ;;  %v2053_v7 = vand.u32 2147483648, %v5745_v20 }
 0x517   : > { %v1799_v23 = vsel %vm759_vm1, %v5790_v46, 0.0  ;;  %v2059_v55 = vsub.f32 1.0, %v2058_v14  ;;  %v2293_v28 = vand.u32 2147483648, %v5781_v60  ;;  %v2188_v45 = vand.u32 2147483648, %v5772_v61 }
 0x518   : > { %1800 = vadd.xlane.f32.xlu1 %v1799_v23  ;;  %v2045_v37 = vmul.f32 %v5769_v39, %v2044_v27  ;;  %3845 = vmatmul.msk.f32.gmra.mxu3 %vm759_vm1, %v2041_v51  ;;  %vm2048_vm10 = vweird.f32 %v5769_v39  ;;  %vm2047_vm11 = vweird.f32 %v5745_v20  ;;  %v2054_v34 = vor.u32 1.1754944e-38, %v2053_v7 }
 0x519   : > { %3854 = vmatmul.msk.f32.gmra.mxu0 %vm759_vm1, %v2176_v5  ;;  %v2060_v33 = vmul.f32 %v5777_v21, %v2059_v55  ;;  %vm2062_vm13 = vweird.f32 %v5747_v4  ;;  %v2069_v48 = vor.u32 1.1754944e-38, %v2068_v18  ;;  %vm2182_vm14 = vweird.f32 %v5772_v61  ;;  %vm5839_vm15 = vmor %vm2047_vm11, %vm2048_vm10 }
 0x51a   : > { %v5803_v42 = vpop.eup %4191  ;;  %v2046_v15 = vadd.f32 %v5769_v39, %v2045_v37  ;;  %v1918_v36 = vand.u32 2147483648, %v5784_v41  ;;  %v2066_v25 = vand.u32 2147483647, %v5747_v4  ;;  %v5846_v59 = vor.u32 1.1754944e-38, %v2293_v28 }
 0x51b   : > { %v2178_v19 = vmul.f32 %v5803_v42, %v5772_v61  ;;  %v5811_v47 = vpop.xlane.xlu0 %1866  ;;  %v5819_v6 = vpop.eup %4193  ;;  %v5848_v9 = vor.u32 1.1754944e-38, %v2188_v45  ;;  %vm2052_vm0 = vcmp.eq.f32.partialorder %v2051_v62, 8.507059e+37  ;;  %v2061_v23 = vadd.f32 %v5777_v21, %v2060_v33 }
 0x51c   : > { %v5816_v50 = vpop.xlane.xlu2 %1782  ;;  %4197 = vrcp.f32 %v5811_v47  ;;  %v2283_v26 = vmul.f32 %v5819_v6, %v5781_v60  ;;  %v5834_v10 = vpop.eup %4195  ;;  %v2050_v27 = vsel %vm5839_vm15, %v5769_v39, %v2046_v15  ;;  %vm2063_vm2 = vweird.f32 %v5777_v21 }
 0x51d   : > { %4199 = vrcp.f32 %v5816_v50  ;;  %v5822_v57 = vpop.xlane.xlu1 %1872  ;;  %v2179_v11 = vsub.f32 1.0, %v2178_v19  ;;  %vm2287_vm3 = vweird.f32 %v5781_v60  ;;  %v2055_v44 = vsel %vm2052_vm0, %v2054_v34, %v2050_v27  ;;  %vm5875_vm4 = vmor %vm2062_vm13, %vm2063_vm2 }
 0x51e   : > { %4201 = vrcp.f32 %v5822_v57  ;;  %v2284_v51 = vsub.f32 1.0, %v2283_v26  ;;  %v1908_v5 = vmul.f32 %v5834_v10, %v5784_v41  ;;  %v5868_v55 = vor.u32 1.1754944e-38, %v1918_v36 }
 0x51f   : > { %v2180_v52 = vmul.f32 %v5803_v42, %v2179_v11  ;;  %v2056_v19 = vmul.f32 %v5527_v53, %v2055_v44  ;;  %v2306_v28 = vand.u32 2147483647, %v5811_v47  ;;  %vm5879_vm5 = vcmp.eq.f32.partialorder %v2066_v25, 8.507059e+37 }
 0x520   : > { %vm1882_vm6 = vweird.f32 %v5816_v50  ;;  %v2065_v4 = vsel %vm5875_vm4, %v5777_v21, %v2061_v23  ;;  %vm2183_vm7 = vweird.f32 %v5803_v42  ;;  %v2285_v34 = vmul.f32 %v5819_v6, %v2284_v51 }
 0x521   : > { %3846 = vmatmul.msk.f32.gmra.mxu3 %vm759_vm1, %v2056_v19  ;;  %v2181_v11 = vadd.f32 %v5803_v42, %v2180_v52  ;;  %v1886_v36 = vand.u32 2147483647, %v5816_v50  ;;  %v1888_v20 = vand.u32 2147483648, %v5816_v50  ;;  %vm2302_vm8 = vweird.f32 %v5811_v47  ;;  %vm5913_vm10 = vmor %vm2182_vm14, %vm2183_vm7 }
 0x522   : > { %v5844_v49 = vpop.eup %4197  ;;  %v1909_v25 = vsub.f32 1.0, %v1908_v5  ;;  %v2308_v27 = vand.u32 2147483648, %v5811_v47  ;;  %v2070_v23 = vsel %vm5879_vm5, %v2069_v48, %v2065_v4  ;;  %vm5918_vm13 = vcmp.eq.f32.partialorder %v2306_v28, 8.507059e+37 }
 0x523   : > { %v5853_v14 = vpop.eup %4199  ;;  %v2298_v31 = vmul.f32 %v5844_v49, %v5811_v47  ;;  %v5858_v12 = vpop.xlane.xlu0 %1785  ;;  %vm2303_vm9 = vweird.f32 %v5844_v49  ;;  %v2185_v48 = vsel %vm5913_vm10, %v5803_v42, %v2181_v11  ;;  %vm2288_vm14 = vweird.f32 %v5819_v6 }
 0x524   : > { %v1878_v39 = vmul.f32 %v5853_v14, %v5816_v50  ;;  %v1612_v37 = vpop.xlane.xlu2 %1611  ;;  %4203 = vrcp.f32 %v5858_v12  ;;  %v5883_v33 = vpop.eup %4201  ;;  %vm1883_vm11 = vweird.f32 %v5853_v14  ;;  %v2071_v45 = vmul.f32 %v5532_v16, %v2070_v23  ;;  %vm5939_vm0 = vmor %vm2287_vm3, %vm2288_vm14 }
 0x525   : > { %v1692_v7 = vsub.f32 %v5574_v8, %v1612_v37  ;;  %v2299_v62 = vsub.f32 1.0, %v2298_v31  ;;  %v5887_v8 = vpop.xlane.xlu1 %1875  ;;  %v2328_v31 = vmul.f32 %v5883_v33, %v5822_v57  ;;  %v2186_v37 = vand.u32 2147483647, %v5772_v61  ;;  %vm1884_vm4 = vmor %vm1882_vm6, %vm1883_vm11 }
 0x526   : > { %v1879_v18 = vsub.f32 1.0, %v1878_v39  ;;  %vm5951_vm2 = vcmp.eq.f32.partialorder %v1886_v36, 8.507059e+37  ;;  %vm5971_vm5 = vmor %vm2302_vm8, %vm2303_vm9  ;;  %vm1912_vm6 = vweird.f32 %v5784_v41  ;;  %vm1897_vm7 = vweird.f32 %v5858_v12 }
 0x527   : > { %v1731_v53 = vmul.f32 1.442695, %v1692_v7  ;;  %v2300_v52 = vmul.f32 %v5844_v49, %v2299_v62  ;;  %v2286_v7 = vadd.f32 %v5819_v6, %v2285_v34  ;;  %vm2187_vm15 = vcmp.eq.f32.partialorder %v2186_v37, 8.507059e+37 }
 0x528   : > { %v1880_v26 = vmul.f32 %v5853_v14, %v1879_v18  ;;  %v2291_v18 = vand.u32 2147483647, %v5781_v60  ;;  %v2329_v15 = vsub.f32 1.0, %v2328_v31  ;;  %v1889_v60 = vor.u32 1.1754944e-38, %v1888_v20 }
 0x529   : > { %4205 = vpow2.f32 %v1731_v53  ;;  %v2301_v42 = vadd.f32 %v5844_v49, %v2300_v52  ;;  %v2190_v53 = vsel %vm2187_vm15, %v5848_v9, %v2185_v48  ;;  %v2290_v4 = vsel %vm5939_vm0, %v5819_v6, %v2286_v7  ;;  %3847 = vmatmul.msk.f32.gmra.mxu3 %vm759_vm1, %v2071_v45 }
 0x52a   : > { %v5901_v21 = vpop.eup %4203  ;;  %4207 = vrcp.f32 %v5887_v8  ;;  %v1881_v19 = vadd.f32 %v5853_v14, %v1880_v26  ;;  %v2191_v34 = vmul.f32 %v5543_v63, %v2190_v53  ;;  %vm2292_vm3 = vcmp.eq.f32.partialorder %v2291_v18, 8.507059e+37 }
 0x52b   : > { %v1893_v44 = vmul.f32 %v5901_v21, %v5858_v12  ;;  %v5928_v5 = vpop.xlane.xlu0 %1824  ;;  %v1910_v9 = vmul.f32 %v5834_v10, %v1909_v25  ;;  %v2295_v36 = vsel %vm2292_vm3, %v5846_v59, %v2290_v4  ;;  %v2309_v20 = vor.u32 1.1754944e-38, %v2308_v27 }
 0x52c   : > { %v5934_v62 = vpop.xlane.xlu2 %1845  ;;  %v1903_v25 = vand.u32 2147483648, %v5858_v12  ;;  %3855 = vmatmul.msk.f32.gmra.mxu0 %vm759_vm1, %v2191_v34  ;;  %v2296_v50 = vmul.f32 %v5545_v1, %v2295_v36  ;;  %v1885_v52 = vsel %vm1884_vm4, %v5853_v14, %v1881_v19  ;;  %v2330_v59 = vmul.f32 %v5883_v33, %v2329_v15 }
 0x52d   : > { %v1894_v28 = vsub.f32 1.0, %v1893_v44  ;;  %4209 = vrcp.f32 %v5934_v62  ;;  %v1890_v31 = vsel %vm5951_vm2, %v1889_v60, %v1885_v52  ;;  %v2305_v47 = vsel %vm5971_vm5, %v5844_v49, %v2301_v42 }
 0x52e   : > { %4211 = vrcp.f32 %v5928_v5  ;;  %v2336_v1 = vand.u32 2147483647, %v5822_v57  ;;  %v2338_v14 = vand.u32 2147483648, %v5822_v57  ;;  %3862 = vmatmul.msk.f32.gmra.mxu1 %vm759_vm1, %v2296_v50  ;;  %v1891_v44 = vmul.f32 %v5556_v43, %v1890_v31 }
 0x52f   : > { %v5949_v11 = vpop.eup %4205  ;;  %v1895_v6 = vmul.f32 %v5901_v21, %v1894_v28  ;;  %v2310_v37 = vsel %vm5918_vm13, %v2309_v20, %v2305_v47  ;;  %v1904_v18 = vor.u32 1.1754944e-38, %v1903_v25  ;;  %v2203_v43 = vand.u32 2147483648, %v5934_v62 }
 0x530   : > { %v5957_v26 = vpop.eup %4207  ;;  %v1802_v27 = vsel %vm759_vm1, %v5949_v11, 0.0  ;;  %3835 = vmatmul.msk.f32.vlgmr.msrb.gmra.mxu2 %vm759_vm1, %v1891_v44  ;;  %v6015_v39 = vadd.f32 %v5883_v33, %v2330_v59  ;;  %vm1898_vm8 = vweird.f32 %v5901_v21  ;;  %v1901_v61 = vand.u32 2147483647, %v5858_v12 }
 0x531   : > { %v5994_v51 = vmul.f32 %v5957_v26, %v5887_v8  ;;  %1803 = vadd.xlane.f32.xlu0 %v1802_v27  ;;  %v1896_v7 = vadd.f32 %v5901_v21, %v1895_v6  ;;  %vm2197_vm9 = vweird.f32 %v5934_v62  ;;  %v2311_v53 = vmul.f32 %v5558_v29, %v2310_v37  ;;  %vm1899_vm10 = vmor %vm1897_vm7, %vm1898_vm8 }
 0x532   : > { %v2098_v16 = vand.u32 2147483648, %v5928_v5  ;;  %vm1902_vm11 = vcmp.eq.f32.partialorder %v1901_v61, 8.507059e+37  ;;  %v2204_v34 = vor.u32 1.1754944e-38, %v2203_v43  ;;  %v1911_v12 = vadd.f32 %v5834_v10, %v1910_v9 }
 0x533   : > { %v5987_v23 = vpop.eup %4209  ;;  %v5998_v49 = vpop.xlane.xlu0 %1848  ;;  %v2344_v42 = vsub.f32 1.0, %v5994_v51  ;;  %v1900_v60 = vsel %vm1899_vm10, %v5901_v21, %v1896_v7  ;;  %vm1913_vm13 = vweird.f32 %v5834_v10  ;;  %v1916_v9 = vand.u32 2147483647, %v5784_v41 }
 0x534   : > { %v2193_v48 = vmul.f32 %v5987_v23, %v5934_v62  ;;  %v6004_v19 = vpop.xlane.xlu2 %1821  ;;  %4213 = vrcp.f32 %v5998_v49  ;;  %v6012_v28 = vpop.eup %4211  ;;  %v1905_v6 = vsel %vm1902_vm11, %v1904_v18, %v1900_v60  ;;  %v2218_v29 = vand.u32 2147483648, %v5998_v49  ;;  %vm6055_vm15 = vmor %vm1912_vm6, %vm1913_vm13 }
 0x535   : > { %4215 = vrcp.f32 %v6004_v19  ;;  %v2088_v15 = vmul.f32 %v6012_v28, %v5928_v5  ;;  %v2083_v20 = vand.u32 2147483648, %v6004_v19  ;;  %v1906_v25 = vmul.f32 %v5570_v58, %v1905_v6 }
 0x536   : > { %v2194_v45 = vsub.f32 1.0, %v2193_v48  ;;  %3863 = vmatmul.msk.f32.gmra.mxu1 %vm759_vm1, %v2311_v53  ;;  %vm2198_vm14 = vweird.f32 %v5987_v23  ;;  %v6044_v31 = vor.u32 1.1754944e-38, %v2098_v16  ;;  %v2201_v44 = vand.u32 2147483647, %v5934_v62 }
 0x537   : > { %v2089_v63 = vsub.f32 1.0, %v2088_v15  ;;  %vm2077_vm0 = vweird.f32 %v6004_v19  ;;  %v1915_v37 = vsel %vm6055_vm15, %v5834_v10, %v1911_v12  ;;  %v2084_v18 = vor.u32 1.1754944e-38, %v2083_v20  ;;  %vm2199_vm3 = vmor %vm2197_vm9, %vm2198_vm14 }
 0x538   : > { %v2195_v4 = vmul.f32 %v5987_v23, %v2194_v45  ;;  %3836 = vmatmul.msk.f32.gmra.mxu2 %vm759_vm1, %v1906_v25  ;;  %vm2212_vm2 = vweird.f32 %v5998_v49  ;;  %v2219_v41 = vor.u32 1.1754944e-38, %v2218_v29  ;;  %vm1917_vm4 = vcmp.eq.f32.partialorder %v1916_v9, 8.507059e+37 }
 0x539   : > { %v2090_v43 = vmul.f32 %v6012_v28, %v2089_v63  ;;  %v1920_v10 = vsel %vm1917_vm4, %v5868_v55, %v1915_v37  ;;  %vm2202_vm5 = vcmp.eq.f32.partialorder %v2201_v44, 8.507059e+37  ;;  %v2081_v53 = vand.u32 2147483647, %v6004_v19 }
 0x53a   : > { %v6029_v36 = vpop.eup %4213  ;;  %v2196_v59 = vadd.f32 %v5987_v23, %v2195_v4  ;;  %vm2092_vm6 = vweird.f32 %v5928_v5  ;;  %v2216_v55 = vand.u32 2147483647, %v5998_v49  ;;  %v1921_v20 = vmul.f32 %v5541_v38, %v1920_v10 }
 0x53b   : > { %v6034_v50 = vpop.eup %4215  ;;  %v2208_v21 = vmul.f32 %v6029_v36, %v5998_v49  ;;  %v6039_v52 = vpop.xlane.xlu0 %1791  ;;  %vm2213_vm8 = vweird.f32 %v6029_v36  ;;  %vm2333_vm11 = vweird.f32 %v5883_v33  ;;  %vm2082_vm14 = vcmp.eq.f32.partialorder %v2081_v53, 8.507059e+37 }
 0x53c   : > { %v2073_v58 = vmul.f32 %v6034_v50, %v6004_v19  ;;  %v6048_v47 = vpop.xlane.xlu2 %1869  ;;  %4217 = vrcp.f32 %v6039_v52  ;;  %v2200_v61 = vsel %vm2199_vm3, %v5987_v23, %v2196_v59  ;;  %vm1927_vm7 = vweird.f32 %v6039_v52  ;;  %vm6095_vm10 = vmor %vm2212_vm2, %vm2213_vm8 }
 0x53d   : > { %v2209_v48 = vsub.f32 1.0, %v2208_v21  ;;  %4219 = vrcp.f32 %v6048_v47  ;;  %v2205_v62 = vsel %vm2202_vm5, %v2204_v34, %v2200_v61  ;;  %vm2078_vm9 = vweird.f32 %v6034_v50 }
 0x53e   : > { %v2074_v7 = vsub.f32 1.0, %v2073_v58  ;;  %v2206_v60 = vmul.f32 %v5586_v17, %v2205_v62  ;;  %v2321_v12 = vand.u32 2147483647, %v6048_v47  ;;  %v1933_v34 = vand.u32 2147483648, %v6039_v52  ;;  %vm2079_vm13 = vmor %vm2077_vm0, %vm2078_vm9 }
 0x53f   : > { %v2210_v45 = vmul.f32 %v6029_v36, %v2209_v48  ;;  %v2323_v21 = vand.u32 2147483648, %v6048_v47  ;;  %v1931_v59 = vand.u32 2147483647, %v6039_v52  ;;  %vm2217_vm15 = vcmp.eq.f32.partialorder %v2216_v55, 8.507059e+37 }
 0x540   : > { %v2075_v15 = vmul.f32 %v6034_v50, %v2074_v7  ;;  %3856 = vmatmul.msk.f32.gmra.mxu0 %vm759_vm1, %v2206_v60  ;;  %3837 = vmatmul.msk.f32.gmra.mxu2 %vm759_vm1, %v1921_v20  ;;  %vm2332_vm3 = vweird.f32 %v5822_v57  ;;  %v2091_v37 = vadd.f32 %v6012_v28, %v2090_v43  ;;  %vm2317_vm0 = vweird.f32 %v6048_v47 }
 0x541   : > { %v2211_v4 = vadd.f32 %v6029_v36, %v2210_v45  ;;  %vm2093_vm8 = vweird.f32 %v6012_v28  ;;  %vm6134_vm9 = vcmp.eq.f32.partialorder %v2321_v12, 8.507059e+37 }
 0x542   : > { %v4218_v16 = vpop.eup %4217  ;;  %v2076_v23 = vadd.f32 %v6034_v50, %v2075_v15 }
 0x543   : > { %v6085_v6 = vpop.eup %4219  ;;  %v1923_v63 = vmul.f32 %v4218_v16, %v6039_v52  ;;  %v6091_v29 = vpop.xlane.xlu0 %1794  ;;  %v2215_v38 = vsel %vm6095_vm10, %v6029_v36, %v2211_v4  ;;  %vm1928_vm2 = vweird.f32 %v4218_v16  ;;  %vm6147_vm10 = vcmp.eq.f32.partialorder %v2336_v1, 8.507059e+37 }
 0x544   : > { %v2313_v25 = vmul.f32 %v6085_v6, %v6048_v47  ;;  %v6103_v9 = vpop.xlane.xlu2 %1827  ;;  %4221 = vrcp.f32 %v6091_v29  ;;  %v2080_v27 = vsel %vm2079_vm13, %v6034_v50, %v2076_v23  ;;  %v2220_v48 = vsel %vm2217_vm15, %v2219_v41, %v2215_v38  ;;  %vm6127_vm5 = vmor %vm1927_vm7, %vm1928_vm2 }
 0x545   : > { %v1924_v49 = vsub.f32 1.0, %v1923_v63  ;;  %4223 = vrcp.f32 %v6103_v9  ;;  %v2085_v44 = vsel %vm2082_vm14, %v2084_v18, %v2080_v27  ;;  %vm2318_vm4 = vweird.f32 %v6085_v6  ;;  %vm6141_vm7 = vmor %vm2092_vm6, %vm2093_vm8 }
 0x546   : > { %v2314_v58 = vsub.f32 1.0, %v2313_v25  ;;  %v2086_v19 = vmul.f32 %v5597_v0, %v2085_v44  ;;  %v2221_v45 = vmul.f32 %v5595_v22, %v2220_v48  ;;  %v2096_v18 = vand.u32 2147483647, %v5928_v5  ;;  %vm6153_vm13 = vmor %vm2317_vm0, %vm2318_vm4 }
 0x547   : > { %v1925_v36 = vmul.f32 %v4218_v16, %v1924_v49  ;;  %v2324_v22 = vor.u32 1.1754944e-38, %v2323_v21  ;;  %v1934_v47 = vor.u32 1.1754944e-38, %v1933_v34  ;;  %vm1932_vm6 = vcmp.eq.f32.partialorder %v1931_v59, 8.507059e+37  ;;  %vm6183_vm2 = vmor %vm2332_vm3, %vm2333_vm11 }
 0x548   : > { %v2315_v7 = vmul.f32 %v6085_v6, %v2314_v58  ;;  %3848 = vmatmul.msk.f32.gmra.mxu3 %vm759_vm1, %v2086_v19  ;;  %v2095_v4 = vsel %vm6141_vm7, %v6012_v28, %v2091_v37  ;;  %3857 = vmatmul.msk.f32.gmra.mxu0 %vm759_vm1, %v2221_v45  ;;  %vm2097_vm14 = vcmp.eq.f32.partialorder %v2096_v18, 8.507059e+37  ;;  %v2113_v12 = vand.u32 2147483648, %v6103_v9 }
 0x549   : > { %v1926_v50 = vadd.f32 %v4218_v16, %v1925_v36  ;;  %v2100_v63 = vsel %vm2097_vm14, %v6044_v31, %v2095_v4  ;;  %v1948_v34 = vand.u32 2147483648, %v6091_v29  ;;  %vm1942_vm0 = vweird.f32 %v6091_v29 }
 0x54a   : > { %v4222_v41 = vpop.eup %4221  ;;  %v2316_v43 = vadd.f32 %v6085_v6, %v2315_v7  ;;  %v2111_v59 = vand.u32 2147483647, %v6103_v9  ;;  %v2335_v51 = vsel %vm6183_vm2, %v5883_v33, %v6015_v39  ;;  %vm2107_vm11 = vweird.f32 %v6103_v9 }
 0x54b   : > { %v4224_v15 = vpop.eup %4223  ;;  %v1938_v62 = vmul.f32 %v4222_v41, %v6091_v29  ;;  %v1930_v5 = vsel %vm6127_vm5, %v4218_v16, %v1926_v50  ;;  %vm1943_vm15 = vweird.f32 %v4222_v41  ;;  %v1949_v58 = vor.u32 1.1754944e-38, %v1948_v34 }
 0x54c   : > { %v2103_v1 = vmul.f32 %v4224_v15, %v6103_v9  ;;  %v6165_v60 = vpop.xlane.xlu2 %1851  ;;  %v1935_v23 = vsel %vm1932_vm6, %v1934_v47, %v1930_v5  ;;  %v2320_v55 = vsel %vm6153_vm13, %v6085_v6, %v2316_v43  ;;  %v1946_v6 = vand.u32 2147483647, %v6091_v29  ;;  %vm1944_vm3 = vmor %vm1942_vm0, %vm1943_vm15 }
 0x54d   : > { %v1939_v16 = vsub.f32 1.0, %v1938_v62  ;;  %4225 = vrcp.f32 %v6165_v60  ;;  %v1936_v20 = vmul.f32 %v5606_v56, %v1935_v23  ;;  %v2325_v17 = vsel %vm6134_vm9, %v2324_v22, %v2320_v55 }
 0x54e   : > { %v2104_v28 = vsub.f32 1.0, %v2103_v1  ;;  %v2326_v21 = vmul.f32 %v5608_v3, %v2325_v17  ;;  %v2345_v56 = vmul.f32 %v5957_v26, %v2344_v42  ;;  %v2101_v3 = vmul.f32 %v5584_v40, %v2100_v63 }
 0x54f   : > { %v1940_v25 = vmul.f32 %v4222_v41, %v1939_v16  ;;  %3838 = vmatmul.msk.f32.gmra.mxu2 %vm759_vm1, %v1936_v20  ;;  %vm2108_vm4 = vweird.f32 %v4224_v15  ;;  %v2339_v42 = vor.u32 1.1754944e-38, %v2338_v14  ;;  %vm2348_vm5 = vweird.f32 %v5957_v26 }
 0x550   : > { %v2105_v38 = vmul.f32 %v4224_v15, %v2104_v28  ;;  %3864 = vmatmul.msk.f32.gmra.mxu1 %vm759_vm1, %v2326_v21  ;;  %3849 = vmatmul.msk.f32.gmra.mxu3 %vm759_vm1, %v2101_v3  ;;  %v2114_v27 = vor.u32 1.1754944e-38, %v2113_v12  ;;  %vm1947_vm8 = vcmp.eq.f32.partialorder %v1946_v6, 8.507059e+37  ;;  %vm2109_vm9 = vmor %vm2107_vm11, %vm2108_vm4  ;;  %v2346_v44 = vadd.f32 %v5957_v26, %v2345_v56 }
 0x551   : > { %v1941_v49 = vadd.f32 %v4222_v41, %v1940_v25  ;;  %v2340_v9 = vsel %vm6147_vm10, %v2339_v42, %v2335_v51  ;;  %vm2112_vm7 = vcmp.eq.f32.partialorder %v2111_v59, 8.507059e+37  ;;  %vm2347_vm13 = vweird.f32 %v5887_v8  ;;  %v988_v25 = vld [vmem:[%s4796_s2 + $0x38] sm:$0xff]  ;;  %v987_v51 = vld [vmem:[%s4796_s2 + $0x30] sm:$0xff] }
 0x552   : > { %v2106_v40 = vadd.f32 %v4224_v15, %v2105_v38  ;;  %v2353_v37 = vand.u32 2147483648, %v5887_v8  ;;  %v2351_v45 = vand.u32 2147483647, %v5887_v8  ;;  %v2233_v50 = vand.u32 2147483648, %v6165_v60  ;;  %vm6219_vm10 = vmor %vm2347_vm13, %vm2348_vm5  ;;  %2774 = vmatpush.msra.mxu2 %v988_v25 }
 0x553   : > { %v4226_v29 = vpop.eup %4225  ;;  %v1945_v36 = vsel %vm1944_vm3, %v4222_v41, %v1941_v49  ;;  %v2341_v18 = vmul.f32 %v5560_v32, %v2340_v9  ;;  %v2231_v43 = vand.u32 2147483647, %v6165_v60  ;;  %vm2227_vm14 = vweird.f32 %v6165_v60  ;;  %v984_v9 = vld [vmem:[%s4796_s2 + $0x18] sm:$0xff] }
 0x554   : > { %v2223_v33 = vmul.f32 %v4226_v29, %v6165_v60  ;;  %v1798_v57 = vpop.xlane.xlu2 %1797  ;;  %v1950_v14 = vsel %vm1947_vm8, %v1949_v58, %v1945_v36  ;;  %v2110_v39 = vsel %vm2109_vm9, %v4224_v15, %v2106_v40  ;;  %vm2228_vm6 = vweird.f32 %v4226_v29  ;;  %2775 = vmatpush.msra.mxu2 %v987_v51  ;;  %v986_v58 = vld [vmem:[%s4796_s2 + $0x28] sm:$0xff] }
 0x555   : > { %4227 = vrcp.f32 %v1798_v57  ;;  %v1951_v48 = vmul.f32 %v5615_v54, %v1950_v14  ;;  %v2115_v19 = vsel %vm2112_vm7, %v2114_v27, %v2110_v39  ;;  %v2354_v8 = vor.u32 1.1754944e-38, %v2353_v37  ;;  %vm2229_vm2 = vmor %vm2227_vm14, %vm2228_vm6 }
 0x556   : > { %v2224_v7 = vsub.f32 1.0, %v2223_v33  ;;  %v2116_v61 = vmul.f32 %v5617_v2, %v2115_v19  ;;  %v2350_v2 = vsel %vm6219_vm10, %v5957_v26, %v2346_v44  ;;  %vm2352_vm15 = vcmp.eq.f32.partialorder %v2351_v45, 8.507059e+37  ;;  %2776 = vmatpush.msra.mxu2 %v986_v58 }
 0x557   : > { %3839 = vmatmul.msk.f32.gmra.mxu2 %vm759_vm1, %v1951_v48  ;;  %v2234_v22 = vor.u32 1.1754944e-38, %v2233_v50  ;;  %vm2232_vm4 = vcmp.eq.f32.partialorder %v2231_v43, 8.507059e+37  ;;  %v2355_v15 = vsel %vm2352_vm15, %v2354_v8, %v2350_v2  ;;  %v1963_v5 = vand.u32 2147483648, %v1798_v57  ;;  %v982_v8 = vld [vmem:[%s4796_s2 + $0x8] sm:$0xff] }
 0x558   : > { %v2225_v54 = vmul.f32 %v4226_v29, %v2224_v7  ;;  %3865 = vmatmul.msk.f32.gmra.mxu1 %vm759_vm1, %v2341_v18  ;;  %3850 = vmatmul.msk.f32.gmra.mxu3 %vm759_vm1, %v2116_v61  ;;  %v2356_v26 = vmul.f32 %v5572_v24, %v2355_v15  ;;  %v1961_v1 = vand.u32 2147483647, %v1798_v57  ;;  %vm1957_vm11 = vweird.f32 %v1798_v57  ;;  %v983_v7 = vld [vmem:[%s4796_s2 + $0x10] sm:$0xff] }
 0x559   : > { %v1964_v23 = vor.u32 1.1754944e-38, %v1963_v5 }
 0x55a   : > { %v2226_v32 = vadd.f32 %v4226_v29, %v2225_v54  ;;  %vm1962_vm5 = vcmp.eq.f32.partialorder %v1961_v1, 8.507059e+37 }
 0x55b   : > { %v4228_v0 = vpop.eup %4227 }
 0x55c   : > { %v1953_v47 = vmul.f32 %v4228_v0, %v1798_v57  ;;  %v2230_v52 = vsel %vm2229_vm2, %v4226_v29, %v2226_v32  ;;  %vm1958_vm0 = vweird.f32 %v4228_v0  ;;  %v985_v57 = vld [vmem:[%s4796_s2 + $0x20] sm:$0xff]  ;;  %vm2721_vm2 = vcmask 261120  }
 0x55d   : > { %v2235_v10 = vsel %vm2232_vm4, %v2234_v22, %v2230_v52  ;;  %vm1959_vm3 = vmor %vm1957_vm11, %vm1958_vm0  ;;  %2777 = vmatpush.msra.mxu2 %v985_v57  ;;  %vm2730_vm4 = vcmask 392192  }
 0x55e   : > { %v1954_v53 = vsub.f32 1.0, %v1953_v47  ;;  %v2236_v62 = vmul.f32 %v5624_v35, %v2235_v10  ;;  %v981_v47 = vld [vmem:[%s4796_s2] sm:$0xff] }
 0x55f   : > { %2778 = vmatpush.msra.mxu2 %v984_v9 }
 0x560   : > { %v1955_v4 = vmul.f32 %v4228_v0, %v1954_v53  ;;  %3858 = vmatmul.msk.f32.gmra.mxu0 %vm759_vm1, %v2236_v62  ;;  %3866 = vmatmul.msk.f32.gmra.mxu1 %vm759_vm1, %v2356_v26 }
 0x561   : > { %2779 = vmatpush.msra.mxu2 %v983_v7 }
 0x562   : > { %v1956_v60 = vadd.f32 %v4228_v0, %v1955_v4 }
 0x563   : > { %2780 = vmatpush.msra.mxu2 %v982_v8 }
 0x564   : > { %v1960_v55 = vsel %vm1959_vm3, %v4228_v0, %v1956_v60 }
 0x565   : > { %v1965_v12 = vsel %vm1962_vm5, %v1964_v23, %v1960_v55  ;;  %2781 = vmatpush.msra.mxu2 %v981_v47 }
 0x566   : > { %v1966_v16 = vmul.f32 %v5628_v13, %v1965_v12 }
 0x568   : > { %3840 = vmatmul.msk.f32.gmra.mxu2 %vm759_vm1, %v1966_v16 }
 0x56c   : > { %v2528_v35 = vpop.f32.mrf.mxu0 }
 0x56d   : > { %2657 = vrot.lane.b32.xlu1 %v2528_v35, %s4556_s13 }
 0x574   : > { %v2593_v24 = vpop.f32.mrf.mxu1 }
 0x575   : > { %2689 = vrot.lane.b32.xlu0 %v2593_v24, %s4557_s23 }
 0x582   : > { %v2463_v63 = vpop.f32.mrf.mxu3 }
 0x583   : > { %2625 = vrot.lane.b32.xlu2 %v2463_v63, %s4558_s1 }
 0x585   : > { %v2531_v28 = vpop.f32.mrf.mxu0  ;;  %v2596_v34 = vpop.f32.mrf.mxu1 }
 0x586   : > { %2691 = vrot.lane.b32.xlu0 %v2596_v34, %s4557_s23  ;;  %2659 = vrot.lane.b32.xlu1 %v2531_v28, %s4556_s13 }
 0x58b   : > { %v1801_v13 = vpop.xlane.xlu1 %1800 }
 0x58c   : > { %4229 = vrcp.f32 %v1801_v13  ;;  %v1978_v38 = vand.u32 2147483648, %v1801_v13  ;;  %v1976_v49 = vand.u32 2147483647, %v1801_v13  ;;  %vm1972_vm9 = vweird.f32 %v1801_v13 }
 0x58e   : > { %v2534_v20 = vpop.f32.mrf.mxu0  ;;  %v1979_v40 = vor.u32 1.1754944e-38, %v1978_v38  ;;  %vm1977_vm13 = vcmp.eq.f32.partialorder %v1976_v49, 8.507059e+37 }
 0x58f   : > { %2661 = vrot.lane.b32.xlu1 %v2534_v20, %s4556_s13 }
 0x590   : > { %v2599_v17 = vpop.f32.mrf.mxu1 }
 0x591   : > { %2693 = vrot.lane.b32.xlu0 %v2599_v17, %s4557_s23 }
 0x592   : > { %v4230_v21 = vpop.eup %4229 }
 0x593   : > { %v1968_v6 = vmul.f32 %v4230_v21, %v1801_v13  ;;  %v2466_v31 = vpop.f32.mrf.mxu3  ;;  %vm1973_vm8 = vweird.f32 %v4230_v21 }
 0x594   : > { %2627 = vrot.lane.b32.xlu2 %v2466_v31, %s4558_s1  ;;  %vm1974_vm7 = vmor %vm1972_vm9, %vm1973_vm8 }
 0x595   : > { %v1969_v56 = vsub.f32 1.0, %v1968_v6 }
 0x596   : > { %v2537_v59 = vpop.f32.mrf.mxu0 }
 0x597   : > { %v1970_v3 = vmul.f32 %v4230_v21, %v1969_v56  ;;  %2663 = vrot.lane.b32.xlu1 %v2537_v59, %s4556_s13 }
 0x599   : > { %v1971_v42 = vadd.f32 %v4230_v21, %v1970_v3 }
 0x59b   : > { %v1975_v29 = vsel %vm1974_vm7, %v4230_v21, %v1971_v42  ;;  %v2469_v36 = vpop.f32.mrf.mxu3 }
 0x59c   : > { %v1980_v27 = vsel %vm1977_vm13, %v1979_v40, %v1975_v29  ;;  %2629 = vrot.lane.b32.xlu2 %v2469_v36, %s4558_s1 }
 0x59d   : > { %v1981_v33 = vmul.f32 %v5790_v46, %v1980_v27 }
 0x59f   : > { %3841 = vmatmul.msk.f32.gmra.mxu2 %vm759_vm1, %v1981_v33 }
 0x5a4   : > { %v1804_v14 = vpop.xlane.xlu0 %1803  ;;  %v2472_v39 = vpop.f32.mrf.mxu3 }
 0x5a5   : > { %4231 = vrcp.f32 %v1804_v14  ;;  %2631 = vrot.lane.b32.xlu2 %v2472_v39, %s4558_s1  ;;  %v1993_v45 = vand.u32 2147483648, %v1804_v14  ;;  %v1991_v18 = vand.u32 2147483647, %v1804_v14  ;;  %vm1987_vm6 = vweird.f32 %v1804_v14 }
 0x5a7   : > { %v1994_v54 = vor.u32 1.1754944e-38, %v1993_v45  ;;  %vm1992_vm15 = vcmp.eq.f32.partialorder %v1991_v18, 8.507059e+37 }
 0x5a9   : > { %v2540_v37 = vpop.f32.mrf.mxu0 }
 0x5aa   : > { %2665 = vrot.lane.b32.xlu1 %v2540_v37, %s4556_s13 }
 0x5ab   : > { %v4232_v44 = vpop.eup %4231  ;;  %v2602_v19 = vpop.f32.mrf.mxu1 }
 0x5ac   : > { %v1983_v48 = vmul.f32 %v4232_v44, %v1804_v14  ;;  %2695 = vrot.lane.b32.xlu0 %v2602_v19, %s4557_s23  ;;  %v2475_v61 = vpop.f32.mrf.mxu3  ;;  %vm1988_vm10 = vweird.f32 %v4232_v44 }
 0x5ad   : > { %2633 = vrot.lane.b32.xlu2 %v2475_v61, %s4558_s1  ;;  %vm1989_vm14 = vmor %vm1987_vm6, %vm1988_vm10 }
 0x5ae   : > { %v1984_v46 = vsub.f32 1.0, %v1983_v48 }
 0x5b0   : > { %v1985_v50 = vmul.f32 %v4232_v44, %v1984_v46 }
 0x5b2   : > { %v1986_v41 = vadd.f32 %v4232_v44, %v1985_v50 }
 0x5b3   : > { %v2605_v32 = vpop.f32.mrf.mxu1  ;;  %v2398_v1 = vpop.f32.mrf.mxu2 }
 0x5b4   : > { %v1990_v43 = vsel %vm1989_vm14, %v4232_v44, %v1986_v41  ;;  %2697 = vrot.lane.b32.xlu0 %v2605_v32, %s4557_s23 }
 0x5b5   : > { %v1995_v2 = vsel %vm1992_vm15, %v1994_v54, %v1990_v43 }
 0x5b6   : > { %v1996_v0 = vmul.f32 %v5949_v11, %v1995_v2 }
 0x5b8   : > { %3842 = vmatmul.msk.f32.gmra.mxu2 %vm759_vm1, %v1996_v0 }
 0x5bb   : > { %v2401_v24 = vpop.f32.mrf.mxu2 }
 0x5bd   : > { %v2543_v22 = vpop.f32.mrf.mxu0 }
 0x5be   : > { %2667 = vrot.lane.b32.xlu1 %v2543_v22, %s4556_s13 }
 0x5c3   : > { %v2404_v25 = vpop.f32.mrf.mxu2 }
 0x5c5   : > { %v2546_v52 = vpop.f32.mrf.mxu0 }
 0x5c6   : > { %2669 = vrot.lane.b32.xlu1 %v2546_v52, %s4556_s13 }
 0x5cb   : > { %v2478_v15 = vpop.f32.mrf.mxu3 }
 0x5cc   : > { %2635 = vrot.lane.b32.xlu2 %v2478_v15, %s4558_s1  ;;  %v4082_v15 = vld [vmem:[%s6747_s6] ss:$0 sm:$0xff] }
 0x5cd   : > { %v2608_v10 = vpop.f32.mrf.mxu1 }
 0x5ce   : > { %2699 = vrot.lane.b32.xlu0 %v2608_v10, %s4557_s23 }
 0x5d2   : > { %v2407_v49 = vpop.f32.mrf.mxu2 }
 0x5d3   : > { %v2481_v11 = vpop.f32.mrf.mxu3 }
 0x5d4   : > { %2637 = vrot.lane.b32.xlu2 %v2481_v11, %s4558_s1 }
 0x5d5   : > { %v2611_v53 = vpop.f32.mrf.mxu1 }
 0x5d6   : > { %2701 = vrot.lane.b32.xlu0 %v2611_v53, %s4557_s23  ;;  %v4281_v53 = vld [vmem:[#allocation2] sm:$0xff] }
 0x5da   : > { %v2410_v36 = vpop.f32.mrf.mxu2 }
 0x5db   : > { %v2484_v62 = vpop.f32.mrf.mxu3 }
 0x5dc   : > { %2639 = vrot.lane.b32.xlu2 %v2484_v62, %s4558_s1 }
 0x5dd   : > { %v2549_v5 = vpop.f32.mrf.mxu0  ;;  %v2614_v26 = vpop.f32.mrf.mxu1 }
 0x5de   : > { %2671 = vrot.lane.b32.xlu1 %v2549_v5, %s4556_s13  ;;  %2703 = vrot.lane.b32.xlu0 %v2614_v26, %s4557_s23  ;;  %v2626_v4 = vpop.permute.xlu2 %2625 }
 0x5df   : > { %v2713_v60 = vsel %vm1248_vm12, %v2398_v1, %v2626_v4  ;;  %v2658_v23 = vpop.permute.xlu1 %2657  ;;  %v4282_v1 = vld [vmem:[#allocation2 + $0x8] sm:$0xff] }
 0x5e0   : > { %v2722_v55 = vsel %vm2721_vm2, %v2713_v60, %v2658_v23 }
 0x5e7   : > { %v2690_v12 = vpop.permute.xlu0 %2689 }
 0x5e8   : > { %v2731_v16 = vsel %vm2730_vm4, %v2722_v55, %v2690_v12 }
 0x5e9   : > { %3867 = vmatmul.msk.f32.vlgmr.msra.gmra.mxu2 %vm759_vm1, %v2731_v16  ;;  %v4283_v16 = vld [vmem:[#allocation2 + $0x10] sm:$0xff] }
 0x5eb   : > { %v2413_v48 = vpop.f32.mrf.mxu2 }
 0x5ee   : > { %v2628_v35 = vpop.permute.xlu2 %2627 }
 0x5ef   : > { %v2714_v63 = vsel %vm1248_vm12, %v2401_v24, %v2628_v35 }
 0x5f6   : > { %v2630_v17 = vpop.permute.xlu2 %2629 }
 0x5f7   : > { %v2715_v21 = vsel %vm1248_vm12, %v2404_v25, %v2630_v17 }
 0x5f8   : > { %v2692_v28 = vpop.permute.xlu0 %2691  ;;  %v2660_v34 = vpop.permute.xlu1 %2659 }
 0x5f9   : > { %v2723_v13 = vsel %vm2721_vm2, %v2714_v63, %v2660_v34  ;;  %v4284_v34 = vld [vmem:[#allocation2 + $0x18] sm:$0xff] }
 0x5fa   : > { %v2732_v20 = vsel %vm2730_vm4, %v2723_v13, %v2692_v28 }
 0x5fb   : > { %3868 = vmatmul.msk.f32.gmra.mxu2 %vm759_vm1, %v2732_v20 }
 0x5ff   : > { %v2632_v3 = vpop.permute.xlu2 %2631 }
 0x600   : > { %v2716_v51 = vsel %vm1248_vm12, %v2407_v49, %v2632_v3  ;;  %v4286_v3 = vld [vmem:[#allocation2 + $0x28] sm:$0xff] }
 0x601   : > { %v2662_v6 = vpop.permute.xlu1 %2661 }
 0x602   : > { %v2724_v31 = vsel %vm2721_vm2, %v2715_v21, %v2662_v6  ;;  %v4285_v21 = vld [vmem:[#allocation2 + $0x20] sm:$0xff] }
 0x603   : > { %v2694_v56 = vpop.permute.xlu0 %2693 }
 0x604   : > { %v2733_v38 = vsel %vm2730_vm4, %v2724_v31, %v2694_v56 }
 0x605   : > { %3869 = vmatmul.msk.f32.gmra.mxu2 %vm759_vm1, %v2733_v38 }
 0x607   : > { %v2634_v29 = vpop.permute.xlu2 %2633 }
 0x608   : > { %v2717_v33 = vsel %vm1248_vm12, %v2410_v36, %v2634_v29 }
 0x609   : > { %v2664_v59 = vpop.permute.xlu1 %2663 }
 0x60a   : > { %v2725_v42 = vsel %vm2721_vm2, %v2716_v51, %v2664_v59 }
 0x61c   : > { %v2666_v27 = vpop.permute.xlu1 %2665 }
 0x61d   : > { %v2726_v57 = vsel %vm2721_vm2, %v2717_v33, %v2666_v27 }
 0x61e   : > { %v2696_v58 = vpop.permute.xlu0 %2695 }
 0x61f   : > { %v2734_v40 = vsel %vm2730_vm4, %v2725_v42, %v2696_v58  ;;  %v4287_v58 = vld [vmem:[#allocation2 + $0x30] sm:$0xff] }
 0x620   : > { %3870 = vmatmul.msk.f32.gmra.mxu2 %vm759_vm1, %v2734_v40 }
 0x622   : > { %v2416_v45 = vpop.f32.mrf.mxu2 }
 0x626   : > { %v2698_v14 = vpop.permute.xlu0 %2697  ;;  %v2636_v9 = vpop.permute.xlu2 %2635 }
 0x627   : > { %v2735_v39 = vsel %vm2730_vm4, %v2726_v57, %v2698_v14  ;;  %v2718_v37 = vsel %vm1248_vm12, %v2413_v48, %v2636_v9 }
 0x628   : > { %3871 = vmatmul.msk.f32.gmra.mxu2 %vm759_vm1, %v2735_v39 }
 0x62e   : > { %v2638_v50 = vpop.permute.xlu2 %2637 }
 0x62f   : > { %v2719_v18 = vsel %vm1248_vm12, %v2416_v45, %v2638_v50 }
 0x630   : > { %v2668_v44 = vpop.permute.xlu1 %2667 }
 0x631   : > { %v2727_v7 = vsel %vm2721_vm2, %v2718_v37, %v2668_v44  ;;  %v4288_v44 = vld [vmem:[#allocation2 + $0x38] sm:$0xff] }
 0x636   : > { %v2640_v8 = vpop.permute.xlu2 %2639 }
 0x638   : > { %v2670_v61 = vpop.permute.xlu1 %2669 }
 0x639   : > { %v2728_v41 = vsel %vm2721_vm2, %v2719_v18, %v2670_v61 }
 0x63b   : > { %v2419_v2 = vpop.f32.mrf.mxu2 }
 0x63c   : > { %v2720_v32 = vsel %vm1248_vm12, %v2419_v2, %v2640_v8 }
 0x640   : > { %v2700_v46 = vpop.permute.xlu0 %2699 }
 0x641   : > { %v2736_v19 = vsel %vm2730_vm4, %v2727_v7, %v2700_v46 }
 0x642   : > { %3872 = vmatmul.msk.f32.gmra.mxu2 %vm759_vm1, %v2736_v19 }
 0x648   : > { %v2702_v54 = vpop.permute.xlu0 %2701 }
 0x649   : > { %v2737_v43 = vsel %vm2730_vm4, %v2728_v41, %v2702_v54 }
 0x64a   : > { %3873 = vmatmul.msk.f32.gmra.mxu2 %vm759_vm1, %v2737_v43 }
 0x650   : > { %v2672_v0 = vpop.permute.xlu1 %2671  ;;  %v2704_v22 = vpop.permute.xlu0 %2703 }
 0x651   : > { %v2729_v47 = vsel %vm2721_vm2, %v2720_v32, %v2672_v0 }
 0x652   : > { %v2738_v52 = vsel %vm2730_vm4, %v2729_v47, %v2704_v22 }
 0x653   : > { %3874 = vmatmul.msk.f32.gmra.mxu2 %vm759_vm1, %v2738_v52 }
 0x66c   : > { %v2783_v10 = vpop.f32.mrf.mxu2 }
 0x66d   : > { %v2784_v11 = vadd.f32 %v4082_v15, %v2783_v10 }
 0x66f   : > { %v6307_v62 = vadd.f32 %v4281_v53, %v2784_v11 }
 0x671   : > { %v2817_v5 = vsel %vm759_vm1, %v6307_v62, 0.0 }
 0x672   : > { %2818 = vadd.xlane.f32.xlu2 %v2817_v5 }
 0x67e   : > { %v2786_v26 = vpop.f32.mrf.mxu2 }
 0x67f   : > { %v2787_v4 = vadd.f32 %v4082_v15, %v2786_v26 }
 0x681   : > { %v6311_v60 = vadd.f32 %v4282_v1, %v2787_v4 }
 0x683   : > { %v2820_v23 = vsel %vm759_vm1, %v6311_v60, 0.0 }
 0x684   : > { %2821 = vadd.xlane.f32.xlu1 %v2820_v23 }
 0x688   : > { %v2789_v55 = vpop.f32.mrf.mxu2 }
 0x689   : > { %v2790_v12 = vadd.f32 %v4082_v15, %v2789_v55 }
 0x68b   : > { %v6315_v35 = vadd.f32 %v4283_v16, %v2790_v12 }
 0x68d   : > { %v2823_v24 = vsel %vm759_vm1, %v6315_v35, 0.0 }
 0x68e   : > { %2824 = vadd.xlane.f32.xlu0 %v2823_v24 }
 0x6a3   : > { %v2792_v63 = vpop.f32.mrf.mxu2 }
 0x6a4   : > { %v2793_v28 = vadd.f32 %v4082_v15, %v2792_v63  ;;  %v3022_v63 = vld [vmem:[%s4772_s27 + $0x38] sm:$0xff] }
 0x6a5   : > { %3076 = vmatpush.msra.mxu3 %v3022_v63 }
 0x6a6   : > { %v6319_v13 = vadd.f32 %v4284_v34, %v2793_v28  ;;  %v3021_v28 = vld [vmem:[%s4772_s27 + $0x30] sm:$0xff] }
 0x6a7   : > { %3077 = vmatpush.msra.mxu3 %v3021_v28 }
 0x6a8   : > { %v2826_v20 = vsel %vm759_vm1, %v6319_v13, 0.0 }
 0x6a9   : > { %2827 = vadd.xlane.f32.xlu2 %v2826_v20 }
 0x6ab   : > { %v2795_v17 = vpop.f32.mrf.mxu2 }
 0x6ac   : > { %v2796_v25 = vadd.f32 %v4082_v15, %v2795_v17 }
 0x6ae   : > { %v6323_v6 = vadd.f32 %v4285_v21, %v2796_v25 }
 0x6b0   : > { %v2829_v31 = vsel %vm759_vm1, %v6323_v6, 0.0 }
 0x6b1   : > { %2830 = vadd.xlane.f32.xlu1 %v2829_v31  ;;  %v3020_v31 = vld [vmem:[%s4772_s27 + $0x28] sm:$0xff] }
 0x6b2   : > { %3078 = vmatpush.msra.mxu3 %v3020_v31 }
 0x6c5   : > { %v2798_v56 = vpop.f32.mrf.mxu2 }
 0x6c6   : > { %v2799_v38 = vadd.f32 %v4082_v15, %v2798_v56  ;;  %v3019_v56 = vld [vmem:[%s4772_s27 + $0x20] sm:$0xff] }
 0x6c7   : > { %3079 = vmatpush.msra.mxu3 %v3019_v56 }
 0x6c8   : > { %v6327_v49 = vadd.f32 %v4286_v3, %v2799_v38 }
 0x6ca   : > { %v2832_v59 = vsel %vm759_vm1, %v6327_v49, 0.0 }
 0x6cb   : > { %2833 = vadd.xlane.f32.xlu0 %v2832_v59  ;;  %v3018_v59 = vld [vmem:[%s4772_s27 + $0x18] sm:$0xff] }
 0x6cc   : > { %3080 = vmatpush.msra.mxu3 %v3018_v59 }
 0x6cd   : > { %v2801_v51 = vpop.f32.mrf.mxu2 }
 0x6ce   : > { %v2802_v42 = vadd.f32 %v4082_v15, %v2801_v51 }
 0x6d0   : > { %v6331_v40 = vadd.f32 %v4287_v58, %v2802_v42  ;;  %v3017_v58 = vld [vmem:[%s4772_s27 + $0x10] sm:$0xff] }
 0x6d1   : > { %3081 = vmatpush.msra.mxu3 %v3017_v58 }
 0x6d2   : > { %v2835_v29 = vsel %vm759_vm1, %v6331_v40, 0.0 }
 0x6d3   : > { %2836 = vadd.xlane.f32.xlu1 %v2835_v29 }
 0x6d6   : > { %v2804_v57 = vpop.f32.mrf.mxu2 }
 0x6d7   : > { %v2805_v39 = vadd.f32 %v4082_v15, %v2804_v57 }
 0x6d9   : > { %v6342_v48 = vadd.f32 %v4288_v44, %v2805_v39  ;;  %v3016_v39 = vld [vmem:[%s4772_s27 + $0x8] sm:$0xff] }
 0x6da   : > { %3082 = vmatpush.msra.mxu3 %v3016_v39 }
 0x6db   : > { %v2838_v37 = vsel %vm759_vm1, %v6342_v48, 0.0 }
 0x6e5   : > { %v2819_v27 = vpop.xlane.xlu2 %2818 }
 0x6e6   : > { %v2841_v36 = vmul.f32 %v2819_v27, %v4825_v30 }
 0x6e8   : > { %v6337_v33 = vsub.f32 %v6307_v62, %v2841_v36 }
 0x6ea   : > { %v2857_v14 = vmul.f32 %v6337_v33, %v6337_v33 }
 0x6ec   : > { %v2865_v9 = vsel %vm759_vm1, %v2857_v14, 0.0 }
 0x6ed   : > { %2866 = vadd.xlane.f32.xlu2 %v2865_v9  ;;  %v3015_v9 = vld [vmem:[%s4772_s27] sm:$0xff] }
 0x6ee   : > { %3083 = vmatpush.msra.mxu3 %v3015_v9 }
 0x6f5   : > { %2839 = vadd.xlane.f32.xlu2 %v2838_v37 }
 0x6f7   : > { %v2822_v7 = vpop.xlane.xlu1 %2821 }
 0x6f8   : > { %v2842_v46 = vmul.f32 %v2822_v7, %v4825_v30  ;;  %v6407_v7 = vld [vmem:[%s6748_s18] ss:$0 sm:$0xff] }
 0x6fa   : > { %v6348_v19 = vsub.f32 %v6311_v60, %v2842_v46 }
 0x6fc   : > { %v2858_v45 = vmul.f32 %v6348_v19, %v6348_v19 }
 0x6fe   : > { %v2868_v50 = vsel %vm759_vm1, %v2858_v45, 0.0 }
 0x6ff   : > { %2869 = vadd.xlane.f32.xlu0 %v2868_v50 }
 0x701   : > { %v2825_v61 = vpop.xlane.xlu0 %2824 }
 0x702   : > { %v2843_v18 = vmul.f32 %v2825_v61, %v4825_v30  ;;  %v6412_v61 = vld [vmem:[%s6749_s25] ss:$0 sm:$0xff] }
 0x704   : > { %v6355_v41 = vsub.f32 %v6315_v35, %v2843_v18 }
 0x706   : > { %v2859_v54 = vmul.f32 %v6355_v41, %v6355_v41 }
 0x708   : > { %v2871_v43 = vsel %vm759_vm1, %v2859_v54, 0.0 }
 0x709   : > { %2872 = vadd.xlane.f32.xlu1 %v2871_v43 }
 0x71c   : > { %v2828_v2 = vpop.xlane.xlu2 %2827 }
 0x71d   : > { %v2844_v8 = vmul.f32 %v2828_v2, %v4825_v30 }
 0x71f   : > { %v6362_v32 = vsub.f32 %v6319_v13, %v2844_v8 }
 0x721   : > { %v2860_v0 = vmul.f32 %v6362_v32, %v6362_v32 }
 0x723   : > { %v2874_v22 = vsel %vm759_vm1, %v2860_v0, 0.0 }
 0x724   : > { %v2831_v47 = vpop.xlane.xlu1 %2830  ;;  %2875 = vadd.xlane.f32.xlu0 %v2874_v22 }
 0x725   : > { %v2845_v52 = vmul.f32 %v2831_v47, %v4825_v30 }
 0x727   : > { %v6369_v15 = vsub.f32 %v6323_v6, %v2845_v52 }
 0x729   : > { %v2861_v10 = vmul.f32 %v6369_v15, %v6369_v15 }
 0x72b   : > { %v2877_v11 = vsel %vm759_vm1, %v2861_v10, 0.0 }
 0x72c   : > { %2878 = vadd.xlane.f32.xlu2 %v2877_v11 }
 0x73e   : > { %v2834_v53 = vpop.xlane.xlu0 %2833 }
 0x73f   : > { %v2846_v5 = vmul.f32 %v2834_v53, %v4825_v30 }
 0x741   : > { %v6376_v26 = vsub.f32 %v6327_v49, %v2846_v5 }
 0x743   : > { %v2862_v4 = vmul.f32 %v6376_v26, %v6376_v26 }
 0x745   : > { %v2880_v1 = vsel %vm759_vm1, %v2862_v4, 0.0 }
 0x746   : > { %2881 = vadd.xlane.f32.xlu1 %v2880_v1  ;;  %v2837_v23 = vpop.xlane.xlu1 %2836 }
 0x747   : > { %v2847_v55 = vmul.f32 %v2837_v23, %v4825_v30 }
 0x749   : > { %v6383_v12 = vsub.f32 %v6331_v40, %v2847_v55 }
 0x74b   : > { %v2863_v16 = vmul.f32 %v6383_v12, %v6383_v12 }
 0x74d   : > { %v2883_v24 = vsel %vm759_vm1, %v2863_v16, 0.0 }
 0x74e   : > { %2884 = vadd.xlane.f32.xlu0 %v2883_v24 }
 0x760   : > { %v2867_v34 = vpop.xlane.xlu2 %2866 }
 0x761   : > { %v2889_v20 = vmul.f32 %v2867_v34, %v4825_v30 }
 0x763   : > { %v2897_v17 = vadd.f32 1e-05, %v2889_v20 }
 0x765   : > { %4233 = vrsqrt.f32 %v2897_v17  ;;  %vm2911_vm0 = vweird.f32 %v2897_v17 }
 0x768   : > { %v2840_v25 = vpop.xlane.xlu2 %2839 }
 0x769   : > { %v2848_v21 = vmul.f32 %v2840_v25, %v4825_v30 }
 0x76b   : > { %v4234_v38 = vpop.eup %4233  ;;  %v6395_v3 = vsub.f32 %v6342_v48, %v2848_v21 }
 0x76c   : > { %v2906_v51 = vmul.f32 %v4234_v38, %v2897_v17  ;;  %vm2912_vm12 = vweird.f32 %v4234_v38 }
 0x76d   : > { %v2864_v42 = vmul.f32 %v6395_v3, %v6395_v3  ;;  %vm2913_vm11 = vmor %vm2911_vm0, %vm2912_vm12 }
 0x76e   : > { %v2907_v29 = vmul.f32 %v4234_v38, %v2906_v51 }
 0x76f   : > { %v2886_v27 = vsel %vm759_vm1, %v2864_v42, 0.0 }
 0x770   : > { %v2908_v36 = vmul.f32 0.5, %v2907_v29  ;;  %2887 = vadd.xlane.f32.xlu2 %v2886_v27 }
 0x772   : > { %v2909_v57 = vsub.f32 1.5, %v2908_v36  ;;  %v2870_v14 = vpop.xlane.xlu0 %2869 }
 0x773   : > { %v2890_v37 = vmul.f32 %v2870_v14, %v4825_v30 }
 0x774   : > { %v2910_v44 = vmul.f32 %v4234_v38, %v2909_v57 }
 0x775   : > { %v2898_v45 = vadd.f32 1e-05, %v2890_v37 }
 0x776   : > { %v2914_v46 = vsel %vm2913_vm11, %v4234_v38, %v2910_v44 }
 0x777   : > { %v2985_v50 = vmul.f32 %v2914_v46, %v6337_v33  ;;  %4235 = vrsqrt.f32 %v2898_v45  ;;  %vm2921_vm5 = vweird.f32 %v2898_v45 }
 0x779   : > { %v2996_v18 = vmul.f32 %v6407_v7, %v2985_v50 }
 0x77b   : > { %v3007_v54 = vadd.f32 %v6412_v61, %v2996_v18 }
 0x77c   : > { %v2873_v43 = vpop.xlane.xlu1 %2872 }
 0x77d   : > { %3875 = vmatmul.msk.f32.vlgmr.msra.gmra.mxu3 %vm759_vm1, %v3007_v54  ;;  %v4236_v2 = vpop.eup %4235  ;;  %v2891_v8 = vmul.f32 %v2873_v43, %v4825_v30 }
 0x77e   : > { %v2916_v0 = vmul.f32 %v4236_v2, %v2898_v45  ;;  %vm2922_vm3 = vweird.f32 %v4236_v2 }
 0x77f   : > { %v2899_v22 = vadd.f32 1e-05, %v2891_v8  ;;  %vm2923_vm8 = vmor %vm2921_vm5, %vm2922_vm3 }
 0x780   : > { %v2917_v47 = vmul.f32 %v4236_v2, %v2916_v0 }
 0x781   : > { %4237 = vrsqrt.f32 %v2899_v22  ;;  %vm2931_vm7 = vweird.f32 %v2899_v22 }
 0x782   : > { %v2918_v52 = vmul.f32 0.5, %v2917_v47 }
 0x784   : > { %v2919_v33 = vsub.f32 1.5, %v2918_v52 }
 0x786   : > { %v2920_v10 = vmul.f32 %v4236_v2, %v2919_v33 }
 0x787   : > { %v4238_v11 = vpop.eup %4237 }
 0x788   : > { %v2924_v53 = vsel %vm2923_vm8, %v4236_v2, %v2920_v10  ;;  %v2926_v5 = vmul.f32 %v4238_v11, %v2899_v22  ;;  %vm2932_vm9 = vweird.f32 %v4238_v11 }
 0x789   : > { %v2986_v4 = vmul.f32 %v2924_v53, %v6348_v19  ;;  %vm2933_vm13 = vmor %vm2931_vm7, %vm2932_vm9 }
 0x78a   : > { %v2927_v1 = vmul.f32 %v4238_v11, %v2926_v5 }
 0x78b   : > { %v2997_v23 = vmul.f32 %v6407_v7, %v2986_v4 }
 0x78c   : > { %v2928_v55 = vmul.f32 0.5, %v2927_v1 }
 0x78d   : > { %v3008_v16 = vadd.f32 %v6412_v61, %v2997_v23 }
 0x78e   : > { %v2929_v24 = vsub.f32 1.5, %v2928_v55 }
 0x78f   : > { %3876 = vmatmul.msk.f32.gmra.mxu3 %vm759_vm1, %v3008_v16 }
 0x790   : > { %v2930_v63 = vmul.f32 %v4238_v11, %v2929_v24 }
 0x792   : > { %v2934_v28 = vsel %vm2933_vm13, %v4238_v11, %v2930_v63 }
 0x793   : > { %v2987_v34 = vmul.f32 %v2934_v28, %v6355_v41 }
 0x795   : > { %v2998_v20 = vmul.f32 %v6407_v7, %v2987_v34 }
 0x797   : > { %v3009_v19 = vadd.f32 %v6412_v61, %v2998_v20  ;;  %v2876_v17 = vpop.xlane.xlu0 %2875 }
 0x798   : > { %v2892_v25 = vmul.f32 %v2876_v17, %v4825_v30 }
 0x799   : > { %3877 = vmatmul.msk.f32.gmra.mxu3 %vm759_vm1, %v3009_v19 }
 0x79a   : > { %v2900_v21 = vadd.f32 1e-05, %v2892_v25 }
 0x79c   : > { %4239 = vrsqrt.f32 %v2900_v21  ;;  %vm2941_vm6 = vweird.f32 %v2900_v21 }
 0x79f   : > { %v2879_v31 = vpop.xlane.xlu2 %2878 }
 0x7a0   : > { %v2893_v56 = vmul.f32 %v2879_v31, %v4825_v30 }
 0x7a2   : > { %v4240_v38 = vpop.eup %4239  ;;  %v2901_v59 = vadd.f32 1e-05, %v2893_v56 }
 0x7a3   : > { %v2936_v51 = vmul.f32 %v4240_v38, %v2900_v21  ;;  %vm2942_vm10 = vweird.f32 %v4240_v38 }
 0x7a4   : > { %4241 = vrsqrt.f32 %v2901_v59  ;;  %vm2943_vm14 = vmor %vm2941_vm6, %vm2942_vm10  ;;  %vm2951_vm2 = vweird.f32 %v2901_v59 }
 0x7a5   : > { %v2937_v42 = vmul.f32 %v4240_v38, %v2936_v51 }
 0x7a7   : > { %v2938_v41 = vmul.f32 0.5, %v2937_v42 }
 0x7a9   : > { %v2939_v58 = vsub.f32 1.5, %v2938_v41 }
 0x7aa   : > { %v4242_v29 = vpop.eup %4241 }
 0x7ab   : > { %v2940_v27 = vmul.f32 %v4240_v38, %v2939_v58  ;;  %v2946_v36 = vmul.f32 %v4242_v29, %v2901_v59  ;;  %vm2952_vm15 = vweird.f32 %v4242_v29  ;;  %v6452_v58 = vld [vmem:[%s713_s30] ss:$0 sm:$0xff] }
 0x7ac   : > { %vm2953_vm4 = vmor %vm2951_vm2, %vm2952_vm15 }
 0x7ad   : > { %v2944_v57 = vsel %vm2943_vm14, %v4240_v38, %v2940_v27  ;;  %v2947_v14 = vmul.f32 %v4242_v29, %v2946_v36 }
 0x7ae   : > { %v2988_v39 = vmul.f32 %v2944_v57, %v6362_v32 }
 0x7af   : > { %v2948_v9 = vmul.f32 0.5, %v2947_v14 }
 0x7b0   : > { %v2999_v44 = vmul.f32 %v6407_v7, %v2988_v39 }
 0x7b1   : > { %v2949_v37 = vsub.f32 1.5, %v2948_v9 }
 0x7b2   : > { %v3010_v46 = vadd.f32 %v6412_v61, %v2999_v44 }
 0x7b3   : > { %v2950_v45 = vmul.f32 %v4242_v29, %v2949_v37 }
 0x7b4   : > { %3878 = vmatmul.msk.f32.gmra.mxu3 %vm759_vm1, %v3010_v46 }
 0x7b5   : > { %v2954_v50 = vsel %vm2953_vm4, %v4242_v29, %v2950_v45 }
 0x7b6   : > { %v2989_v54 = vmul.f32 %v2954_v50, %v6369_v15 }
 0x7b8   : > { %v3000_v32 = vmul.f32 %v6407_v7, %v2989_v54  ;;  %v3039_v54 = vld [vmem:[%s4805_s7 + $0x78] sm:$0xff] }
 0x7b9   : > { %v2882_v18 = vpop.xlane.xlu1 %2881  ;;  %3432 = vmatpush.msrb.mxu0 %v3039_v54  ;;  %3898 = vmatpush.msrb.mxu2 %v3039_v54 }
 0x7ba   : > { %v2894_v43 = vmul.f32 %v2882_v18, %v4825_v30  ;;  %v3011_v8 = vadd.f32 %v6412_v61, %v3000_v32 }
 0x7bc   : > { %v2902_v2 = vadd.f32 1e-05, %v2894_v43  ;;  %3879 = vmatmul.msk.f32.gmra.mxu3 %vm759_vm1, %v3011_v8  ;;  %v3038_v43 = vld [vmem:[%s4805_s7 + $0x70] sm:$0xff] }
 0x7bd   : > { %3433 = vmatpush.msrb.mxu0 %v3038_v43  ;;  %3899 = vmatpush.msrb.mxu2 %v3038_v43  ;;  %v3028_v43 = vld [vmem:[%s4805_s7 + $0x20] sm:$0xff] }
 0x7be   : > { %4243 = vrsqrt.f32 %v2902_v2  ;;  %vm2961_vm0 = vweird.f32 %v2902_v2 }
 0x7c1   : > { %v2885_v0 = vpop.xlane.xlu0 %2884 }
 0x7c2   : > { %v2895_v22 = vmul.f32 %v2885_v0, %v4825_v30  ;;  %v3037_v0 = vld [vmem:[%s4805_s7 + $0x68] sm:$0xff] }
 0x7c3   : > { %3434 = vmatpush.msrb.mxu0 %v3037_v0  ;;  %3900 = vmatpush.msrb.mxu2 %v3037_v0 }
 0x7c4   : > { %v4244_v47 = vpop.eup %4243  ;;  %v2903_v52 = vadd.f32 1e-05, %v2895_v22 }
 0x7c5   : > { %v2956_v33 = vmul.f32 %v4244_v47, %v2902_v2  ;;  %vm2962_vm12 = vweird.f32 %v4244_v47 }
 0x7c6   : > { %4245 = vrsqrt.f32 %v2903_v52  ;;  %vm2963_vm11 = vmor %vm2961_vm0, %vm2962_vm12  ;;  %vm2971_vm5 = vweird.f32 %v2903_v52 }
 0x7c7   : > { %v2957_v10 = vmul.f32 %v4244_v47, %v2956_v33 }
 0x7c9   : > { %v2958_v11 = vmul.f32 0.5, %v2957_v10  ;;  %v3036_v10 = vld [vmem:[%s4805_s7 + $0x60] sm:$0xff] }
 0x7ca   : > { %3435 = vmatpush.msrb.mxu0 %v3036_v10  ;;  %3901 = vmatpush.msrb.mxu2 %v3036_v10 }
 0x7cb   : > { %v2959_v15 = vsub.f32 1.5, %v2958_v11 }
 0x7cc   : > { %v4246_v53 = vpop.eup %4245 }
 0x7cd   : > { %v2960_v5 = vmul.f32 %v4244_v47, %v2959_v15  ;;  %v2966_v4 = vmul.f32 %v4246_v53, %v2903_v52  ;;  %vm2972_vm3 = vweird.f32 %v4246_v53 }
 0x7ce   : > { %vm2973_vm8 = vmor %vm2971_vm5, %vm2972_vm3 }
 0x7cf   : > { %v2964_v1 = vsel %vm2963_vm11, %v4244_v47, %v2960_v5  ;;  %v2967_v23 = vmul.f32 %v4246_v53, %v2966_v4  ;;  %v3035_v5 = vld [vmem:[%s4805_s7 + $0x58] sm:$0xff] }
 0x7d0   : > { %v2990_v55 = vmul.f32 %v2964_v1, %v6376_v26  ;;  %3436 = vmatpush.msrb.mxu0 %v3035_v5  ;;  %3902 = vmatpush.msrb.mxu2 %v3035_v5 }
 0x7d1   : > { %v2968_v16 = vmul.f32 0.5, %v2967_v23 }
 0x7d2   : > { %v3001_v24 = vmul.f32 %v6407_v7, %v2990_v55 }
 0x7d3   : > { %v2969_v63 = vsub.f32 1.5, %v2968_v16  ;;  %v3034_v16 = vld [vmem:[%s4805_s7 + $0x50] sm:$0xff] }
 0x7d4   : > { %v3012_v28 = vadd.f32 %v6412_v61, %v3001_v24  ;;  %3437 = vmatpush.msrb.mxu0 %v3034_v16  ;;  %3903 = vmatpush.msrb.mxu2 %v3034_v16 }
 0x7d5   : > { %v2970_v34 = vmul.f32 %v4246_v53, %v2969_v63 }
 0x7d6   : > { %3880 = vmatmul.msk.f32.gmra.mxu3 %vm759_vm1, %v3012_v28  ;;  %v3033_v28 = vld [vmem:[%s4805_s7 + $0x48] sm:$0xff] }
 0x7d7   : > { %v2974_v20 = vsel %vm2973_vm8, %v4246_v53, %v2970_v34  ;;  %3438 = vmatpush.msrb.mxu0 %v3033_v28  ;;  %3904 = vmatpush.msrb.mxu2 %v3033_v28 }
 0x7d8   : > { %v2991_v19 = vmul.f32 %v2974_v20, %v6383_v12 }
 0x7da   : > { %v3002_v17 = vmul.f32 %v6407_v7, %v2991_v19 }
 0x7dc   : > { %v3013_v25 = vadd.f32 %v6412_v61, %v3002_v17  ;;  %v3032_v17 = vld [vmem:[%s4805_s7 + $0x40] sm:$0xff] }
 0x7dd   : > { %3439 = vmatpush.msrb.mxu0 %v3032_v17  ;;  %3905 = vmatpush.msrb.mxu2 %v3032_v17 }
 0x7de   : > { %3881 = vmatmul.msk.f32.gmra.mxu3 %vm759_vm1, %v3013_v25 }
 0x7e3   : > { %v2888_v26 = vpop.xlane.xlu2 %2887 }
 0x7e4   : > { %v2896_v21 = vmul.f32 %v2888_v26, %v4825_v30 }
 0x7e6   : > { %v2904_v31 = vadd.f32 1e-05, %v2896_v21  ;;  %v3031_v21 = vld [vmem:[%s4805_s7 + $0x38] sm:$0xff] }
 0x7e7   : > { %3440 = vmatpush.msrb.mxu0 %v3031_v21  ;;  %3906 = vmatpush.msrb.mxu2 %v3031_v21 }
 0x7e8   : > { %4247 = vrsqrt.f32 %v2904_v31  ;;  %vm2981_vm7 = vweird.f32 %v2904_v31 }
 0x7ee   : > { %v4248_v56 = vpop.eup %4247 }
 0x7ef   : > { %v2976_v38 = vmul.f32 %v4248_v56, %v2904_v31  ;;  %vm2982_vm9 = vweird.f32 %v4248_v56 }
 0x7f0   : > { %vm2983_vm13 = vmor %vm2981_vm7, %vm2982_vm9 }
 0x7f1   : > { %v2977_v59 = vmul.f32 %v4248_v56, %v2976_v38 }
 0x7f3   : > { %v2978_v51 = vmul.f32 0.5, %v2977_v59 }
 0x7f5   : > { %v2979_v42 = vsub.f32 1.5, %v2978_v51  ;;  %v3030_v51 = vld [vmem:[%s4805_s7 + $0x30] sm:$0xff] }
 0x7f6   : > { %3441 = vmatpush.msrb.mxu0 %v3030_v51  ;;  %3907 = vmatpush.msrb.mxu2 %v3030_v51 }
 0x7f7   : > { %v2980_v41 = vmul.f32 %v4248_v56, %v2979_v42 }
 0x7f9   : > { %v2984_v12 = vsel %vm2983_vm13, %v4248_v56, %v2980_v41 }
 0x7fa   : > { %v2992_v30 = vmul.f32 %v2984_v12, %v6395_v3  ;;  %v3029_v12 = vld [vmem:[%s4805_s7 + $0x28] sm:$0xff] }
 0x7fb   : > { %3442 = vmatpush.msrb.mxu0 %v3029_v12  ;;  %3908 = vmatpush.msrb.mxu2 %v3029_v12 }
 0x7fc   : > { %v3003_v27 = vmul.f32 %v6407_v7, %v2992_v30 }
 0x7fd   : > { %3443 = vmatpush.msrb.mxu0 %v3028_v43  ;;  %3909 = vmatpush.msrb.mxu2 %v3028_v43 }
 0x7fe   : > { %v3014_v57 = vadd.f32 %v6412_v61, %v3003_v27 }
 0x800   : > { %v3085_v29 = vpop.f32.mrf.mxu3  ;;  %3882 = vmatmul.msk.f32.gmra.mxu3 %vm759_vm1, %v3014_v57 }
 0x801   : > { %v6457_v36 = vadd.f32 %v6452_v58, %v3085_v29 }
 0x803   : > { %v6461_v14 = vmul.f32 0.70710677, %v6457_v36  ;;  %v3109_v16 = vmul.f32 0.5, %v6457_v36  ;;  %v3024_v36 = vld [vmem:[%s4805_s7] sm:$0xff] }
 0x805   : > { %v3125_v39 = vand.u32 2147483647, %v6461_v14  ;;  %vm3389_vm11 = vcmp.lt.f32.partialorder %v6461_v14, 0.0 }
 0x807   : > { %v3133_v9 = vmul.f32 0.3275911, %v3125_v39  ;;  %v3341_v33 = vsub.f32 0.0, %v3125_v39 }
 0x809   : > { %v3141_v44 = vadd.f32 1.0, %v3133_v9  ;;  %v3349_v55 = vmul.f32 %v3341_v33, %v3125_v39  ;;  %v3026_v33 = vld [vmem:[%s4805_s7 + $0x10] sm:$0xff] }
 0x80b   : > { %4249 = vrcp.f32 %v3141_v44  ;;  %v3160_v46 = vand.u32 2147483648, %v3141_v44  ;;  %v3158_v61 = vand.u32 2147483647, %v3141_v44  ;;  %vm3154_vm6 = vweird.f32 %v3141_v44 }
 0x80c   : > { %v3357_v20 = vmul.f32 1.442695, %v3349_v55 }
 0x80d   : > { %v3161_v8 = vor.u32 1.1754944e-38, %v3160_v46  ;;  %vm3159_vm15 = vcmp.eq.f32.partialorder %v3158_v61, 8.507059e+37 }
 0x811   : > { %v4250_v3 = vpop.eup %4249 }
 0x812   : > { %v3150_v37 = vmul.f32 %v4250_v3, %v3141_v44  ;;  %v3088_v45 = vpop.f32.mrf.mxu3  ;;  %vm3155_vm10 = vweird.f32 %v4250_v3 }
 0x813   : > { %v6466_v18 = vadd.f32 %v6452_v58, %v3088_v45  ;;  %vm3156_vm14 = vmor %vm3154_vm6, %vm3155_vm10 }
 0x814   : > { %v3151_v7 = vsub.f32 1.0, %v3150_v37 }
 0x815   : > { %v6471_v2 = vmul.f32 0.70710677, %v6466_v18 }
 0x816   : > { %v3152_v50 = vmul.f32 %v4250_v3, %v3151_v7 }
 0x817   : > { %v6475_v47 = vand.u32 2147483647, %v6471_v2  ;;  %vm3390_vm7 = vcmp.lt.f32.partialorder %v6471_v2, 0.0 }
 0x818   : > { %v3153_v32 = vadd.f32 %v4250_v3, %v3152_v50 }
 0x819   : > { %v3134_v15 = vmul.f32 0.3275911, %v6475_v47  ;;  %v3342_v46 = vsub.f32 0.0, %v6475_v47 }
 0x81a   : > { %v3157_v22 = vsel %vm3156_vm14, %v4250_v3, %v3153_v32  ;;  %v3027_v32 = vld [vmem:[%s4805_s7 + $0x18] sm:$0xff] }
 0x81b   : > { %v3162_v52 = vsel %vm3159_vm15, %v3161_v8, %v3157_v22  ;;  %v3142_v1 = vadd.f32 1.0, %v3134_v15  ;;  %3444 = vmatpush.msrb.mxu0 %v3027_v32  ;;  %3910 = vmatpush.msrb.mxu2 %v3027_v32 }
 0x81c   : > { %v3269_v11 = vmul.f32 1.0614054, %v3162_v52  ;;  %v3091_v53 = vpop.f32.mrf.mxu3 }
 0x81d   : > { %v6481_v23 = vadd.f32 %v6452_v58, %v3091_v53  ;;  %4251 = vrcp.f32 %v3142_v1  ;;  %v3175_v29 = vand.u32 2147483648, %v3142_v1  ;;  %v3173_v57 = vand.u32 2147483647, %v3142_v1  ;;  %3445 = vmatpush.msrb.mxu0 %v3026_v33  ;;  %3911 = vmatpush.msrb.mxu2 %v3026_v33 }
 0x81e   : > { %v3277_v4 = vadd.f32 -1.4531521, %v3269_v11  ;;  %4253 = vpow2.f32 %v3357_v20  ;;  %vm3169_vm4 = vweird.f32 %v3142_v1 }
 0x81f   : > { %v6485_v63 = vmul.f32 0.70710677, %v6481_v23  ;;  %v3176_v37 = vor.u32 1.1754944e-38, %v3175_v29  ;;  %vm3174_vm0 = vcmp.eq.f32.partialorder %v3173_v57, 8.507059e+37 }
 0x820   : > { %v3285_v24 = vmul.f32 %v3277_v4, %v3162_v52 }
 0x821   : > { %v6489_v19 = vand.u32 2147483647, %v6485_v63  ;;  %vm3391_vm10 = vcmp.lt.f32.partialorder %v6485_v63, 0.0 }
 0x822   : > { %v3293_v34 = vadd.f32 1.4214138, %v3285_v24 }
 0x823   : > { %v3135_v26 = vmul.f32 0.3275911, %v6489_v19  ;;  %v4252_v31 = vpop.eup %4251  ;;  %v3343_v17 = vsub.f32 0.0, %v6489_v19 }
 0x824   : > { %v3301_v25 = vmul.f32 %v3293_v34, %v3162_v52  ;;  %v3165_v38 = vmul.f32 %v4252_v31, %v3142_v1  ;;  %vm3170_vm2 = vweird.f32 %v4252_v31  ;;  %v4254_v9 = vpop.eup %4253  ;;  %v3025_v1 = vld [vmem:[%s4805_s7 + $0x8] sm:$0xff] }
 0x825   : > { %v6494_v59 = vadd.f32 1.0, %v3135_v26  ;;  %vm3171_vm12 = vmor %vm3169_vm4, %vm3170_vm2  ;;  %3446 = vmatpush.msrb.mxu0 %v3025_v1  ;;  %3912 = vmatpush.msrb.mxu2 %v3025_v1  ;;  %v3351_v51 = vmul.f32 %v3343_v17, %v6489_v19  ;;  %v3111_v17 = vmul.f32 0.5, %v6481_v23 }
 0x826   : > { %v3309_v56 = vadd.f32 -0.28449672, %v3301_v25  ;;  %v3166_v41 = vsub.f32 1.0, %v3165_v38 }
 0x827   : > { %4255 = vrcp.f32 %v6494_v59  ;;  %v3190_v11 = vand.u32 2147483648, %v6494_v59  ;;  %v3188_v5 = vand.u32 2147483647, %v6494_v59  ;;  %vm3184_vm5 = vweird.f32 %v6494_v59  ;;  %3447 = vmatpush.msrb.mxu0 %v3024_v36  ;;  %3913 = vmatpush.msrb.mxu2 %v3024_v36 }
 0x828   : > { %v3317_v42 = vmul.f32 %v3309_v56, %v3162_v52  ;;  %v3167_v27 = vmul.f32 %v4252_v31, %v3166_v41  ;;  %v3361_v57 = vmul.f32 1.442695, %v3351_v51 }
 0x829   : > { %v3191_v24 = vor.u32 1.1754944e-38, %v3190_v11  ;;  %vm3189_vm9 = vcmp.eq.f32.partialorder %v3188_v5, 8.507059e+37 }
 0x82a   : > { %v3325_v30 = vadd.f32 0.2548296, %v3317_v42  ;;  %v3168_v44 = vadd.f32 %v4252_v31, %v3167_v27 }
 0x82c   : > { %v3333_v39 = vmul.f32 %v3325_v30, %v3162_v52  ;;  %v3172_v45 = vsel %vm3171_vm12, %v4252_v31, %v3168_v44  ;;  %v3350_v52 = vmul.f32 %v3342_v46, %v6475_v47 }
 0x82d   : > { %v4256_v7 = vpop.eup %4255  ;;  %v3177_v54 = vsel %vm3174_vm0, %v3176_v37, %v3172_v45 }
 0x82e   : > { %v3373_v3 = vmul.f32 %v4254_v9, %v3333_v39  ;;  %v3180_v61 = vmul.f32 %v4256_v7, %v6494_v59  ;;  %v3270_v8 = vmul.f32 1.0614054, %v3177_v54  ;;  %vm3185_vm3 = vweird.f32 %v4256_v7 }
 0x82f   : > { %vm3186_vm8 = vmor %vm3184_vm5, %vm3185_vm3  ;;  %v3359_v34 = vmul.f32 1.442695, %v3350_v52 }
 0x830   : > { %v3381_v50 = vsub.f32 1.0, %v3373_v3  ;;  %v3181_v22 = vsub.f32 1.0, %v3180_v61  ;;  %v3278_v10 = vadd.f32 -1.4531521, %v3270_v8 }
 0x831   : > { %4257 = vpow2.f32 %v3359_v34 }
 0x832   : > { %v3397_v0 = vsub.f32 0.0, %v3381_v50  ;;  %v3182_v53 = vmul.f32 %v4256_v7, %v3181_v22  ;;  %v3286_v55 = vmul.f32 %v3278_v10, %v3177_v54  ;;  %4259 = vpow2.f32 %v3361_v57 }
 0x833   : > { %v3110_v22 = vmul.f32 0.5, %v6466_v18 }
 0x834   : > { %v3405_v15 = vsel %vm3389_vm11, %v3397_v0, %v3381_v50  ;;  %v3183_v14 = vadd.f32 %v4256_v7, %v3182_v53  ;;  %v3294_v47 = vadd.f32 1.4214138, %v3286_v55 }
 0x835   : > { %v3413_v4 = vadd.f32 1.0, %v3405_v15 }
 0x836   : > { %v3187_v20 = vsel %vm3186_vm8, %v4256_v7, %v3183_v14  ;;  %v3302_v25 = vmul.f32 %v3294_v47, %v3177_v54 }
 0x837   : > { %v3421_v28 = vmul.f32 %v3413_v4, %v3109_v16  ;;  %v3192_v26 = vsel %vm3189_vm9, %v3191_v24, %v3187_v20  ;;  %v3094_v31 = vpop.f32.mrf.mxu3  ;;  %v4258_v9 = vpop.eup %4257 }
 0x838   : > { %v3271_v21 = vmul.f32 1.0614054, %v3192_v26  ;;  %v3310_v56 = vadd.f32 -0.28449672, %v3302_v25  ;;  %v6514_v38 = vadd.f32 %v6452_v58, %v3094_v31  ;;  %v4260_v33 = vpop.eup %4259 }
 0x839   : > { %3448 = vmatmul.f32.vlgmr.msrb.gmra.mxu0 %v3421_v28 }
 0x83a   : > { %v3279_v59 = vadd.f32 -1.4531521, %v3271_v21  ;;  %v3318_v42 = vmul.f32 %v3310_v56, %v3177_v54  ;;  %v6518_v41 = vmul.f32 0.70710677, %v6514_v38 }
 0x83c   : > { %v3287_v12 = vmul.f32 %v3279_v59, %v3192_v26  ;;  %v3326_v30 = vadd.f32 0.2548296, %v3318_v42  ;;  %v6521_v29 = vand.u32 2147483647, %v6518_v41  ;;  %vm3392_vm11 = vcmp.lt.f32.partialorder %v6518_v41, 0.0 }
 0x83e   : > { %v3295_v27 = vadd.f32 1.4214138, %v3287_v12  ;;  %v3334_v39 = vmul.f32 %v3326_v30, %v3177_v54  ;;  %v3136_v44 = vmul.f32 0.3275911, %v6521_v29  ;;  %v3344_v31 = vsub.f32 0.0, %v6521_v29 }
 0x83f   : > { %v3097_v37 = vpop.f32.mrf.mxu3 }
 0x840   : > { %v3303_v3 = vmul.f32 %v3295_v27, %v3192_v26  ;;  %v3374_v7 = vmul.f32 %v4258_v9, %v3334_v39  ;;  %v3144_v46 = vadd.f32 1.0, %v3136_v44  ;;  %v6525_v19 = vadd.f32 %v6452_v58, %v3097_v37 }
 0x841   : > { %v3352_v23 = vmul.f32 %v3344_v31, %v6521_v29 }
 0x842   : > { %v3311_v45 = vadd.f32 -0.28449672, %v3303_v3  ;;  %v3382_v50 = vsub.f32 1.0, %v3374_v7  ;;  %4261 = vrcp.f32 %v3144_v46  ;;  %v6528_v61 = vmul.f32 0.70710677, %v6525_v19 }
 0x843   : > { %v3205_v16 = vand.u32 2147483648, %v3144_v46  ;;  %v3203_v47 = vand.u32 2147483647, %v3144_v46  ;;  %vm3199_vm6 = vweird.f32 %v3144_v46 }
 0x844   : > { %v3398_v43 = vsub.f32 0.0, %v3382_v50  ;;  %v3319_v32 = vmul.f32 %v3311_v45, %v3192_v26  ;;  %v6532_v54 = vand.u32 2147483647, %v6528_v61  ;;  %v3363_v45 = vmul.f32 1.442695, %v3352_v23 }
 0x845   : > { %v3206_v34 = vor.u32 1.1754944e-38, %v3205_v16  ;;  %vm3204_vm15 = vcmp.eq.f32.partialorder %v3203_v47, 8.507059e+37 }
 0x846   : > { %v3406_v8 = vsel %vm3390_vm7, %v3398_v43, %v3382_v50  ;;  %v3327_v0 = vadd.f32 0.2548296, %v3319_v32  ;;  %v3137_v10 = vmul.f32 0.3275911, %v6532_v54  ;;  %v3345_v32 = vsub.f32 0.0, %v6532_v54 }
 0x847   : > { %v3414_v52 = vadd.f32 1.0, %v3406_v8  ;;  %vm3393_vm7 = vcmp.lt.f32.partialorder %v6528_v61, 0.0 }
 0x848   : > { %v3335_v11 = vmul.f32 %v3327_v0, %v3192_v26  ;;  %v4262_v15 = vpop.eup %4261  ;;  %v3145_v4 = vadd.f32 1.0, %v3137_v10 }
 0x849   : > { %v3422_v53 = vmul.f32 %v3414_v52, %v3110_v22  ;;  %v3195_v5 = vmul.f32 %v4262_v15, %v3144_v46  ;;  %vm3200_vm13 = vweird.f32 %v4262_v15 }
 0x84a   : > { %v3375_v1 = vmul.f32 %v4260_v33, %v3335_v11  ;;  %4263 = vrcp.f32 %v3145_v4  ;;  %vm3201_vm14 = vmor %vm3199_vm6, %vm3200_vm13  ;;  %v3220_v42 = vand.u32 2147483648, %v3145_v4  ;;  %v3218_v27 = vand.u32 2147483647, %v3145_v4 }
 0x84b   : > { %3451 = vmatmul.f32.gmra.mxu0 %v3422_v53  ;;  %v3196_v55 = vsub.f32 1.0, %v3195_v5  ;;  %vm3214_vm4 = vweird.f32 %v3145_v4  ;;  %4265 = vpow2.f32 %v3363_v45 }
 0x84c   : > { %v3383_v2 = vsub.f32 1.0, %v3375_v1  ;;  %v3221_v3 = vor.u32 1.1754944e-38, %v3220_v42  ;;  %vm3219_vm0 = vcmp.eq.f32.partialorder %v3218_v27, 8.507059e+37 }
 0x84d   : > { %v3197_v14 = vmul.f32 %v4262_v15, %v3196_v55 }
 0x84e   : > { %v3399_v24 = vsub.f32 0.0, %v3383_v2 }
 0x84f   : > { %v3198_v18 = vadd.f32 %v4262_v15, %v3197_v14 }
 0x850   : > { %v3407_v28 = vsel %vm3391_vm10, %v3399_v24, %v3383_v2  ;;  %v4264_v20 = vpop.eup %4263 }
 0x851   : > { %v3415_v25 = vadd.f32 1.0, %v3407_v28  ;;  %v3202_v26 = vsel %vm3201_vm14, %v4262_v15, %v3198_v18  ;;  %v3210_v36 = vmul.f32 %v4264_v20, %v3145_v4  ;;  %vm3215_vm2 = vweird.f32 %v4264_v20  ;;  %v4266_v14 = vpop.eup %4265 }
 0x852   : > { %v3207_v21 = vsel %vm3204_vm15, %v3206_v34, %v3202_v26  ;;  %vm3216_vm12 = vmor %vm3214_vm4, %vm3215_vm2  ;;  %v3353_v15 = vmul.f32 %v3345_v32, %v6532_v54 }
 0x853   : > { %v3423_v56 = vmul.f32 %v3415_v25, %v3111_v17  ;;  %v3272_v59 = vmul.f32 1.0614054, %v3207_v21  ;;  %v3211_v51 = vsub.f32 1.0, %v3210_v36 }
 0x854   : > { %v3365_v2 = vmul.f32 1.442695, %v3353_v15 }
 0x855   : > { %3454 = vmatmul.f32.gmra.mxu0 %v3423_v56  ;;  %v3280_v12 = vadd.f32 -1.4531521, %v3272_v59  ;;  %v3212_v30 = vmul.f32 %v4264_v20, %v3211_v51  ;;  %v3112_v59 = vmul.f32 0.5, %v6514_v38 }
 0x857   : > { %v3288_v39 = vmul.f32 %v3280_v12, %v3207_v21  ;;  %v3213_v44 = vadd.f32 %v4264_v20, %v3212_v30 }
 0x859   : > { %v3100_v63 = vpop.f32.mrf.mxu3  ;;  %v3296_v37 = vadd.f32 1.4214138, %v3288_v39  ;;  %v3217_v46 = vsel %vm3216_vm12, %v4264_v20, %v3213_v44 }
 0x85a   : > { %v6540_v57 = vadd.f32 %v6452_v58, %v3100_v63  ;;  %v3222_v43 = vsel %vm3219_vm0, %v3221_v3, %v3217_v46 }
 0x85b   : > { %v3304_v50 = vmul.f32 %v3296_v37, %v3207_v21  ;;  %v3273_v8 = vmul.f32 1.0614054, %v3222_v43 }
 0x85c   : > { %v6544_v9 = vmul.f32 0.70710677, %v6540_v57 }
 0x85d   : > { %v3312_v22 = vadd.f32 -0.28449672, %v3304_v50  ;;  %v3281_v10 = vadd.f32 -1.4531521, %v3273_v8 }
 0x85e   : > { %v6547_v7 = vand.u32 2147483647, %v6544_v9  ;;  %vm3394_vm15 = vcmp.lt.f32.partialorder %v6544_v9, 0.0 }
 0x85f   : > { %v3320_v11 = vmul.f32 %v3312_v22, %v3207_v21  ;;  %v3289_v5 = vmul.f32 %v3281_v10, %v3222_v43  ;;  %v3113_v10 = vmul.f32 0.5, %v6525_v19 }
 0x860   : > { %v3138_v29 = vmul.f32 0.3275911, %v6547_v7  ;;  %v3346_v38 = vsub.f32 0.0, %v6547_v7 }
 0x861   : > { %v3103_v0 = vpop.f32.mrf.mxu3  ;;  %v3328_v4 = vadd.f32 0.2548296, %v3320_v11  ;;  %v3297_v55 = vadd.f32 1.4214138, %v3289_v5 }
 0x862   : > { %v3146_v52 = vadd.f32 1.0, %v3138_v29  ;;  %v6552_v33 = vadd.f32 %v6452_v58, %v3103_v0  ;;  %v3354_v11 = vmul.f32 %v3346_v38, %v6547_v7 }
 0x863   : > { %v3336_v16 = vmul.f32 %v3328_v4, %v3207_v21  ;;  %v3305_v24 = vmul.f32 %v3297_v55, %v3222_v43 }
 0x864   : > { %4267 = vrcp.f32 %v3146_v52  ;;  %v6556_v53 = vmul.f32 0.70710677, %v6552_v33  ;;  %v3235_v51 = vand.u32 2147483648, %v3146_v52  ;;  %v3233_v12 = vand.u32 2147483647, %v3146_v52 }
 0x865   : > { %v3376_v28 = vmul.f32 %v4266_v14, %v3336_v16  ;;  %4269 = vpow2.f32 %v3365_v2  ;;  %v3313_v17 = vadd.f32 -0.28449672, %v3305_v24  ;;  %vm3229_vm5 = vweird.f32 %v3146_v52 }
 0x866   : > { %v6559_v1 = vand.u32 2147483647, %v6556_v53  ;;  %v3236_v37 = vor.u32 1.1754944e-38, %v3235_v51  ;;  %vm3234_vm9 = vcmp.eq.f32.partialorder %v3233_v12, 8.507059e+37  ;;  %v3367_v61 = vmul.f32 1.442695, %v3354_v11 }
 0x867   : > { %v3384_v20 = vsub.f32 1.0, %v3376_v28  ;;  %v3321_v36 = vmul.f32 %v3313_v17, %v3222_v43  ;;  %vm3395_vm2 = vcmp.lt.f32.partialorder %v6556_v53, 0.0  ;;  %v3115_v9 = vmul.f32 0.5, %v6552_v33 }
 0x868   : > { %v3139_v47 = vmul.f32 0.3275911, %v6559_v1  ;;  %v3347_v24 = vsub.f32 0.0, %v6559_v1 }
 0x869   : > { %v3400_v26 = vsub.f32 0.0, %v3384_v20  ;;  %v3329_v21 = vadd.f32 0.2548296, %v3321_v36 }
 0x86a   : > { %v4268_v18 = vpop.eup %4267  ;;  %v3147_v54 = vadd.f32 1.0, %v3139_v47  ;;  %v3355_v7 = vmul.f32 %v3347_v24, %v6559_v1 }
 0x86b   : > { %v3225_v34 = vmul.f32 %v4268_v18, %v3146_v52  ;;  %v3408_v56 = vsel %vm3392_vm11, %v3400_v26, %v3384_v20  ;;  %v4270_v63 = vpop.eup %4269  ;;  %vm3230_vm3 = vweird.f32 %v4268_v18  ;;  %v3337_v30 = vmul.f32 %v3329_v21, %v3222_v43 }
 0x86c   : > { %4271 = vrcp.f32 %v3147_v54  ;;  %v3416_v42 = vadd.f32 1.0, %v3408_v56  ;;  %vm3231_vm8 = vmor %vm3229_vm5, %vm3230_vm3  ;;  %v3250_v43 = vand.u32 2147483648, %v3147_v54  ;;  %v3248_v0 = vand.u32 2147483647, %v3147_v54 }
 0x86d   : > { %v3226_v25 = vsub.f32 1.0, %v3225_v34  ;;  %v3377_v44 = vmul.f32 %v4270_v63, %v3337_v30  ;;  %vm3244_vm10 = vweird.f32 %v3147_v54  ;;  %4273 = vpow2.f32 %v3367_v61 }
 0x86e   : > { %v3424_v23 = vmul.f32 %v3416_v42, %v3112_v59  ;;  %v3251_v55 = vor.u32 1.1754944e-38, %v3250_v43  ;;  %vm3249_vm14 = vcmp.eq.f32.partialorder %v3248_v0, 8.507059e+37  ;;  %v3369_v36 = vmul.f32 1.442695, %v3355_v7 }
 0x86f   : > { %v3227_v31 = vmul.f32 %v4268_v18, %v3226_v25  ;;  %v3385_v46 = vsub.f32 1.0, %v3377_v44 }
 0x870   : > { %3457 = vmatmul.f32.gmra.mxu0 %v3424_v23  ;;  %4275 = vpow2.f32 %v3369_v36 }
 0x871   : > { %v3228_v3 = vadd.f32 %v4268_v18, %v3227_v31  ;;  %v3401_v29 = vsub.f32 0.0, %v3385_v46 }
 0x872   : > { %v4272_v27 = vpop.eup %4271 }
 0x873   : > { %v3240_v39 = vmul.f32 %v4272_v27, %v3147_v54  ;;  %v3232_v45 = vsel %vm3231_vm8, %v4268_v18, %v3228_v3  ;;  %vm3245_vm13 = vweird.f32 %v4272_v27  ;;  %v3409_v22 = vsel %vm3393_vm7, %v3401_v29, %v3385_v46  ;;  %v4274_v59 = vpop.eup %4273 }
 0x874   : > { %v3237_v50 = vsel %vm3234_vm9, %v3236_v37, %v3232_v45  ;;  %v3417_v15 = vadd.f32 1.0, %v3409_v22  ;;  %vm3246_vm6 = vmor %vm3244_vm10, %vm3245_vm13  ;;  %v3114_v37 = vmul.f32 0.5, %v6540_v57 }
 0x875   : > { %v3241_v41 = vsub.f32 1.0, %v3240_v39  ;;  %v3274_v8 = vmul.f32 1.0614054, %v3237_v50 }
 0x876   : > { %v3425_v2 = vmul.f32 %v3417_v15, %v3113_v10  ;;  %v4276_v46 = vpop.eup %4275 }
 0x877   : > { %v3242_v32 = vmul.f32 %v4272_v27, %v3241_v41  ;;  %v3282_v52 = vadd.f32 -1.4531521, %v3274_v8 }
 0x878   : > { %3460 = vmatmul.f32.gmra.mxu0 %v3425_v2 }
 0x879   : > { %v3290_v5 = vmul.f32 %v3282_v52, %v3237_v50  ;;  %v3243_v4 = vadd.f32 %v4272_v27, %v3242_v32 }
 0x87b   : > { %v3298_v16 = vadd.f32 1.4214138, %v3290_v5  ;;  %v3247_v14 = vsel %vm3246_vm6, %v4272_v27, %v3243_v4 }
 0x87c   : > { %v3252_v47 = vsel %vm3249_vm14, %v3251_v55, %v3247_v14 }
 0x87d   : > { %v3306_v18 = vmul.f32 %v3298_v16, %v3237_v50  ;;  %v3275_v28 = vmul.f32 1.0614054, %v3252_v47 }
 0x87f   : > { %v3314_v19 = vadd.f32 -0.28449672, %v3306_v18  ;;  %v3283_v34 = vadd.f32 -1.4531521, %v3275_v28 }
 0x881   : > { %v3322_v54 = vmul.f32 %v3314_v19, %v3237_v50  ;;  %v3291_v20 = vmul.f32 %v3283_v34, %v3252_v47 }
 0x883   : > { %v3330_v17 = vadd.f32 0.2548296, %v3322_v54  ;;  %v3299_v25 = vadd.f32 1.4214138, %v3291_v20  ;;  %v3106_v26 = vpop.f32.mrf.mxu3  ;;  %v4086_v20 = vld [vmem:[%s721_s8] ss:$0 sm:$0xff] }
 0x884   : > { %v6571_v31 = vadd.f32 %v6452_v58, %v3106_v26 }
 0x885   : > { %v3338_v56 = vmul.f32 %v3330_v17, %v3237_v50  ;;  %v3307_v21 = vmul.f32 %v3299_v25, %v3252_v47 }
 0x886   : > { %v6574_v51 = vmul.f32 0.70710677, %v6571_v31 }
 0x887   : > { %v3378_v42 = vmul.f32 %v4274_v59, %v3338_v56  ;;  %v3315_v63 = vadd.f32 -0.28449672, %v3307_v21  ;;  %v3116_v21 = vmul.f32 0.5, %v6571_v31 }
 0x888   : > { %v3132_v1 = vand.u32 2147483647, %v6574_v51  ;;  %vm3396_vm3 = vcmp.lt.f32.partialorder %v6574_v51, 0.0 }
 0x889   : > { %v3386_v12 = vsub.f32 1.0, %v3378_v42  ;;  %v3323_v30 = vmul.f32 %v3315_v63, %v3252_v47 }
 0x88a   : > { %v3140_v27 = vmul.f32 0.3275911, %v3132_v1  ;;  %v3348_v53 = vsub.f32 0.0, %v3132_v1 }
 0x88b   : > { %v3402_v23 = vsub.f32 0.0, %v3386_v12  ;;  %v3331_v39 = vadd.f32 0.2548296, %v3323_v30 }
 0x88c   : > { %v3148_v58 = vadd.f32 1.0, %v3140_v27  ;;  %v3356_v33 = vmul.f32 %v3348_v53, %v3132_v1 }
 0x88d   : > { %v3410_v44 = vsel %vm3394_vm15, %v3402_v23, %v3386_v12  ;;  %v3339_v3 = vmul.f32 %v3331_v39, %v3252_v47 }
 0x88e   : > { %v3418_v41 = vadd.f32 1.0, %v3410_v44  ;;  %4277 = vrcp.f32 %v3148_v58  ;;  %v3265_v52 = vand.u32 2147483648, %v3148_v58  ;;  %v3263_v11 = vand.u32 2147483647, %v3148_v58 }
 0x88f   : > { %v3379_v38 = vmul.f32 %v4276_v46, %v3339_v3  ;;  %vm3259_vm12 = vweird.f32 %v3148_v58  ;;  %v3371_v47 = vmul.f32 1.442695, %v3356_v33 }
 0x890   : > { %v3426_v45 = vmul.f32 %v3418_v41, %v3114_v37  ;;  %v3266_v5 = vor.u32 1.1754944e-38, %v3265_v52  ;;  %vm3264_vm11 = vcmp.eq.f32.partialorder %v3263_v11, 8.507059e+37 }
 0x891   : > { %v3387_v50 = vsub.f32 1.0, %v3379_v38  ;;  %4279 = vpow2.f32 %v3371_v47 }
 0x892   : > { %3463 = vmatmul.f32.gmra.mxu0 %v3426_v45 }
 0x893   : > { %v3403_v32 = vsub.f32 0.0, %v3387_v50 }
 0x894   : > { %v4278_v29 = vpop.eup %4277 }
 0x895   : > { %v3255_v8 = vmul.f32 %v4278_v29, %v3148_v58  ;;  %v3411_v43 = vsel %vm3395_vm2, %v3403_v32, %v3387_v50  ;;  %vm3260_vm4 = vweird.f32 %v4278_v29 }
 0x896   : > { %v3419_v0 = vadd.f32 1.0, %v3411_v43  ;;  %vm3261_vm0 = vmor %vm3259_vm12, %vm3260_vm4 }
 0x897   : > { %v3256_v22 = vsub.f32 1.0, %v3255_v8  ;;  %v4280_v7 = vpop.eup %4279 }
 0x898   : > { %v3427_v10 = vmul.f32 %v3419_v0, %v3115_v9 }
 0x899   : > { %v3257_v57 = vmul.f32 %v4278_v29, %v3256_v22 }
 0x89a   : > { %3466 = vmatmul.f32.gmra.mxu0 %v3427_v10 }
 0x89b   : > { %v3258_v15 = vadd.f32 %v4278_v29, %v3257_v57 }
 0x89d   : > { %v3262_v4 = vsel %vm3261_vm0, %v4278_v29, %v3258_v15 }
 0x89e   : > { %v3267_v55 = vsel %vm3264_vm11, %v3266_v5, %v3262_v4 }
 0x89f   : > { %v3276_v2 = vmul.f32 1.0614054, %v3267_v55 }
 0x8a1   : > { %v3284_v16 = vadd.f32 -1.4531521, %v3276_v2 }
 0x8a3   : > { %v3292_v14 = vmul.f32 %v3284_v16, %v3267_v55 }
 0x8a5   : > { %v3300_v61 = vadd.f32 1.4214138, %v3292_v14 }
 0x8a7   : > { %v3308_v24 = vmul.f32 %v3300_v61, %v3267_v55 }
 0x8a9   : > { %v3316_v18 = vadd.f32 -0.28449672, %v3308_v24 }
 0x8ab   : > { %v3324_v28 = vmul.f32 %v3316_v18, %v3267_v55 }
 0x8ad   : > { %v3332_v19 = vadd.f32 0.2548296, %v3324_v28 }
 0x8af   : > { %v3340_v34 = vmul.f32 %v3332_v19, %v3267_v55 }
 0x8b1   : > { %v3380_v54 = vmul.f32 %v4280_v7, %v3340_v34 }
 0x8b3   : > { %v3388_v17 = vsub.f32 1.0, %v3380_v54 }
 0x8b5   : > { %v3404_v25 = vsub.f32 0.0, %v3388_v17 }
 0x8b6   : > { %v3449_v26 = vpop.f32.mrf.mxu0 }
 0x8b7   : > { %v3450_v36 = vadd.f32 %v4086_v20, %v3449_v26  ;;  %v3412_v56 = vsel %vm3396_vm3, %v3404_v25, %v3388_v17 }
 0x8b8   : > { %v3420_v59 = vadd.f32 1.0, %v3412_v56 }
 0x8b9   : > { %v3473_v42 = vadd.f32 %v3450_v36, %v6307_v62 }
 0x8ba   : > { %v3428_v63 = vmul.f32 %v3420_v59, %v3116_v21 }
 0x8bb   : > { %3481 = vst.msk [vmem:[#allocation2] sm:$0xff] %vm759_vm1, %v3473_v42 }
 0x8bc   : > { %3469 = vmatmul.f32.vlgmr.msrb.gmra.mxu2 %v3428_v63 }
 0x8c8   : > { %v3452_v1 = vpop.f32.mrf.mxu0 }
 0x8c9   : > { %v3453_v12 = vadd.f32 %v4086_v20, %v3452_v1 }
 0x8cb   : > { %v3474_v30 = vadd.f32 %v3453_v12, %v6311_v60 }
 0x8cd   : > { %3482 = vst.msk [vmem:[#allocation2 + $0x8] sm:$0xff] %vm759_vm1, %v3474_v30 }
 0x8d2   : > { %v3455_v27 = vpop.f32.mrf.mxu0 }
 0x8d3   : > { %v3456_v23 = vadd.f32 %v4086_v20, %v3455_v27 }
 0x8d5   : > { %v3475_v51 = vadd.f32 %v3456_v23, %v6315_v35 }
 0x8d7   : > { %3483 = vst.msk [vmem:[#allocation2 + $0x10] sm:$0xff] %vm759_vm1, %v3475_v51 }
 0x8ed   : > { %v3458_v31 = vpop.f32.mrf.mxu0 }
 0x8ee   : > { %v3459_v39 = vadd.f32 %v4086_v20, %v3458_v31 }
 0x8f0   : > { %v3476_v62 = vadd.f32 %v3459_v39, %v6319_v13 }
 0x8f2   : > { %3484 = vst.msk [vmem:[#allocation2 + $0x18] sm:$0xff] %vm759_vm1, %v3476_v62 }
 0x8f5   : > { %v3461_v58 = vpop.f32.mrf.mxu0 }
 0x8f6   : > { %v3462_v44 = vadd.f32 %v4086_v20, %v3461_v58 }
 0x8f8   : > { %v3477_v3 = vadd.f32 %v3462_v44, %v6323_v6 }
 0x8fa   : > { %3485 = vst.msk [vmem:[#allocation2 + $0x20] sm:$0xff] %vm759_vm1, %v3477_v3 }
 0x90f   : > { %v3464_v60 = vpop.f32.mrf.mxu0 }
 0x910   : > { %v3465_v37 = vadd.f32 %v4086_v20, %v3464_v60 }
 0x912   : > { %v3478_v41 = vadd.f32 %v3465_v37, %v6327_v49 }
 0x914   : > { %3486 = vst.msk [vmem:[#allocation2 + $0x28] sm:$0xff] %vm759_vm1, %v3478_v41 }
 0x917   : > { %v3467_v35 = vpop.f32.mrf.mxu0 }
 0x918   : > { %v3468_v46 = vadd.f32 %v4086_v20, %v3467_v35 }
 0x91a   : > { %v3479_v45 = vadd.f32 %v3468_v46, %v6331_v40 }
 0x91c   : > { %3487 = vst.msk [vmem:[#allocation2 + $0x30] sm:$0xff] %vm759_vm1, %v3479_v45 }
 0x93f   : > { %v3470_v13 = vpop.f32.mrf.mxu2 }
 0x940   : > { %v3471_v38 = vadd.f32 %v4086_v20, %v3470_v13  ;;  %3492 = sbr.rel (%p3883_p3) target bundleno = 2381 (0x94d), region = 100 }
 0x942   : > { %v3480_v50 = vadd.f32 %v3471_v38, %v6342_v48 }
 0x944   : > { %3488 = vst.msk [vmem:[#allocation2 + $0x38] sm:$0xff] %vm759_vm1, %v3480_v50 }
 0x945   : > { %3493 = vst.msk [vmem:[%s4814_s26] sm:$0xff] %vm759_vm1, %v3473_v42 }
 0x946   : > { %3494 = vst.msk [vmem:[%s4814_s26 + $0x8] sm:$0xff] %vm759_vm1, %v3474_v30 }
 0x947   : > { %3495 = vst.msk [vmem:[%s4814_s26 + $0x10] sm:$0xff] %vm759_vm1, %v3475_v51 }
 0x948   : > { %3496 = vst.msk [vmem:[%s4814_s26 + $0x18] sm:$0xff] %vm759_vm1, %v3476_v62 }
 0x949   : > { %3497 = vst.msk [vmem:[%s4814_s26 + $0x20] sm:$0xff] %vm759_vm1, %v3477_v3 }
 0x94a   : > { %3498 = vst.msk [vmem:[%s4814_s26 + $0x28] sm:$0xff] %vm759_vm1, %v3478_v41 }
 0x94b   : > { %3499 = vst.msk [vmem:[%s4814_s26 + $0x30] sm:$0xff] %vm759_vm1, %v3479_v45 }
 0x94c   : > { %3500 = vst.msk [vmem:[%s4814_s26 + $0x38] sm:$0xff] %vm759_vm1, %v3480_v50 }
 0x94d PF: > { %s34_s28 = sadd.s32 1, %s4547_s28   ;;  %s6752_s8 = sld [smem:[#allocation17_spill]] }
 0x94e   : > { %p31_p4 = scmp.ge.s32.totalorder %s34_s28, 8   ;;  %s6753_s23 = sld [smem:[#allocation22_spill]] }
 0x94f   : > { %s6754_s24 = sld [smem:[#allocation18_spill]]  ;;  %s6758_s21 = smov %s4523_s22 }
 0x950   : > { %s6755_s25 = sld [smem:[#allocation19_spill]]  ;;  %33 = sbr.rel (!%p31_p4) target bundleno = 24 (0x18), region = 195 }
 0x951   : > { %s6756_s26 = sld [smem:[#allocation20_spill]] }
 0x952   : > { %s6757_s27 = sld [smem:[#allocation21_spill]] }
 0x953   : > { %s6759_s22 = smov %s6752_s8 }
 0x955   :  { %3523 = vsyncpa [#allocation4], 1 }
 0x956   :  { %3525 = vsyncpa [#allocation4 + $0x1], 1 }
 0x957   :  { %3526 = vsyncpa [#allocation6], 1 }
 0x958   :  { %3528 = vsyncpa [#allocation6 + $0x1], 1 }
 0x959   :  { %3529 = vsyncpa [#allocation9], 1 }
 0x95a   :  { %3531 = vsyncpa [#allocation9 + $0x1], 1 }
 0x95b   :  { %3532 = vsyncpa [#allocation12], 1 }
 0x95c   :  { %3534 = vsyncpa [#allocation12 + $0x1], 1 }

</bundles_post_ra>
